<compile_context>
chip_gen: v7x
topology: tpu7x:2x2x1
jax: 0.10.0
libtpu: 0.0.40
codegen_flags: <defaults>
</compile_context>

<pallas_src>
import functools

import jax
import jax.numpy as jnp
from jax import lax
from jax.experimental import pallas as pl
from jax.experimental.pallas import tpu as pltpu


# ------------------------------ small helpers ------------------------------

def _ln_f32(x, g, b, eps):
    """LayerNorm with statistics in f32.  x:(S,D) f32, g/b:(1,D) f32."""
    mu = jnp.mean(x, axis=-1, keepdims=True)
    var = jnp.mean(jnp.square(x - mu), axis=-1, keepdims=True)
    return (x - mu) * lax.rsqrt(var + eps) * g + b


def _const_spec(arr):
    """BlockSpec for a weight that is fully resident and grid-invariant."""
    nd = arr.ndim
    return pl.BlockSpec(arr.shape, lambda b, _nd=nd: (0,) * _nd)


def _tile(dim, pref):
    """Pick a tile size: `pref` if it divides `dim`, else the full dim."""
    if dim <= pref or dim % pref != 0:
        return dim
    return pref


_VMEM_LIMIT = 48 * 1024 * 1024     # headroom under v7x's 64 MiB physical VMEM


# ---------------------- tiled matmul (patch embedding) ----------------------

def _matmul_kernel(x_ref, w_ref, o_ref, acc_ref):
    @pl.when(pl.program_id(2) == 0)
    def _():
        acc_ref[...] = jnp.zeros_like(acc_ref)
    acc_ref[...] += jnp.dot(x_ref[...].astype(jnp.bfloat16), w_ref[...],
                            preferred_element_type=jnp.float32)

    @pl.when(pl.program_id(2) == pl.num_programs(2) - 1)
    def _():
        o_ref[...] = acc_ref[...].astype(o_ref.dtype)


def matmul_pallas(x, w, tm=256, tn=256, tk=256):
    """x:(M,K) f32, w:(K,N) bf16 -> (M,N) f32.  K-tiled f32 accumulation."""
    M, K = x.shape
    N = w.shape[1]
    tm, tn, tk = _tile(M, tm), _tile(N, tn), _tile(K, tk)
    grid = (M // tm, N // tn, K // tk)
    return pl.pallas_call(
        _matmul_kernel,
        grid=grid,
        in_specs=[pl.BlockSpec((tm, tk), lambda i, j, k: (i, k)),
                  pl.BlockSpec((tk, tn), lambda i, j, k: (k, j))],
        out_specs=pl.BlockSpec((tm, tn), lambda i, j, k: (i, j)),
        out_shape=jax.ShapeDtypeStruct((M, N), jnp.float32),
        scratch_shapes=[pltpu.VMEM((tm, tn), jnp.float32)],
        compiler_params=pltpu.CompilerParams(
            dimension_semantics=("parallel", "parallel", "arbitrary"),
            vmem_limit_bytes=_VMEM_LIMIT),
    )(x, w)


# ------------------- prelude: (+pos_emb) then ln_pre, fused -------------------

def _prelude_kernel(eps, x_ref, pos_ref, g_ref, b_ref, o_ref):
    x = x_ref[0].astype(jnp.float32) + pos_ref[...].astype(jnp.float32)
    o_ref[0] = _ln_f32(x, g_ref[...], b_ref[...], eps).astype(o_ref.dtype)


def prelude_pallas(xseq, pos, g, b, eps=1e-5):
    B, S, w = xseq.shape
    xspec = pl.BlockSpec((1, S, w), lambda bb: (bb, 0, 0))
    return pl.pallas_call(
        functools.partial(_prelude_kernel, eps),
        grid=(B,),
        in_specs=[xspec, _const_spec(pos), _const_spec(g), _const_spec(b)],
        out_specs=xspec,
        out_shape=jax.ShapeDtypeStruct((B, S, w), xseq.dtype),
        compiler_params=pltpu.CompilerParams(
            dimension_semantics=("parallel",)),
    )(xseq, pos, g, b)


# ------------------ fused pre-LN transformer block (1 call) ------------------

def _block_kernel(heads, eps, x_ref, ln1g_ref, ln1b_ref, qkvw_ref, qkvb_ref,
                  outw_ref, outb_ref, ln2g_ref, ln2b_ref, fcw_ref, fcb_ref,
                  projw_ref, projb_ref, o_ref):
    x = x_ref[0].astype(jnp.float32)                      # (S, w)
    S, w = x.shape
    hd = w // heads
    scale = 1.0 / float(hd) ** 0.5

    # ---- x = x + out_proj(MHA(ln_1(x)))  (all heads, one grid step) ----
    h = _ln_f32(x, ln1g_ref[...], ln1b_ref[...], eps)
    h_bf = h.astype(jnp.bfloat16)
    attn = jnp.zeros((S, w), jnp.float32)
    for i in range(heads):                                # unrolled at trace
        q = jnp.dot(h_bf, qkvw_ref[i],
                    preferred_element_type=jnp.float32) + qkvb_ref[i]
        k = jnp.dot(h_bf, qkvw_ref[heads + i],
                    preferred_element_type=jnp.float32) + qkvb_ref[heads + i]
        v = jnp.dot(h_bf, qkvw_ref[2 * heads + i],
                    preferred_element_type=jnp.float32) + qkvb_ref[2 * heads + i]
        s = lax.dot_general(q.astype(jnp.bfloat16), k.astype(jnp.bfloat16),
                            (((1,), (1,)), ((), ())),
                            preferred_element_type=jnp.float32) * scale
        s = s - jnp.max(s, axis=-1, keepdims=True)
        p = jnp.exp(s)
        p = p * pl.reciprocal(jnp.sum(p, axis=-1, keepdims=True), approx=True)
        o = jnp.dot(p.astype(jnp.bfloat16), v.astype(jnp.bfloat16),
                    preferred_element_type=jnp.float32)
        # concat-of-heads @ W_out  ==  sum_h  o_h @ W_out[h-rows]
        attn = attn + jnp.dot(o.astype(jnp.bfloat16), outw_ref[i],
                              preferred_element_type=jnp.float32)
    x1 = x + attn + outb_ref[...]                         # fused residual

    # ---- x = x + mlp(ln_2(x))  (QuickGELU) ----
    h2 = _ln_f32(x1, ln2g_ref[...], ln2b_ref[...], eps)
    h2 = jnp.dot(h2.astype(jnp.bfloat16), fcw_ref[...],
                 preferred_element_type=jnp.float32) + fcb_ref[...]
    h2 = h2 * jax.nn.sigmoid(1.702 * h2)                  # QuickGELU in f32
    h2 = jnp.dot(h2.astype(jnp.bfloat16), projw_ref[...],
                 preferred_element_type=jnp.float32) + projb_ref[...]
    o_ref[0] = (x1 + h2).astype(o_ref.dtype)              # fused residual


def block_pallas(x, blk, heads, eps=1e-5):
    B, S, w = x.shape
    wargs = [blk["ln1_g"], blk["ln1_b"], blk["qkv_w"], blk["qkv_b"],
             blk["out_w"], blk["out_b"], blk["ln2_g"], blk["ln2_b"],
             blk["fc_w"], blk["fc_b"], blk["proj_w"], blk["proj_b"]]
    xspec = pl.BlockSpec((1, S, w), lambda bb: (bb, 0, 0))
    return pl.pallas_call(
        functools.partial(_block_kernel, heads, eps),
        grid=(B,),
        in_specs=[xspec] + [_const_spec(a) for a in wargs],
        out_specs=xspec,
        out_shape=jax.ShapeDtypeStruct((B, S, w), x.dtype),
        compiler_params=pltpu.CompilerParams(
            dimension_semantics=("parallel",),
            vmem_limit_bytes=_VMEM_LIMIT),
    )(x, *wargs)


# ------- ln_post(cls) + visual projection + classifier head, one call -------

def _post_head_kernel(eps, cls_ref, g_ref, b_ref, p_ref,
                      w1_ref, w2_ref, w3_ref, w4_ref, w5_ref,
                      feat_ref, out_ref, margin_ref):
    # feats = ln_post(cls) @ visual.proj
    y = _ln_f32(cls_ref[...].astype(jnp.float32), g_ref[...], b_ref[...], eps)
    f = jnp.dot(y.astype(jnp.bfloat16), p_ref[...],
                preferred_element_type=jnp.float32)           # (B, feat_dim)
    feat_ref[...] = f.astype(feat_ref.dtype)
    # CLIP.hashing: nn.Dropout(p=0.2) — identity in eval/inference mode.
    fb = f.astype(jnp.bfloat16)
    # logits = linear1(feats)   (bias=False; weight zero-padded to 128 lanes)
    out_ref[...] = jnp.dot(fb, w1_ref[...],
                           preferred_element_type=jnp.float32
                           ).astype(out_ref.dtype)
    # margin = linear5(relu(linear4(relu(linear3(relu(linear2(feats)))))))
    m = jnp.maximum(jnp.dot(fb, w2_ref[...],
                            preferred_element_type=jnp.float32), 0.0)
    m = jnp.maximum(jnp.dot(m.astype(jnp.bfloat16), w3_ref[...],
                            preferred_element_type=jnp.float32), 0.0)
    m = jnp.maximum(jnp.dot(m.astype(jnp.bfloat16), w4_ref[...],
                            preferred_element_type=jnp.float32), 0.0)
    m = jnp.dot(m.astype(jnp.bfloat16), w5_ref[...],
                preferred_element_type=jnp.float32)           # (B, 128 padded)
    # torch.norm(margin, p=2, dim=0): L2 over the batch dim
    margin_ref[...] = jnp.sqrt(jnp.sum(m * m, axis=0, keepdims=True)
                               ).astype(margin_ref.dtype)


def post_head_pallas(cls_tok, g, b, proj, w1, w2, w3, w4, w5,
                     num_classes, eps=1e-5):
    B = cls_tok.shape[0]
    feat_dim = proj.shape[1]
    feats, out_pad, margin_pad = pl.pallas_call(
        functools.partial(_post_head_kernel, eps),
        out_shape=(jax.ShapeDtypeStruct((B, feat_dim), jnp.float32),
                   jax.ShapeDtypeStruct((B, w1.shape[1]), jnp.float32),
                   jax.ShapeDtypeStruct((1, w5.shape[1]), jnp.float32)),
        compiler_params=pltpu.CompilerParams(vmem_limit_bytes=_VMEM_LIMIT),
    )(cls_tok, g, b, proj, w1, w2, w3, w4, w5)
    return feats, out_pad[:, :num_classes], margin_pad[0, :3]


# ------------------------ parameters (deterministic) ------------------------

def init_params(key, cfg):
    ks = iter(jax.random.split(key, 128))

    def nrm(shape, std=0.02):
        return jax.random.normal(next(ks), shape, jnp.float32) * std

    w, heads = cfg["width"], cfg["heads"]
    hd = w // heads
    C, P = cfg["in_ch"], cfg["patch"]
    p = {}

    # CLIP visual encoder (scaled-down ViT-B/32 structure), pre-transposed.
    conv_w = nrm((w, C, P, P))                                   # torch layout
    p["conv1_w"] = conv_w.reshape(w, C * P * P).T.astype(jnp.bfloat16)
    p["class_emb"] = nrm((1, w))
    p["pos_emb"] = nrm((cfg["n_tokens"], w))
    p["ln_pre_g"] = jnp.ones((1, w), jnp.float32)
    p["ln_pre_b"] = jnp.zeros((1, w), jnp.float32)

    blocks = []
    for _ in range(cfg["layers"]):
        qkv_w_t = nrm((3 * w, w))            # torch in_proj_weight (3w, w)
        qkv_b_t = jnp.zeros((3 * w,), jnp.float32)
        out_w_t = nrm((w, w))                # torch out_proj.weight
        ws, bs = [], []
        for part in range(3):                # q, k, v
            wp = qkv_w_t[part * w:(part + 1) * w]
            bp = qkv_b_t[part * w:(part + 1) * w]
            for h in range(heads):
                ws.append(wp[h * hd:(h + 1) * hd, :].T)          # (w, hd)
                bs.append(bp[h * hd:(h + 1) * hd].reshape(1, hd))
        out_heads = [out_w_t.T[h * hd:(h + 1) * hd, :] for h in range(heads)]
        blocks.append(dict(
            ln1_g=jnp.ones((1, w), jnp.float32),
            ln1_b=jnp.zeros((1, w), jnp.float32),
            qkv_w=jnp.stack(ws).astype(jnp.bfloat16),            # (3H, w, hd)
            qkv_b=jnp.stack(bs),                                 # (3H, 1, hd)
            out_w=jnp.stack(out_heads).astype(jnp.bfloat16),     # (H, hd, w)
            out_b=jnp.zeros((1, w), jnp.float32),
            ln2_g=jnp.ones((1, w), jnp.float32),
            ln2_b=jnp.zeros((1, w), jnp.float32),
            fc_w=nrm((4 * w, w)).T.astype(jnp.bfloat16),         # (w, 4w)
            fc_b=jnp.zeros((1, 4 * w), jnp.float32),
            proj_w=nrm((w, 4 * w)).T.astype(jnp.bfloat16),       # (4w, w)
            proj_b=jnp.zeros((1, w), jnp.float32),
        ))
    p["blocks"] = blocks
    p["ln_post_g"] = jnp.ones((1, w), jnp.float32)
    p["ln_post_b"] = jnp.zeros((1, w), jnp.float32)
    p["vis_proj"] = nrm((w, cfg["feat_dim"])).astype(jnp.bfloat16)

    # CLIPModel classifier head (all bias=False); out dims zero-padded to 128
    # lanes so the kernel issues unmasked lane-dense stores.
    fd, nc = cfg["feat_dim"], cfg["num_classes"]

    def padded_t(wt, out_pad):               # torch (out,in) -> (in,out_pad)
        t = wt.T
        pad = out_pad - t.shape[1]
        if pad > 0:
            t = jnp.pad(t, ((0, 0), (0, pad)))
        return t.astype(jnp.bfloat16)

    p["w1"] = padded_t(nrm((nc, fd)), 128)                  # (512, 128)
    p["w2"] = nrm((256, fd)).T.astype(jnp.bfloat16)         # (512, 256)
    p["w3"] = nrm((128, 256)).T.astype(jnp.bfloat16)        # (256, 128)
    p["w4"] = nrm((128, 128)).T.astype(jnp.bfloat16)        # (128, 128)
    p["w5"] = padded_t(nrm((3, 128)), 128)                  # (128, 128)
    return p


# ------------------------------ model forward ------------------------------

def encode_image_tokens(params, cfg, x):
    """CLIP visual transformer up to the post-block token stream."""
    B, C, H, W = x.shape
    P, w, heads = cfg["patch"], cfg["width"], cfg["heads"]
    gh, gw = H // P, W // P

    # Patch extraction (cheap one-time glue): NCHW -> (B*N, C*P*P), matching
    # conv-weight flatten order (c, kh, kw); patch conv == matmul.
    patches = (x.reshape(B, C, gh, P, gw, P)
                .transpose(0, 2, 4, 1, 3, 5)
                .reshape(B * gh * gw, C * P * P))
    tok = matmul_pallas(patches, params["conv1_w"])          # (B*N, w)
    tok = tok.reshape(B, gh * gw, w)

    cls = jnp.broadcast_to(params["class_emb"].reshape(1, 1, w), (B, 1, w))
    xseq = jnp.concatenate([cls, tok], axis=1)               # (B, S, w)

    # + pos_emb and ln_pre fused in one kernel
    xf = prelude_pallas(xseq, params["pos_emb"],
                        params["ln_pre_g"], params["ln_pre_b"])

    # One fused pallas_call per transformer block
    for blk in params["blocks"]:
        xf = block_pallas(xf, blk, heads)
    return xf


def clip_model_forward(params, cfg, x, y, return_feat=False):
    # TODO(synk): DTag.set_domain_tag(y.int().squeeze()) is a global tagging
    # side effect with no compute; y is accepted but unused here.
    del y
    xf = encode_image_tokens(params, cfg, x)
    cls_tok = xf[:, 0, :]                                    # (B, w)
    # ln_post + visual proj + (dropout=identity) + linear1 & margin chain,
    # all fused in a single pallas_call.
    feats, out, margin = post_head_pallas(
        cls_tok, params["ln_post_g"], params["ln_post_b"], params["vis_proj"],
        params["w1"], params["w2"], params["w3"], params["w4"], params["w5"],
        cfg["num_classes"])
    if return_feat:
        return out, feats, margin
    return out


# ----------------------------------- main -----------------------------------

if __name__ == "__main__":
    cfg = dict(in_ch=3, patch=16, image=64, width=64, heads=2, layers=2,
               feat_dim=512, num_classes=10)
    cfg["n_tokens"] = (cfg["image"] // cfg["patch"]) ** 2 + 1   # patches + cls

    key = jax.random.PRNGKey(0)
    pkey, xkey, ykey = jax.random.split(key, 3)
    params = init_params(pkey, cfg)

    x = jax.random.normal(xkey, (2, 3, cfg["image"], cfg["image"]), jnp.float32)
    y = jax.random.randint(ykey, (2, 1), 0, 3)                  # domain tags

    fwd = jax.jit(functools.partial(clip_model_forward, params, cfg,
                                    return_feat=True))
    out, feats, margin = fwd(x, y)
    jax.block_until_ready((out, feats, margin))

    assert out.shape == (2, cfg["num_classes"]) and out.dtype == jnp.float32
    assert feats.shape == (2, cfg["feat_dim"])
    assert margin.shape == (3,)
    print("KERNEL_OK")
</pallas_src>

<mosaic_0001>
module attributes {stable_mosaic.version = 11 : i64} {
  func.func @_matmul_kernel(%arg0: i32, %arg1: i32, %arg2: i32, %arg3: memref<32x256xf32, #tpu.memory_space<vmem>>, %arg4: memref<256x64xbf16, #tpu.memory_space<vmem>>, %arg5: memref<32x64xf32, #tpu.memory_space<vmem>>, %arg6: memref<32x64xf32, #tpu.memory_space<vmem>>) attributes {dimension_semantics = [#tpu.dimension_semantics<parallel>, #tpu.dimension_semantics<parallel>, #tpu.dimension_semantics<arbitrary>], iteration_bounds = array<i64: 1, 1, 3>, scalar_prefetch = 0 : i64, scratch_operands = 1 : i64, tpu.core_type = #tpu.core_type<tc>, window_params = [{transform_indices = @transform_0, window_bounds = array<i64: 32, 256>}, {transform_indices = @transform_1, window_bounds = array<i64: 256, 64>}, {transform_indices = @transform_2, window_bounds = array<i64: 32, 64>}]} {
    %c0_i32 = arith.constant 0 : i32
    %0 = arith.cmpi eq, %arg2, %c0_i32 : i32
    %1 = arith.extui %0 : i1 to i32
    %c0_i32_0 = arith.constant 0 : i32
    %2 = arith.cmpi ne, %1, %c0_i32_0 : i32
    scf.if %2 {
      %cst_9 = arith.constant 0.000000e+00 : f32
      %13 = vector.broadcast %cst_9 : f32 to vector<32x64xf32>
      %c0_10 = arith.constant 0 : index
      %c0_11 = arith.constant 0 : index
      %14 = vector.load %arg6[%c0_10, %c0_11] : memref<32x64xf32, #tpu.memory_space<vmem>>, vector<32x64xf32>
      tpu.vector_store %arg6[%c0_10, %c0_11], %13 {strides = array<i32>} : memref<32x64xf32, #tpu.memory_space<vmem>>, vector<32x64xf32>,
    } else {
    }
    %c0 = arith.constant 0 : index
    %c0_1 = arith.constant 0 : index
    %3 = vector.load %arg6[%c0, %c0_1] : memref<32x64xf32, #tpu.memory_space<vmem>>, vector<32x64xf32>
    %c0_2 = arith.constant 0 : index
    %c0_3 = arith.constant 0 : index
    %4 = vector.load %arg3[%c0_2, %c0_3] : memref<32x256xf32, #tpu.memory_space<vmem>>, vector<32x256xf32>
    %5 = arith.truncf %4 : vector<32x256xf32> to vector<32x256xbf16>
    %c0_4 = arith.constant 0 : index
    %c0_5 = arith.constant 0 : index
    %6 = vector.load %arg4[%c0_4, %c0_5] : memref<256x64xbf16, #tpu.memory_space<vmem>>, vector<256x64xbf16>
    %cst = arith.constant dense<0.000000e+00> : vector<32x64xf32>
    %7 = tpu.matmul %5, %6, %cst {dimension_numbers = #tpu.dot_dimension_numbers<[1], [0], [0], [1], [0, 0, 1, 1], [], []>} : vector<32x256xbf16>, vector<256x64xbf16>, vector<32x64xf32> -> vector<32x64xf32>
    %8 = arith.addf %3, %7 : vector<32x64xf32>
    %c0_6 = arith.constant 0 : index
    %c0_7 = arith.constant 0 : index
    %9 = vector.load %arg6[%c0_6, %c0_7] : memref<32x64xf32, #tpu.memory_space<vmem>>, vector<32x64xf32>
    tpu.vector_store %arg6[%c0_6, %c0_7], %8 {strides = array<i32>} : memref<32x64xf32, #tpu.memory_space<vmem>>, vector<32x64xf32>,
    %c2_i32 = arith.constant 2 : i32
    %10 = arith.cmpi eq, %arg2, %c2_i32 : i32
    %11 = arith.extui %10 : i1 to i32
    %c0_i32_8 = arith.constant 0 : i32
    %12 = arith.cmpi ne, %11, %c0_i32_8 : i32
    scf.if %12 {
      %c0_9 = arith.constant 0 : index
      %c0_10 = arith.constant 0 : index
      %13 = vector.load %arg6[%c0_9, %c0_10] : memref<32x64xf32, #tpu.memory_space<vmem>>, vector<32x64xf32>
      %c0_11 = arith.constant 0 : index
      %c0_12 = arith.constant 0 : index
      %14 = vector.load %arg5[%c0_11, %c0_12] : memref<32x64xf32, #tpu.memory_space<vmem>>, vector<32x64xf32>
      tpu.vector_store %arg5[%c0_11, %c0_12], %13 {strides = array<i32>} : memref<32x64xf32, #tpu.memory_space<vmem>>, vector<32x64xf32>,
    } else {
    }
    return
  }
  func.func @transform_0(%arg0: i32, %arg1: i32, %arg2: i32) -> (i32, i32) {
    %c0_i32 = arith.constant 0 : i32
    return %arg0, %arg2 : i32, i32
  }
  func.func @transform_1(%arg0: i32, %arg1: i32, %arg2: i32) -> (i32, i32) {
    %c0_i32 = arith.constant 0 : i32
    return %arg2, %arg1 : i32, i32
  }
  func.func @transform_2(%arg0: i32, %arg1: i32, %arg2: i32) -> (i32, i32) {
    %c0_i32 = arith.constant 0 : i32
    return %arg0, %arg1 : i32, i32
  }
}

module attributes {stable_mosaic.version = 11 : i64} {
  func.func @_prelude_kernel(%arg0: i32, %arg1: memref<1x17x64xf32, #tpu.memory_space<vmem>>, %arg2: memref<17x64xf32, #tpu.memory_space<vmem>>, %arg3: memref<1x64xf32, #tpu.memory_space<vmem>>, %arg4: memref<1x64xf32, #tpu.memory_space<vmem>>, %arg5: memref<1x17x64xf32, #tpu.memory_space<vmem>>) attributes {dimension_semantics = [#tpu.dimension_semantics<parallel>], iteration_bounds = array<i64: 2>, scalar_prefetch = 0 : i64, scratch_operands = 0 : i64, tpu.core_type = #tpu.core_type<tc>, window_params = [{transform_indices = @transform_0, window_bounds = array<i64: 1, 17, 64>}, {pipeline_mode = #tpu.pipeline_mode<synchronous>, transform_indices = @transform_1, window_bounds = array<i64: 17, 64>}, {pipeline_mode = #tpu.pipeline_mode<synchronous>, transform_indices = @transform_2, window_bounds = array<i64: 1, 64>}, {pipeline_mode = #tpu.pipeline_mode<synchronous>, transform_indices = @transform_3, window_bounds = array<i64: 1, 64>}, {transform_indices = @transform_4, window_bounds = array<i64: 1, 17, 64>}]} {
    %c0 = arith.constant 0 : index
    %c0_0 = arith.constant 0 : index
    %c0_1 = arith.constant 0 : index
    %0 = vector.load %arg1[%c0, %c0_0, %c0_1] : memref<1x17x64xf32, #tpu.memory_space<vmem>>, vector<1x17x64xf32>
    %1 = vector.shape_cast %0 : vector<1x17x64xf32> to vector<17x64xf32>
    %c0_2 = arith.constant 0 : index
    %c0_3 = arith.constant 0 : index
    %2 = vector.load %arg2[%c0_2, %c0_3] : memref<17x64xf32, #tpu.memory_space<vmem>>, vector<17x64xf32>
    %3 = arith.addf %1, %2 : vector<17x64xf32>
    %c0_4 = arith.constant 0 : index
    %c0_5 = arith.constant 0 : index
    %4 = vector.load %arg3[%c0_4, %c0_5] : memref<1x64xf32, #tpu.memory_space<vmem>>, vector<1x64xf32>
    %c0_6 = arith.constant 0 : index
    %c0_7 = arith.constant 0 : index
    %5 = vector.load %arg4[%c0_6, %c0_7] : memref<1x64xf32, #tpu.memory_space<vmem>>, vector<1x64xf32>
    %cst = arith.constant dense<0.000000e+00> : vector<17xf32>
    %6 = vector.multi_reduction <add>, %3, %cst [1] : vector<17x64xf32> to vector<17xf32>
    %7 = vector.shape_cast %6 : vector<17xf32> to vector<17x1xf32>
    %cst_8 = arith.constant 6.400000e+01 : f32
    %8 = vector.broadcast %cst_8 : f32 to vector<17x1xf32>
    %9 = arith.divf %7, %8 : vector<17x1xf32>
    %10 = vector.broadcast %9 : vector<17x1xf32> to vector<17x64xf32>
    %11 = arith.subf %3, %10 : vector<17x64xf32>
    %12 = arith.mulf %11, %11 : vector<17x64xf32>
    %cst_9 = arith.constant dense<0.000000e+00> : vector<17xf32>
    %13 = vector.multi_reduction <add>, %12, %cst_9 [1] : vector<17x64xf32> to vector<17xf32>
    %14 = vector.shape_cast %13 : vector<17xf32> to vector<17x1xf32>
    %cst_10 = arith.constant 6.400000e+01 : f32
    %15 = vector.broadcast %cst_10 : f32 to vector<17x1xf32>
    %16 = arith.divf %14, %15 : vector<17x1xf32>
    %17 = vector.broadcast %9 : vector<17x1xf32> to vector<17x64xf32>
    %18 = arith.subf %3, %17 : vector<17x64xf32>
    %cst_11 = arith.constant 9.99999974E-6 : f32
    %19 = vector.broadcast %cst_11 : f32 to vector<17x1xf32>
    %20 = arith.addf %16, %19 : vector<17x1xf32>
    %21 = math.rsqrt %20 : vector<17x1xf32>
    %22 = vector.broadcast %21 : vector<17x1xf32> to vector<17x64xf32>
    %23 = arith.mulf %18, %22 : vector<17x64xf32>
    %24 = vector.broadcast %4 : vector<1x64xf32> to vector<17x64xf32>
    %25 = arith.mulf %23, %24 : vector<17x64xf32>
    %26 = vector.broadcast %5 : vector<1x64xf32> to vector<17x64xf32>
    %27 = arith.addf %25, %26 : vector<17x64xf32>
    %c0_12 = arith.constant 0 : index
    %c0_13 = arith.constant 0 : index
    %c0_14 = arith.constant 0 : index
    %28 = vector.load %arg5[%c0_12, %c0_13, %c0_14] : memref<1x17x64xf32, #tpu.memory_space<vmem>>, vector<1x17x64xf32>
    %29 = vector.shape_cast %28 : vector<1x17x64xf32> to vector<17x64xf32>
    %30 = vector.shape_cast %27 : vector<17x64xf32> to vector<1x17x64xf32>
    tpu.vector_store %arg5[%c0_12, %c0_13, %c0_14], %30 {strides = array<i32>} : memref<1x17x64xf32, #tpu.memory_space<vmem>>, vector<1x17x64xf32>,
    return
  }
  func.func @transform_0(%arg0: i32) -> (i32, i32, i32) {
    %c0_i32 = arith.constant 0 : i32
    %c0_i32_0 = arith.constant 0 : i32
    %c0_i32_1 = arith.constant 0 : i32
    return %arg0, %c0_i32, %c0_i32_0 : i32, i32, i32
  }
  func.func @transform_1(%arg0: i32) -> (i32, i32) {
    %c0_i32 = arith.constant 0 : i32
    %c0_i32_0 = arith.constant 0 : i32
    %c0_i32_1 = arith.constant 0 : i32
    return %c0_i32, %c0_i32_0 : i32, i32
  }
  func.func @transform_2(%arg0: i32) -> (i32, i32) {
    %c0_i32 = arith.constant 0 : i32
    %c0_i32_0 = arith.constant 0 : i32
    %c0_i32_1 = arith.constant 0 : i32
    return %c0_i32, %c0_i32_0 : i32, i32
  }
  func.func @transform_3(%arg0: i32) -> (i32, i32) {
    %c0_i32 = arith.constant 0 : i32
    %c0_i32_0 = arith.constant 0 : i32
    %c0_i32_1 = arith.constant 0 : i32
    return %c0_i32, %c0_i32_0 : i32, i32
  }
  func.func @transform_4(%arg0: i32) -> (i32, i32, i32) {
    %c0_i32 = arith.constant 0 : i32
    %c0_i32_0 = arith.constant 0 : i32
    %c0_i32_1 = arith.constant 0 : i32
    return %arg0, %c0_i32, %c0_i32_0 : i32, i32, i32
  }
}

module attributes {stable_mosaic.version = 11 : i64} {
  func.func @_post_head_kernel(%arg0: memref<2x64xf32, #tpu.memory_space<vmem>>, %arg1: memref<1x64xf32, #tpu.memory_space<vmem>>, %arg2: memref<1x64xf32, #tpu.memory_space<vmem>>, %arg3: memref<64x512xbf16, #tpu.memory_space<vmem>>, %arg4: memref<512x128xbf16, #tpu.memory_space<vmem>>, %arg5: memref<512x256xbf16, #tpu.memory_space<vmem>>, %arg6: memref<256x128xbf16, #tpu.memory_space<vmem>>, %arg7: memref<128x128xbf16, #tpu.memory_space<vmem>>, %arg8: memref<128x128xbf16, #tpu.memory_space<vmem>>, %arg9: memref<2x512xf32, #tpu.memory_space<vmem>>, %arg10: memref<2x128xf32, #tpu.memory_space<vmem>>, %arg11: memref<1x128xf32, #tpu.memory_space<vmem>>) attributes {dimension_semantics = [], scalar_prefetch = 0 : i64, scratch_operands = 0 : i64, tpu.core_type = #tpu.core_type<tc>} {
    %c0 = arith.constant 0 : index
    %c0_0 = arith.constant 0 : index
    %0 = vector.load %arg0[%c0, %c0_0] : memref<2x64xf32, #tpu.memory_space<vmem>>, vector<2x64xf32>
    %c0_1 = arith.constant 0 : index
    %c0_2 = arith.constant 0 : index
    %1 = vector.load %arg1[%c0_1, %c0_2] : memref<1x64xf32, #tpu.memory_space<vmem>>, vector<1x64xf32>
    %c0_3 = arith.constant 0 : index
    %c0_4 = arith.constant 0 : index
    %2 = vector.load %arg2[%c0_3, %c0_4] : memref<1x64xf32, #tpu.memory_space<vmem>>, vector<1x64xf32>
    %cst = arith.constant dense<0.000000e+00> : vector<2xf32>
    %3 = vector.multi_reduction <add>, %0, %cst [1] : vector<2x64xf32> to vector<2xf32>
    %4 = vector.shape_cast %3 : vector<2xf32> to vector<2x1xf32>
    %cst_5 = arith.constant 6.400000e+01 : f32
    %5 = vector.broadcast %cst_5 : f32 to vector<2x1xf32>
    %6 = arith.divf %4, %5 : vector<2x1xf32>
    %7 = vector.broadcast %6 : vector<2x1xf32> to vector<2x64xf32>
    %8 = arith.subf %0, %7 : vector<2x64xf32>
    %9 = arith.mulf %8, %8 : vector<2x64xf32>
    %cst_6 = arith.constant dense<0.000000e+00> : vector<2xf32>
    %10 = vector.multi_reduction <add>, %9, %cst_6 [1] : vector<2x64xf32> to vector<2xf32>
    %11 = vector.shape_cast %10 : vector<2xf32> to vector<2x1xf32>
    %cst_7 = arith.constant 6.400000e+01 : f32
    %12 = vector.broadcast %cst_7 : f32 to vector<2x1xf32>
    %13 = arith.divf %11, %12 : vector<2x1xf32>
    %14 = vector.broadcast %6 : vector<2x1xf32> to vector<2x64xf32>
    %15 = arith.subf %0, %14 : vector<2x64xf32>
    %cst_8 = arith.constant 9.99999974E-6 : f32
    %16 = vector.broadcast %cst_8 : f32 to vector<2x1xf32>
    %17 = arith.addf %13, %16 : vector<2x1xf32>
    %18 = math.rsqrt %17 : vector<2x1xf32>
    %19 = vector.broadcast %18 : vector<2x1xf32> to vector<2x64xf32>
    %20 = arith.mulf %15, %19 : vector<2x64xf32>
    %21 = vector.broadcast %1 : vector<1x64xf32> to vector<2x64xf32>
    %22 = arith.mulf %20, %21 : vector<2x64xf32>
    %23 = vector.broadcast %2 : vector<1x64xf32> to vector<2x64xf32>
    %24 = arith.addf %22, %23 : vector<2x64xf32>
    %25 = arith.truncf %24 : vector<2x64xf32> to vector<2x64xbf16>
    %c0_9 = arith.constant 0 : index
    %c0_10 = arith.constant 0 : index
    %26 = vector.load %arg3[%c0_9, %c0_10] : memref<64x512xbf16, #tpu.memory_space<vmem>>, vector<64x512xbf16>
    %cst_11 = arith.constant dense<0.000000e+00> : vector<2x512xf32>
    %27 = tpu.matmul %25, %26, %cst_11 {dimension_numbers = #tpu.dot_dimension_numbers<[1], [0], [0], [1], [0, 0, 1, 1], [], []>} : vector<2x64xbf16>, vector<64x512xbf16>, vector<2x512xf32> -> vector<2x512xf32>
    %c0_12 = arith.constant 0 : index
    %c0_13 = arith.constant 0 : index
    %28 = vector.load %arg9[%c0_12, %c0_13] : memref<2x512xf32, #tpu.memory_space<vmem>>, vector<2x512xf32>
    tpu.vector_store %arg9[%c0_12, %c0_13], %27 {strides = array<i32>} : memref<2x512xf32, #tpu.memory_space<vmem>>, vector<2x512xf32>,
    %29 = arith.truncf %27 : vector<2x512xf32> to vector<2x512xbf16>
    %c0_14 = arith.constant 0 : index
    %c0_15 = arith.constant 0 : index
    %30 = vector.load %arg4[%c0_14, %c0_15] : memref<512x128xbf16, #tpu.memory_space<vmem>>, vector<512x128xbf16>
    %cst_16 = arith.constant dense<0.000000e+00> : vector<2x128xf32>
    %31 = tpu.matmul %29, %30, %cst_16 {dimension_numbers = #tpu.dot_dimension_numbers<[1], [0], [0], [1], [0, 0, 1, 1], [], []>} : vector<2x512xbf16>, vector<512x128xbf16>, vector<2x128xf32> -> vector<2x128xf32>
    %c0_17 = arith.constant 0 : index
    %c0_18 = arith.constant 0 : index
    %32 = vector.load %arg10[%c0_17, %c0_18] : memref<2x128xf32, #tpu.memory_space<vmem>>, vector<2x128xf32>
    tpu.vector_store %arg10[%c0_17, %c0_18], %31 {strides = array<i32>} : memref<2x128xf32, #tpu.memory_space<vmem>>, vector<2x128xf32>,
    %c0_19 = arith.constant 0 : index
    %c0_20 = arith.constant 0 : index
    %33 = vector.load %arg5[%c0_19, %c0_20] : memref<512x256xbf16, #tpu.memory_space<vmem>>, vector<512x256xbf16>
    %cst_21 = arith.constant dense<0.000000e+00> : vector<2x256xf32>
    %34 = tpu.matmul %29, %33, %cst_21 {dimension_numbers = #tpu.dot_dimension_numbers<[1], [0], [0], [1], [0, 0, 1, 1], [], []>} : vector<2x512xbf16>, vector<512x256xbf16>, vector<2x256xf32> -> vector<2x256xf32>
    %cst_22 = arith.constant 0.000000e+00 : f32
    %35 = vector.broadcast %cst_22 : f32 to vector<2x256xf32>
    %36 = arith.maximumf %34, %35 : vector<2x256xf32>
    %37 = arith.truncf %36 : vector<2x256xf32> to vector<2x256xbf16>
    %c0_23 = arith.constant 0 : index
    %c0_24 = arith.constant 0 : index
    %38 = vector.load %arg6[%c0_23, %c0_24] : memref<256x128xbf16, #tpu.memory_space<vmem>>, vector<256x128xbf16>
    %cst_25 = arith.constant dense<0.000000e+00> : vector<2x128xf32>
    %39 = tpu.matmul %37, %38, %cst_25 {dimension_numbers = #tpu.dot_dimension_numbers<[1], [0], [0], [1], [0, 0, 1, 1], [], []>} : vector<2x256xbf16>, vector<256x128xbf16>, vector<2x128xf32> -> vector<2x128xf32>
    %cst_26 = arith.constant 0.000000e+00 : f32
    %40 = vector.broadcast %cst_26 : f32 to vector<2x128xf32>
    %41 = arith.maximumf %39, %40 : vector<2x128xf32>
    %42 = arith.truncf %41 : vector<2x128xf32> to vector<2x128xbf16>
    %c0_27 = arith.constant 0 : index
    %c0_28 = arith.constant 0 : index
    %43 = vector.load %arg7[%c0_27, %c0_28] : memref<128x128xbf16, #tpu.memory_space<vmem>>, vector<128x128xbf16>
    %cst_29 = arith.constant dense<0.000000e+00> : vector<2x128xf32>
    %44 = tpu.matmul %42, %43, %cst_29 {dimension_numbers = #tpu.dot_dimension_numbers<[1], [0], [0], [1], [0, 0, 1, 1], [], []>} : vector<2x128xbf16>, vector<128x128xbf16>, vector<2x128xf32> -> vector<2x128xf32>
    %cst_30 = arith.constant 0.000000e+00 : f32
    %45 = vector.broadcast %cst_30 : f32 to vector<2x128xf32>
    %46 = arith.maximumf %44, %45 : vector<2x128xf32>
    %47 = arith.truncf %46 : vector<2x128xf32> to vector<2x128xbf16>
    %c0_31 = arith.constant 0 : index
    %c0_32 = arith.constant 0 : index
    %48 = vector.load %arg8[%c0_31, %c0_32] : memref<128x128xbf16, #tpu.memory_space<vmem>>, vector<128x128xbf16>
    %cst_33 = arith.constant dense<0.000000e+00> : vector<2x128xf32>
    %49 = tpu.matmul %47, %48, %cst_33 {dimension_numbers = #tpu.dot_dimension_numbers<[1], [0], [0], [1], [0, 0, 1, 1], [], []>} : vector<2x128xbf16>, vector<128x128xbf16>, vector<2x128xf32> -> vector<2x128xf32>
    %50 = arith.mulf %49, %49 : vector<2x128xf32>
    %cst_34 = arith.constant dense<0.000000e+00> : vector<128xf32>
    %51 = vector.multi_reduction <add>, %50, %cst_34 [0] : vector<2x128xf32> to vector<128xf32>
    %52 = vector.shape_cast %51 : vector<128xf32> to vector<1x128xf32>
    %53 = math.sqrt %52 : vector<1x128xf32>
    %c0_35 = arith.constant 0 : index
    %c0_36 = arith.constant 0 : index
    %54 = vector.load %arg11[%c0_35, %c0_36] : memref<1x128xf32, #tpu.memory_space<vmem>>, vector<1x128xf32>
    tpu.vector_store %arg11[%c0_35, %c0_36], %53 {strides = array<i32>} : memref<1x128xf32, #tpu.memory_space<vmem>>, vector<1x128xf32>,
    return
  }
}

module attributes {stable_mosaic.version = 11 : i64} {
  func.func @_block_kernel(%arg0: i32, %arg1: memref<1x17x64xf32, #tpu.memory_space<vmem>>, %arg2: memref<1x64xf32, #tpu.memory_space<vmem>>, %arg3: memref<1x64xf32, #tpu.memory_space<vmem>>, %arg4: memref<6x64x32xbf16, #tpu.memory_space<vmem>>, %arg5: memref<6x1x32xf32, #tpu.memory_space<vmem>>, %arg6: memref<2x32x64xbf16, #tpu.memory_space<vmem>>, %arg7: memref<1x64xf32, #tpu.memory_space<vmem>>, %arg8: memref<1x64xf32, #tpu.memory_space<vmem>>, %arg9: memref<1x64xf32, #tpu.memory_space<vmem>>, %arg10: memref<64x256xbf16, #tpu.memory_space<vmem>>, %arg11: memref<1x256xf32, #tpu.memory_space<vmem>>, %arg12: memref<256x64xbf16, #tpu.memory_space<vmem>>, %arg13: memref<1x64xf32, #tpu.memory_space<vmem>>, %arg14: memref<1x17x64xf32, #tpu.memory_space<vmem>>) attributes {dimension_semantics = [#tpu.dimension_semantics<parallel>], iteration_bounds = array<i64: 2>, scalar_prefetch = 0 : i64, scratch_operands = 0 : i64, tpu.core_type = #tpu.core_type<tc>, window_params = [{transform_indices = @transform_0, window_bounds = array<i64: 1, 17, 64>}, {pipeline_mode = #tpu.pipeline_mode<synchronous>, transform_indices = @transform_1, window_bounds = array<i64: 1, 64>}, {pipeline_mode = #tpu.pipeline_mode<synchronous>, transform_indices = @transform_2, window_bounds = array<i64: 1, 64>}, {pipeline_mode = #tpu.pipeline_mode<synchronous>, transform_indices = @transform_3, window_bounds = array<i64: 6, 64, 32>}, {pipeline_mode = #tpu.pipeline_mode<synchronous>, transform_indices = @transform_4, window_bounds = array<i64: 6, 1, 32>}, {pipeline_mode = #tpu.pipeline_mode<synchronous>, transform_indices = @transform_5, window_bounds = array<i64: 2, 32, 64>}, {pipeline_mode = #tpu.pipeline_mode<synchronous>, transform_indices = @transform_6, window_bounds = array<i64: 1, 64>}, {pipeline_mode = #tpu.pipeline_mode<synchronous>, transform_indices = @transform_7, window_bounds = array<i64: 1, 64>}, {pipeline_mode = #tpu.pipeline_mode<synchronous>, transform_indices = @transform_8, window_bounds = array<i64: 1, 64>}, {pipeline_mode = #tpu.pipeline_mode<synchronous>, transform_indices = @transform_9, window_bounds = array<i64: 64, 256>}, {pipeline_mode = #tpu.pipeline_mode<synchronous>, transform_indices = @transform_10, window_bounds = array<i64: 1, 256>}, {pipeline_mode = #tpu.pipeline_mode<synchronous>, transform_indices = @transform_11, window_bounds = array<i64: 256, 64>}, {pipeline_mode = #tpu.pipeline_mode<synchronous>, transform_indices = @transform_12, window_bounds = array<i64: 1, 64>}, {transform_indices = @transform_13, window_bounds = array<i64: 1, 17, 64>}]} {
    %c0 = arith.constant 0 : index
    %c0_0 = arith.constant 0 : index
    %c0_1 = arith.constant 0 : index
    %0 = vector.load %arg1[%c0, %c0_0, %c0_1] : memref<1x17x64xf32, #tpu.memory_space<vmem>>, vector<1x17x64xf32>
    %1 = vector.shape_cast %0 : vector<1x17x64xf32> to vector<17x64xf32>
    %c0_2 = arith.constant 0 : index
    %c0_3 = arith.constant 0 : index
    %2 = vector.load %arg2[%c0_2, %c0_3] : memref<1x64xf32, #tpu.memory_space<vmem>>, vector<1x64xf32>
    %c0_4 = arith.constant 0 : index
    %c0_5 = arith.constant 0 : index
    %3 = vector.load %arg3[%c0_4, %c0_5] : memref<1x64xf32, #tpu.memory_space<vmem>>, vector<1x64xf32>
    %cst = arith.constant dense<0.000000e+00> : vector<17xf32>
    %4 = vector.multi_reduction <add>, %1, %cst [1] : vector<17x64xf32> to vector<17xf32>
    %5 = vector.shape_cast %4 : vector<17xf32> to vector<17x1xf32>
    %cst_6 = arith.constant 6.400000e+01 : f32
    %6 = vector.broadcast %cst_6 : f32 to vector<17x1xf32>
    %7 = arith.divf %5, %6 : vector<17x1xf32>
    %8 = vector.broadcast %7 : vector<17x1xf32> to vector<17x64xf32>
    %9 = arith.subf %1, %8 : vector<17x64xf32>
    %10 = arith.mulf %9, %9 : vector<17x64xf32>
    %cst_7 = arith.constant dense<0.000000e+00> : vector<17xf32>
    %11 = vector.multi_reduction <add>, %10, %cst_7 [1] : vector<17x64xf32> to vector<17xf32>
    %12 = vector.shape_cast %11 : vector<17xf32> to vector<17x1xf32>
    %cst_8 = arith.constant 6.400000e+01 : f32
    %13 = vector.broadcast %cst_8 : f32 to vector<17x1xf32>
    %14 = arith.divf %12, %13 : vector<17x1xf32>
    %15 = vector.broadcast %7 : vector<17x1xf32> to vector<17x64xf32>
    %16 = arith.subf %1, %15 : vector<17x64xf32>
    %cst_9 = arith.constant 9.99999974E-6 : f32
    %17 = vector.broadcast %cst_9 : f32 to vector<17x1xf32>
    %18 = arith.addf %14, %17 : vector<17x1xf32>
    %19 = math.rsqrt %18 : vector<17x1xf32>
    %20 = vector.broadcast %19 : vector<17x1xf32> to vector<17x64xf32>
    %21 = arith.mulf %16, %20 : vector<17x64xf32>
    %22 = vector.broadcast %2 : vector<1x64xf32> to vector<17x64xf32>
    %23 = arith.mulf %21, %22 : vector<17x64xf32>
    %24 = vector.broadcast %3 : vector<1x64xf32> to vector<17x64xf32>
    %25 = arith.addf %23, %24 : vector<17x64xf32>
    %26 = arith.truncf %25 : vector<17x64xf32> to vector<17x64xbf16>
    %cst_10 = arith.constant 0.000000e+00 : f32
    %27 = vector.broadcast %cst_10 : f32 to vector<17x64xf32>
    %c0_11 = arith.constant 0 : index
    %c0_12 = arith.constant 0 : index
    %c0_13 = arith.constant 0 : index
    %28 = vector.load %arg4[%c0_11, %c0_12, %c0_13] : memref<6x64x32xbf16, #tpu.memory_space<vmem>>, vector<1x64x32xbf16>
    %29 = vector.shape_cast %28 : vector<1x64x32xbf16> to vector<64x32xbf16>
    %cst_14 = arith.constant dense<0.000000e+00> : vector<17x32xf32>
    %30 = tpu.matmul %26, %29, %cst_14 {dimension_numbers = #tpu.dot_dimension_numbers<[1], [0], [0], [1], [0, 0, 1, 1], [], []>} : vector<17x64xbf16>, vector<64x32xbf16>, vector<17x32xf32> -> vector<17x32xf32>
    %c0_15 = arith.constant 0 : index
    %c0_16 = arith.constant 0 : index
    %c0_17 = arith.constant 0 : index
    %31 = vector.load %arg5[%c0_15, %c0_16, %c0_17] : memref<6x1x32xf32, #tpu.memory_space<vmem>>, vector<1x1x32xf32>
    %32 = vector.shape_cast %31 : vector<1x1x32xf32> to vector<1x32xf32>
    %33 = vector.broadcast %32 : vector<1x32xf32> to vector<17x32xf32>
    %34 = arith.addf %30, %33 : vector<17x32xf32>
    %c2 = arith.constant 2 : index
    %c0_18 = arith.constant 0 : index
    %c0_19 = arith.constant 0 : index
    %35 = vector.load %arg4[%c2, %c0_18, %c0_19] : memref<6x64x32xbf16, #tpu.memory_space<vmem>>, vector<1x64x32xbf16>
    %36 = vector.shape_cast %35 : vector<1x64x32xbf16> to vector<64x32xbf16>
    %cst_20 = arith.constant dense<0.000000e+00> : vector<17x32xf32>
    %37 = tpu.matmul %26, %36, %cst_20 {dimension_numbers = #tpu.dot_dimension_numbers<[1], [0], [0], [1], [0, 0, 1, 1], [], []>} : vector<17x64xbf16>, vector<64x32xbf16>, vector<17x32xf32> -> vector<17x32xf32>
    %c2_21 = arith.constant 2 : index
    %c0_22 = arith.constant 0 : index
    %c0_23 = arith.constant 0 : index
    %38 = vector.load %arg5[%c2_21, %c0_22, %c0_23] : memref<6x1x32xf32, #tpu.memory_space<vmem>>, vector<1x1x32xf32>
    %39 = vector.shape_cast %38 : vector<1x1x32xf32> to vector<1x32xf32>
    %40 = vector.broadcast %39 : vector<1x32xf32> to vector<17x32xf32>
    %41 = arith.addf %37, %40 : vector<17x32xf32>
    %c4 = arith.constant 4 : index
    %c0_24 = arith.constant 0 : index
    %c0_25 = arith.constant 0 : index
    %42 = vector.load %arg4[%c4, %c0_24, %c0_25] : memref<6x64x32xbf16, #tpu.memory_space<vmem>>, vector<1x64x32xbf16>
    %43 = vector.shape_cast %42 : vector<1x64x32xbf16> to vector<64x32xbf16>
    %cst_26 = arith.constant dense<0.000000e+00> : vector<17x32xf32>
    %44 = tpu.matmul %26, %43, %cst_26 {dimension_numbers = #tpu.dot_dimension_numbers<[1], [0], [0], [1], [0, 0, 1, 1], [], []>} : vector<17x64xbf16>, vector<64x32xbf16>, vector<17x32xf32> -> vector<17x32xf32>
    %c4_27 = arith.constant 4 : index
    %c0_28 = arith.constant 0 : index
    %c0_29 = arith.constant 0 : index
    %45 = vector.load %arg5[%c4_27, %c0_28, %c0_29] : memref<6x1x32xf32, #tpu.memory_space<vmem>>, vector<1x1x32xf32>
    %46 = vector.shape_cast %45 : vector<1x1x32xf32> to vector<1x32xf32>
    %47 = vector.broadcast %46 : vector<1x32xf32> to vector<17x32xf32>
    %48 = arith.addf %44, %47 : vector<17x32xf32>
    %49 = arith.truncf %34 : vector<17x32xf32> to vector<17x32xbf16>
    %50 = arith.truncf %41 : vector<17x32xf32> to vector<17x32xbf16>
    %cst_30 = arith.constant dense<0.000000e+00> : vector<17x17xf32>
    %51 = tpu.matmul %49, %50, %cst_30 {dimension_numbers = #tpu.dot_dimension_numbers<[1], [1], [0], [0], [0, 0, 1, 0], [], []>} : vector<17x32xbf16>, vector<17x32xbf16>, vector<17x17xf32> -> vector<17x17xf32>
    %cst_31 = arith.constant 0.176776692 : f32
    %52 = vector.broadcast %cst_31 : f32 to vector<17x17xf32>
    %53 = arith.mulf %51, %52 : vector<17x17xf32>
    %cst_32 = arith.constant dense<0xFF800000> : vector<17xf32>
    %54 = vector.multi_reduction <maximumf>, %53, %cst_32 [1] : vector<17x17xf32> to vector<17xf32>
    %55 = vector.shape_cast %54 : vector<17xf32> to vector<17x1xf32>
    %56 = vector.broadcast %55 : vector<17x1xf32> to vector<17x17xf32>
    %57 = arith.subf %53, %56 : vector<17x17xf32>
    %58 = math.exp %57 : vector<17x17xf32>
    %cst_33 = arith.constant dense<0.000000e+00> : vector<17xf32>
    %59 = vector.multi_reduction <add>, %58, %cst_33 [1] : vector<17x17xf32> to vector<17xf32>
    %60 = vector.shape_cast %59 : vector<17xf32> to vector<17x1xf32>
    %61 = tpu.reciprocal %60 {approx = true} : vector<17x1xf32> -> vector<17x1xf32>
    %62 = vector.broadcast %61 : vector<17x1xf32> to vector<17x17xf32>
    %63 = arith.mulf %58, %62 : vector<17x17xf32>
    %64 = arith.truncf %63 : vector<17x17xf32> to vector<17x17xbf16>
    %65 = arith.truncf %48 : vector<17x32xf32> to vector<17x32xbf16>
    %cst_34 = arith.constant dense<0.000000e+00> : vector<17x32xf32>
    %66 = tpu.matmul %64, %65, %cst_34 {dimension_numbers = #tpu.dot_dimension_numbers<[1], [0], [0], [1], [0, 0, 1, 1], [], []>} : vector<17x17xbf16>, vector<17x32xbf16>, vector<17x32xf32> -> vector<17x32xf32>
    %67 = arith.truncf %66 : vector<17x32xf32> to vector<17x32xbf16>
    %c0_35 = arith.constant 0 : index
    %c0_36 = arith.constant 0 : index
    %c0_37 = arith.constant 0 : index
    %68 = vector.load %arg6[%c0_35, %c0_36, %c0_37] : memref<2x32x64xbf16, #tpu.memory_space<vmem>>, vector<1x32x64xbf16>
    %69 = vector.shape_cast %68 : vector<1x32x64xbf16> to vector<32x64xbf16>
    %cst_38 = arith.constant dense<0.000000e+00> : vector<17x64xf32>
    %70 = tpu.matmul %67, %69, %cst_38 {dimension_numbers = #tpu.dot_dimension_numbers<[1], [0], [0], [1], [0, 0, 1, 1], [], []>} : vector<17x32xbf16>, vector<32x64xbf16>, vector<17x64xf32> -> vector<17x64xf32>
    %71 = arith.addf %27, %70 : vector<17x64xf32>
    %c1 = arith.constant 1 : index
    %c0_39 = arith.constant 0 : index
    %c0_40 = arith.constant 0 : index
    %72 = vector.load %arg4[%c1, %c0_39, %c0_40] : memref<6x64x32xbf16, #tpu.memory_space<vmem>>, vector<1x64x32xbf16>
    %73 = vector.shape_cast %72 : vector<1x64x32xbf16> to vector<64x32xbf16>
    %cst_41 = arith.constant dense<0.000000e+00> : vector<17x32xf32>
    %74 = tpu.matmul %26, %73, %cst_41 {dimension_numbers = #tpu.dot_dimension_numbers<[1], [0], [0], [1], [0, 0, 1, 1], [], []>} : vector<17x64xbf16>, vector<64x32xbf16>, vector<17x32xf32> -> vector<17x32xf32>
    %c1_42 = arith.constant 1 : index
    %c0_43 = arith.constant 0 : index
    %c0_44 = arith.constant 0 : index
    %75 = vector.load %arg5[%c1_42, %c0_43, %c0_44] : memref<6x1x32xf32, #tpu.memory_space<vmem>>, vector<1x1x32xf32>
    %76 = vector.shape_cast %75 : vector<1x1x32xf32> to vector<1x32xf32>
    %77 = vector.broadcast %76 : vector<1x32xf32> to vector<17x32xf32>
    %78 = arith.addf %74, %77 : vector<17x32xf32>
    %c3 = arith.constant 3 : index
    %c0_45 = arith.constant 0 : index
    %c0_46 = arith.constant 0 : index
    %79 = vector.load %arg4[%c3, %c0_45, %c0_46] : memref<6x64x32xbf16, #tpu.memory_space<vmem>>, vector<1x64x32xbf16>
    %80 = vector.shape_cast %79 : vector<1x64x32xbf16> to vector<64x32xbf16>
    %cst_47 = arith.constant dense<0.000000e+00> : vector<17x32xf32>
    %81 = tpu.matmul %26, %80, %cst_47 {dimension_numbers = #tpu.dot_dimension_numbers<[1], [0], [0], [1], [0, 0, 1, 1], [], []>} : vector<17x64xbf16>, vector<64x32xbf16>, vector<17x32xf32> -> vector<17x32xf32>
    %c3_48 = arith.constant 3 : index
    %c0_49 = arith.constant 0 : index
    %c0_50 = arith.constant 0 : index
    %82 = vector.load %arg5[%c3_48, %c0_49, %c0_50] : memref<6x1x32xf32, #tpu.memory_space<vmem>>, vector<1x1x32xf32>
    %83 = vector.shape_cast %82 : vector<1x1x32xf32> to vector<1x32xf32>
    %84 = vector.broadcast %83 : vector<1x32xf32> to vector<17x32xf32>
    %85 = arith.addf %81, %84 : vector<17x32xf32>
    %c5 = arith.constant 5 : index
    %c0_51 = arith.constant 0 : index
    %c0_52 = arith.constant 0 : index
    %86 = vector.load %arg4[%c5, %c0_51, %c0_52] : memref<6x64x32xbf16, #tpu.memory_space<vmem>>, vector<1x64x32xbf16>
    %87 = vector.shape_cast %86 : vector<1x64x32xbf16> to vector<64x32xbf16>
    %cst_53 = arith.constant dense<0.000000e+00> : vector<17x32xf32>
    %88 = tpu.matmul %26, %87, %cst_53 {dimension_numbers = #tpu.dot_dimension_numbers<[1], [0], [0], [1], [0, 0, 1, 1], [], []>} : vector<17x64xbf16>, vector<64x32xbf16>, vector<17x32xf32> -> vector<17x32xf32>
    %c5_54 = arith.constant 5 : index
    %c0_55 = arith.constant 0 : index
    %c0_56 = arith.constant 0 : index
    %89 = vector.load %arg5[%c5_54, %c0_55, %c0_56] : memref<6x1x32xf32, #tpu.memory_space<vmem>>, vector<1x1x32xf32>
    %90 = vector.shape_cast %89 : vector<1x1x32xf32> to vector<1x32xf32>
    %91 = vector.broadcast %90 : vector<1x32xf32> to vector<17x32xf32>
    %92 = arith.addf %88, %91 : vector<17x32xf32>
    %93 = arith.truncf %78 : vector<17x32xf32> to vector<17x32xbf16>
    %94 = arith.truncf %85 : vector<17x32xf32> to vector<17x32xbf16>
    %cst_57 = arith.constant dense<0.000000e+00> : vector<17x17xf32>
    %95 = tpu.matmul %93, %94, %cst_57 {dimension_numbers = #tpu.dot_dimension_numbers<[1], [1], [0], [0], [0, 0, 1, 0], [], []>} : vector<17x32xbf16>, vector<17x32xbf16>, vector<17x17xf32> -> vector<17x17xf32>
    %cst_58 = arith.constant 0.176776692 : f32
    %96 = vector.broadcast %cst_58 : f32 to vector<17x17xf32>
    %97 = arith.mulf %95, %96 : vector<17x17xf32>
    %cst_59 = arith.constant dense<0xFF800000> : vector<17xf32>
    %98 = vector.multi_reduction <maximumf>, %97, %cst_59 [1] : vector<17x17xf32> to vector<17xf32>
    %99 = vector.shape_cast %98 : vector<17xf32> to vector<17x1xf32>
    %100 = vector.broadcast %99 : vector<17x1xf32> to vector<17x17xf32>
    %101 = arith.subf %97, %100 : vector<17x17xf32>
    %102 = math.exp %101 : vector<17x17xf32>
    %cst_60 = arith.constant dense<0.000000e+00> : vector<17xf32>
    %103 = vector.multi_reduction <add>, %102, %cst_60 [1] : vector<17x17xf32> to vector<17xf32>
    %104 = vector.shape_cast %103 : vector<17xf32> to vector<17x1xf32>
    %105 = tpu.reciprocal %104 {approx = true} : vector<17x1xf32> -> vector<17x1xf32>
    %106 = vector.broadcast %105 : vector<17x1xf32> to vector<17x17xf32>
    %107 = arith.mulf %102, %106 : vector<17x17xf32>
    %108 = arith.truncf %107 : vector<17x17xf32> to vector<17x17xbf16>
    %109 = arith.truncf %92 : vector<17x32xf32> to vector<17x32xbf16>
    %cst_61 = arith.constant dense<0.000000e+00> : vector<17x32xf32>
    %110 = tpu.matmul %108, %109, %cst_61 {dimension_numbers = #tpu.dot_dimension_numbers<[1], [0], [0], [1], [0, 0, 1, 1], [], []>} : vector<17x17xbf16>, vector<17x32xbf16>, vector<17x32xf32> -> vector<17x32xf32>
    %111 = arith.truncf %110 : vector<17x32xf32> to vector<17x32xbf16>
    %c1_62 = arith.constant 1 : index
    %c0_63 = arith.constant 0 : index
    %c0_64 = arith.constant 0 : index
    %112 = vector.load %arg6[%c1_62, %c0_63, %c0_64] : memref<2x32x64xbf16, #tpu.memory_space<vmem>>, vector<1x32x64xbf16>
    %113 = vector.shape_cast %112 : vector<1x32x64xbf16> to vector<32x64xbf16>
    %cst_65 = arith.constant dense<0.000000e+00> : vector<17x64xf32>
    %114 = tpu.matmul %111, %113, %cst_65 {dimension_numbers = #tpu.dot_dimension_numbers<[1], [0], [0], [1], [0, 0, 1, 1], [], []>} : vector<17x32xbf16>, vector<32x64xbf16>, vector<17x64xf32> -> vector<17x64xf32>
    %115 = arith.addf %71, %114 : vector<17x64xf32>
    %116 = arith.addf %1, %115 : vector<17x64xf32>
    %c0_66 = arith.constant 0 : index
    %c0_67 = arith.constant 0 : index
    %117 = vector.load %arg7[%c0_66, %c0_67] : memref<1x64xf32, #tpu.memory_space<vmem>>, vector<1x64xf32>
    %118 = vector.broadcast %117 : vector<1x64xf32> to vector<17x64xf32>
    %119 = arith.addf %116, %118 : vector<17x64xf32>
    %c0_68 = arith.constant 0 : index
    %c0_69 = arith.constant 0 : index
    %120 = vector.load %arg8[%c0_68, %c0_69] : memref<1x64xf32, #tpu.memory_space<vmem>>, vector<1x64xf32>
    %c0_70 = arith.constant 0 : index
    %c0_71 = arith.constant 0 : index
    %121 = vector.load %arg9[%c0_70, %c0_71] : memref<1x64xf32, #tpu.memory_space<vmem>>, vector<1x64xf32>
    %cst_72 = arith.constant dense<0.000000e+00> : vector<17xf32>
    %122 = vector.multi_reduction <add>, %119, %cst_72 [1] : vector<17x64xf32> to vector<17xf32>
    %123 = vector.shape_cast %122 : vector<17xf32> to vector<17x1xf32>
    %cst_73 = arith.constant 6.400000e+01 : f32
    %124 = vector.broadcast %cst_73 : f32 to vector<17x1xf32>
    %125 = arith.divf %123, %124 : vector<17x1xf32>
    %126 = vector.broadcast %125 : vector<17x1xf32> to vector<17x64xf32>
    %127 = arith.subf %119, %126 : vector<17x64xf32>
    %128 = arith.mulf %127, %127 : vector<17x64xf32>
    %cst_74 = arith.constant dense<0.000000e+00> : vector<17xf32>
    %129 = vector.multi_reduction <add>, %128, %cst_74 [1] : vector<17x64xf32> to vector<17xf32>
    %130 = vector.shape_cast %129 : vector<17xf32> to vector<17x1xf32>
    %cst_75 = arith.constant 6.400000e+01 : f32
    %131 = vector.broadcast %cst_75 : f32 to vector<17x1xf32>
    %132 = arith.divf %130, %131 : vector<17x1xf32>
    %133 = vector.broadcast %125 : vector<17x1xf32> to vector<17x64xf32>
    %134 = arith.subf %119, %133 : vector<17x64xf32>
    %cst_76 = arith.constant 9.99999974E-6 : f32
    %135 = vector.broadcast %cst_76 : f32 to vector<17x1xf32>
    %136 = arith.addf %132, %135 : vector<17x1xf32>
    %137 = math.rsqrt %136 : vector<17x1xf32>
    %138 = vector.broadcast %137 : vector<17x1xf32> to vector<17x64xf32>
    %139 = arith.mulf %134, %138 : vector<17x64xf32>
    %140 = vector.broadcast %120 : vector<1x64xf32> to vector<17x64xf32>
    %141 = arith.mulf %139, %140 : vector<17x64xf32>
    %142 = vector.broadcast %121 : vector<1x64xf32> to vector<17x64xf32>
    %143 = arith.addf %141, %142 : vector<17x64xf32>
    %144 = arith.truncf %143 : vector<17x64xf32> to vector<17x64xbf16>
    %c0_77 = arith.constant 0 : index
    %c0_78 = arith.constant 0 : index
    %145 = vector.load %arg10[%c0_77, %c0_78] : memref<64x256xbf16, #tpu.memory_space<vmem>>, vector<64x256xbf16>
    %cst_79 = arith.constant dense<0.000000e+00> : vector<17x256xf32>
    %146 = tpu.matmul %144, %145, %cst_79 {dimension_numbers = #tpu.dot_dimension_numbers<[1], [0], [0], [1], [0, 0, 1, 1], [], []>} : vector<17x64xbf16>, vector<64x256xbf16>, vector<17x256xf32> -> vector<17x256xf32>
    %c0_80 = arith.constant 0 : index
    %c0_81 = arith.constant 0 : index
    %147 = vector.load %arg11[%c0_80, %c0_81] : memref<1x256xf32, #tpu.memory_space<vmem>>, vector<1x256xf32>
    %148 = vector.broadcast %147 : vector<1x256xf32> to vector<17x256xf32>
    %149 = arith.addf %146, %148 : vector<17x256xf32>
    %cst_82 = arith.constant 1.702000e+00 : f32
    %150 = vector.broadcast %cst_82 : f32 to vector<17x256xf32>
    %151 = arith.mulf %150, %149 : vector<17x256xf32>
    %152 = arith.negf %151 : vector<17x256xf32>
    %153 = math.exp %152 : vector<17x256xf32>
    %cst_83 = arith.constant 1.000000e+00 : f32
    %154 = vector.broadcast %cst_83 : f32 to vector<17x256xf32>
    %155 = arith.addf %154, %153 : vector<17x256xf32>
    %156 = arith.divf %154, %155 : vector<17x256xf32>
    %157 = arith.mulf %149, %156 : vector<17x256xf32>
    %158 = arith.truncf %157 : vector<17x256xf32> to vector<17x256xbf16>
    %c0_84 = arith.constant 0 : index
    %c0_85 = arith.constant 0 : index
    %159 = vector.load %arg12[%c0_84, %c0_85] : memref<256x64xbf16, #tpu.memory_space<vmem>>, vector<256x64xbf16>
    %cst_86 = arith.constant dense<0.000000e+00> : vector<17x64xf32>
    %160 = tpu.matmul %158, %159, %cst_86 {dimension_numbers = #tpu.dot_dimension_numbers<[1], [0], [0], [1], [0, 0, 1, 1], [], []>} : vector<17x256xbf16>, vector<256x64xbf16>, vector<17x64xf32> -> vector<17x64xf32>
    %c0_87 = arith.constant 0 : index
    %c0_88 = arith.constant 0 : index
    %161 = vector.load %arg13[%c0_87, %c0_88] : memref<1x64xf32, #tpu.memory_space<vmem>>, vector<1x64xf32>
    %162 = vector.broadcast %161 : vector<1x64xf32> to vector<17x64xf32>
    %163 = arith.addf %160, %162 : vector<17x64xf32>
    %164 = arith.addf %119, %163 : vector<17x64xf32>
    %c0_89 = arith.constant 0 : index
    %c0_90 = arith.constant 0 : index
    %c0_91 = arith.constant 0 : index
    %165 = vector.load %arg14[%c0_89, %c0_90, %c0_91] : memref<1x17x64xf32, #tpu.memory_space<vmem>>, vector<1x17x64xf32>
    %166 = vector.shape_cast %165 : vector<1x17x64xf32> to vector<17x64xf32>
    %167 = vector.shape_cast %164 : vector<17x64xf32> to vector<1x17x64xf32>
    tpu.vector_store %arg14[%c0_89, %c0_90, %c0_91], %167 {strides = array<i32>} : memref<1x17x64xf32, #tpu.memory_space<vmem>>, vector<1x17x64xf32>,
    return
  }
  func.func @transform_0(%arg0: i32) -> (i32, i32, i32) {
    %c0_i32 = arith.constant 0 : i32
    %c0_i32_0 = arith.constant 0 : i32
    %c0_i32_1 = arith.constant 0 : i32
    return %arg0, %c0_i32, %c0_i32_0 : i32, i32, i32
  }
  func.func @transform_1(%arg0: i32) -> (i32, i32) {
    %c0_i32 = arith.constant 0 : i32
    %c0_i32_0 = arith.constant 0 : i32
    %c0_i32_1 = arith.constant 0 : i32
    return %c0_i32, %c0_i32_0 : i32, i32
  }
  func.func @transform_2(%arg0: i32) -> (i32, i32) {
    %c0_i32 = arith.constant 0 : i32
    %c0_i32_0 = arith.constant 0 : i32
    %c0_i32_1 = arith.constant 0 : i32
    return %c0_i32, %c0_i32_0 : i32, i32
  }
  func.func @transform_3(%arg0: i32) -> (i32, i32, i32) {
    %c0_i32 = arith.constant 0 : i32
    %c0_i32_0 = arith.constant 0 : i32
    %c0_i32_1 = arith.constant 0 : i32
    %c0_i32_2 = arith.constant 0 : i32
    return %c0_i32, %c0_i32_0, %c0_i32_1 : i32, i32, i32
  }
  func.func @transform_4(%arg0: i32) -> (i32, i32, i32) {
    %c0_i32 = arith.constant 0 : i32
    %c0_i32_0 = arith.constant 0 : i32
    %c0_i32_1 = arith.constant 0 : i32
    %c0_i32_2 = arith.constant 0 : i32
    return %c0_i32, %c0_i32_0, %c0_i32_1 : i32, i32, i32
  }
  func.func @transform_5(%arg0: i32) -> (i32, i32, i32) {
    %c0_i32 = arith.constant 0 : i32
    %c0_i32_0 = arith.constant 0 : i32
    %c0_i32_1 = arith.constant 0 : i32
    %c0_i32_2 = arith.constant 0 : i32
    return %c0_i32, %c0_i32_0, %c0_i32_1 : i32, i32, i32
  }
  func.func @transform_6(%arg0: i32) -> (i32, i32) {
    %c0_i32 = arith.constant 0 : i32
    %c0_i32_0 = arith.constant 0 : i32
    %c0_i32_1 = arith.constant 0 : i32
    return %c0_i32, %c0_i32_0 : i32, i32
  }
  func.func @transform_7(%arg0: i32) -> (i32, i32) {
    %c0_i32 = arith.constant 0 : i32
    %c0_i32_0 = arith.constant 0 : i32
    %c0_i32_1 = arith.constant 0 : i32
    return %c0_i32, %c0_i32_0 : i32, i32
  }
  func.func @transform_8(%arg0: i32) -> (i32, i32) {
    %c0_i32 = arith.constant 0 : i32
    %c0_i32_0 = arith.constant 0 : i32
    %c0_i32_1 = arith.constant 0 : i32
    return %c0_i32, %c0_i32_0 : i32, i32
  }
  func.func @transform_9(%arg0: i32) -> (i32, i32) {
    %c0_i32 = arith.constant 0 : i32
    %c0_i32_0 = arith.constant 0 : i32
    %c0_i32_1 = arith.constant 0 : i32
    return %c0_i32, %c0_i32_0 : i32, i32
  }
  func.func @transform_10(%arg0: i32) -> (i32, i32) {
    %c0_i32 = arith.constant 0 : i32
    %c0_i32_0 = arith.constant 0 : i32
    %c0_i32_1 = arith.constant 0 : i32
    return %c0_i32, %c0_i32_0 : i32, i32
  }
  func.func @transform_11(%arg0: i32) -> (i32, i32) {
    %c0_i32 = arith.constant 0 : i32
    %c0_i32_0 = arith.constant 0 : i32
    %c0_i32_1 = arith.constant 0 : i32
    return %c0_i32, %c0_i32_0 : i32, i32
  }
  func.func @transform_12(%arg0: i32) -> (i32, i32) {
    %c0_i32 = arith.constant 0 : i32
    %c0_i32_0 = arith.constant 0 : i32
    %c0_i32_1 = arith.constant 0 : i32
    return %c0_i32, %c0_i32_0 : i32, i32
  }
  func.func @transform_13(%arg0: i32) -> (i32, i32, i32) {
    %c0_i32 = arith.constant 0 : i32
    %c0_i32_0 = arith.constant 0 : i32
    %c0_i32_1 = arith.constant 0 : i32
    return %arg0, %c0_i32, %c0_i32_0 : i32, i32, i32
  }
}

</mosaic_0001>

<bundles_post_ra>
// kernel: clip_model_forward.5
= control target key start
LH: loop header
LB: loop body
LE: loop exit
PB: predicated region body
PF: predicated region fallthrough
CT: control target
= control target key end

     0   :  { %s759_s9 = smov 0   ;;  %s761_s10 = smov 0   ;;  %s874_s0 = inlined_call_operand.vmem [shape: f32[32,768], index: 0, kind: input, shape index: {}]   ;;  %s875_s1 = inlined_call_operand.vmem [shape: bf16[768,64], index: 1, kind: input, shape index: {}]   ;;  %s876_s2 = inlined_call_operand.vmem [shape: f32[32,64], index: 2, kind: output, shape index: {}]  }
   0x1   :  { %s763_s11 = smov 0   ;;  %s765_s12 = smov 0  }
   0x2   :  { %s767_s13 = smov 0  }
   0x3 LB: > { %s24_s14 = sadd.s32 1, %s737_s12  ;;  %p47_p1 = scmp.ne.s32.totalorder %s729_s10, %s725_s9  ;;  %s741_s13 = sphi %s767_s13, %s12_s13   ;;  %s737_s12 = sphi %s765_s12, %s880_s12   ;;  %s733_s11 = sphi %s763_s11, %s879_s11   ;;  %s729_s10 = sphi %s761_s10, %s878_s10   ;;  %s725_s9 = sphi %s759_s9, %s877_s9  }
   0x4   : > { %p25_p0 = scmp.ge.s32.totalorder %s24_s14, 3  ;;  %p48_p2 = scmp.eq.s32.totalorder %s741_s13, 0 }
   0x5   : > { %s40_s16 = sadd.s32 1, %s729_s10  ;;  %p571_p5 = scmp.ge.s32.totalorder %s741_s13, 3 }
   0x6   : > { %s882_s14 = smov (%p25_p0, %s24_s14), 0  ;;  %p49_p3 = por %p48_p2, %p47_p1 }
   0x7   : > { %s36_s15 = ssub.s32 %s737_s12, %s882_s14  ;;  %129 = sbr.rel (%p571_p5) target bundleno = 22 (0x16), region = 16 }
   0x8   : > { %p38_p4 = scmp.eq.s32.totalorder %s36_s15, 0 }
   0xa   : > { %s794_s17 = scalar_select %p38_p4, %s729_s10, %s40_s16  }
   0xe   : > { %132 = sbr.rel (!%p49_p3) target bundleno = 22 (0x16), region = 20  ;;  %s134_s18 = sand.u32 (%p49_p3), 1, %s729_s10  }
   0xf   : > { %s601_s19 = sshll.u32 (%p49_p3), %s737_s12, 4  ;;  %s572_s20 = sshll.u32 (%p49_p3), %s134_s18, 6 }
  0x10   : > { %s142_s23 = scalar_lea.vmem (%p49_p3), %s874_s0, %s601_s19  ;;  %s136_s24 = scalar_lea.vmem (%p49_p3), [#allocation3], %s572_s20 }
  0x11   : > { %v155_v0 = vld [vmem:[%s142_s23] sm:$0xff] (%p49_p3)  ;;  %v157_v1 = vld [vmem:[%s142_s23 + $0x8] sm:$0xff] (%p49_p3)  ;;  %v159_v2 = vld [vmem:[%s142_s23 + $0x30] sm:$0xff] (%p49_p3) }
  0x12   : > { %156 = vst [vmem:[%s136_s24] sm:$0xff] (%p49_p3), %v155_v0  ;;  %158 = vst [vmem:[%s136_s24 + $0x8] sm:$0xff] (%p49_p3), %v157_v1  ;;  %v161_v3 = vld [vmem:[%s142_s23 + $0x38] sm:$0xff] (%p49_p3)  ;;  %v163_v4 = vld [vmem:[%s142_s23 + $0x60] sm:$0xff] (%p49_p3) }
  0x13   : > { %160 = vst [vmem:[%s136_s24 + $0x10] sm:$0xff] (%p49_p3), %v159_v2  ;;  %v165_v5 = vld [vmem:[%s142_s23 + $0x68] sm:$0xff] (%p49_p3)  ;;  %162 = vst [vmem:[%s136_s24 + $0x18] sm:$0xff] (%p49_p3), %v161_v3  ;;  %v167_v6 = vld [vmem:[%s142_s23 + $0x90] sm:$0xff] (%p49_p3) }
  0x14   : > { %164 = vst [vmem:[%s136_s24 + $0x20] sm:$0xff] (%p49_p3), %v163_v4  ;;  %166 = vst [vmem:[%s136_s24 + $0x28] sm:$0xff] (%p49_p3), %v165_v5  ;;  %v169_v7 = vld [vmem:[%s142_s23 + $0x98] sm:$0xff] (%p49_p3) }
  0x15   : > { %168 = vst [vmem:[%s136_s24 + $0x30] sm:$0xff] %v167_v6  ;;  %170 = vst [vmem:[%s136_s24 + $0x38] sm:$0xff] %v169_v7 }
  0x16 PF: > { %p575_p6 = scmp.ge.s32.totalorder %s741_s13, 1  ;;  %p187_p7 = scmp.lt.s32.totalorder %s741_s13, 4 }
  0x18   : > { %p188_p8 = pnand %p575_p6, %p187_p7 }
  0x19   : > { %s194_s25 = sand.u32 (!%p188_p8), 1, %s725_s9   ;;  %s577_s26 = sshll.u32 (!%p188_p8), %s733_s11, 5 }
  0x1a   : > { %191 = sbr.rel (%p188_p8) target bundleno = 301 (0x12d), region = 47  ;;  %s576_s27 = sshll.u32 (!%p188_p8), %s194_s25, 6 }
  0x1b   : > { %p229_p9 = scmp.lt.s32.totalorder (!%p188_p8), %s577_s26, 95  ;;  %s811_s4 = scalar_lea.vmem (!%p188_p8), [#allocation3], %s576_s27 }
  0x1c   : > { %p579_p10 = scmp.ne.s32.totalorder (!%p188_p8), %s733_s11, 0 }
  0x21   : > { %s884_s26 = smov (!%p229_p9, %s577_s26), 95  ;;  %250 = sbr.rel (%p579_p10) target bundleno = 40 (0x28), region = 55 }
  0x22   : > { %s578_s28 = sshll.u32 %s884_s26, 2  ;;  %vm251_vm0 = vcmask (!%p579_p10), 523264   ;;  %v743_v8 = vmov (!%p579_p10), 0.0  }
  0x23   : > { %s809_s3 = scalar_lea.vmem %s875_s1, %s578_s28  ;;  %252 = vst.msk [vmem:[#allocation2] sm:$0xff] (!%p579_p10), %vm251_vm0, %v743_v8  ;;  %253 = vst.msk [vmem:[#allocation2 + $0x8] sm:$0xff] (!%p579_p10), %vm251_vm0, %v743_v8 }
  0x24   : > { %254 = vst.msk [vmem:[#allocation2 + $0x10] sm:$0xff] (!%p579_p10), %vm251_vm0, %v743_v8  ;;  %255 = vst.msk [vmem:[#allocation2 + $0x18] sm:$0xff] (!%p579_p10), %vm251_vm0, %v743_v8 }
  0x28 PF: > { %v687_v9 = vld [vmem:[%s809_s3 + $0x40] sm:$0xff]   ;;  %v689_v11 = vld [vmem:[%s809_s3 + $0x48] sm:$0xff]   ;;  %v691_v13 = vld [vmem:[%s809_s3 + $0x50] sm:$0xff]   ;;  %vm453_vm1 = vcmask 523264   ;;  %p596_p11 = scmp.ne.s32.totalorder %s733_s11, 2 }
  0x29   : > { %v688_v10 = vld [vmem:[%s809_s3] sm:$0xff]   ;;  %602 = vmatprep.subr.bf16.mxu0 %v687_v9  ;;  %630 = vmatprep.subr.bf16.mxu1 %v687_v9  ;;  %v690_v12 = vld [vmem:[%s809_s3 + $0x8] sm:$0xff]   ;;  %v692_v14 = vld [vmem:[%s809_s3 + $0x10] sm:$0xff]  }
  0x2a   : > { %603 = vmatpush3.bf16.msra.mxu0 %v688_v10  ;;  %638 = vmatpush3.bf16.msra.mxu1 %v688_v10  ;;  %v693_v15 = vld [vmem:[%s809_s3 + $0x58] sm:$0xff]   ;;  %v695_v17 = vld [vmem:[%s809_s3 + $0x60] sm:$0xff]   ;;  %v697_v19 = vld [vmem:[%s809_s3 + $0x68] sm:$0xff]  }
  0x2b   : > { %604 = vmatprep.subr.bf16.mxu0 %v689_v11  ;;  %631 = vmatprep.subr.bf16.mxu1 %v689_v11  ;;  %v694_v16 = vld [vmem:[%s809_s3 + $0x18] sm:$0xff]   ;;  %v696_v18 = vld [vmem:[%s809_s3 + $0x20] sm:$0xff]   ;;  %v261_v20 = vld [vmem:[%s811_s4 + $0x8] sm:$0xff] }
  0x2c   : > { %v263_v21 = vld [vmem:[%s811_s4 + $0x18] sm:$0xff]  ;;  %v265_v22 = vld [vmem:[%s811_s4 + $0x28] sm:$0xff]  ;;  %v699_v27 = vld [vmem:[%s809_s3 + $0x70] sm:$0xff]  }
  0x2d   : > { %v269_v23 = vpack.c.bf16 %v263_v21, %v261_v20  ;;  %v267_v24 = vld [vmem:[%s811_s4 + $0x38] sm:$0xff]  ;;  %v698_v26 = vld [vmem:[%s809_s3 + $0x28] sm:$0xff]   ;;  %v700_v28 = vld [vmem:[%s809_s3 + $0x30] sm:$0xff]  }
  0x2e   : > { %605 = vmatpush3.bf16.msra.mxu0 %v690_v12  ;;  %639 = vmatpush3.bf16.msra.mxu1 %v690_v12  ;;  %v271_v25 = vpack.c.bf16 %v267_v24, %v265_v22  ;;  %v701_v29 = vld [vmem:[%s809_s3 + $0x78] sm:$0xff]   ;;  %v260_v31 = vld [vmem:[%s811_s4] sm:$0xff]  ;;  %v262_v32 = vld [vmem:[%s811_s4 + $0x10] sm:$0xff] }
  0x2f   : > { %606 = vmatprep.subr.bf16.mxu0 %v691_v13  ;;  %632 = vmatprep.subr.bf16.mxu1 %v691_v13  ;;  %v702_v30 = vld [vmem:[%s809_s3 + $0x38] sm:$0xff]   ;;  %v264_v33 = vld [vmem:[%s811_s4 + $0x20] sm:$0xff]  ;;  %v266_v34 = vld [vmem:[%s811_s4 + $0x30] sm:$0xff]  ;;  %v268_v35 = vpack.c.bf16 %v262_v32, %v260_v31 }
  0x30   : > { %432 = vmatprep.mubr.bf16.mxu0 %v269_v23  ;;  %440 = vmatprep.mubr.bf16.mxu1 %v271_v25  ;;  %v270_v36 = vpack.c.bf16 %v266_v34, %v264_v33  ;;  %v256_v39 = vld [vmem:[#allocation2] sm:$0xff]  ;;  %v258_v41 = vld [vmem:[#allocation2 + $0x10] sm:$0xff]  ;;  %v257_v47 = vld [vmem:[#allocation2 + $0x8] sm:$0xff] }
  0x31   : > { %v259_v49 = vld [vmem:[#allocation2 + $0x18] sm:$0xff] }
  0x32   : > { %607 = vmatpush3.bf16.msra.mxu0 %v692_v14  ;;  %640 = vmatpush3.bf16.msra.mxu1 %v692_v14 }
  0x33   : > { %608 = vmatprep.subr.bf16.mxu0 %v693_v15  ;;  %633 = vmatprep.subr.bf16.mxu1 %v693_v15 }
  0x36   : > { %609 = vmatpush3.bf16.msra.mxu0 %v694_v16  ;;  %641 = vmatpush3.bf16.msra.mxu1 %v694_v16 }
  0x37   : > { %610 = vmatprep.subr.bf16.mxu0 %v695_v17  ;;  %634 = vmatprep.subr.bf16.mxu1 %v695_v17 }
  0x3a   : > { %611 = vmatpush3.bf16.msra.mxu0 %v696_v18  ;;  %642 = vmatpush3.bf16.msra.mxu1 %v696_v18 }
  0x3b   : > { %612 = vmatprep.subr.bf16.mxu0 %v697_v19  ;;  %635 = vmatprep.subr.bf16.mxu1 %v697_v19 }
  0x3e   : > { %613 = vmatpush3.bf16.msra.mxu0 %v698_v26  ;;  %643 = vmatpush3.bf16.msra.mxu1 %v698_v26 }
  0x3f   : > { %614 = vmatprep.subr.bf16.mxu0 %v699_v27  ;;  %636 = vmatprep.subr.bf16.mxu1 %v699_v27 }
  0x42   : > { %615 = vmatpush3.bf16.msra.mxu0 %v700_v28  ;;  %644 = vmatpush3.bf16.msra.mxu1 %v700_v28 }
  0x43   : > { %616 = vmatprep.subr.bf16.mxu0 %v701_v29  ;;  %637 = vmatprep.subr.bf16.mxu1 %v701_v29 }
  0x46   : > { %617 = vmatpush3.bf16.msra.mxu0 %v702_v30  ;;  %645 = vmatpush3.bf16.msra.mxu1 %v702_v30 }
  0x49   : > { %433 = vmatmul.mubr.bf16.vlgmr.msra.gmra.mrb[0].mxu0 %v268_v35  ;;  %441 = vmatmul.mubr.bf16.vlgmr.msra.gmra.mrb[0].mxu1 %v270_v36 }
 0x11c   : > { %v618_v37 = vpop.f32.mrb[0].mxu0  ;;  %v624_v38 = vpop.f32.mrb[0].mxu1 }
 0x11d   : > { %v619_v40 = vpop.f32.mrb[1].mxu0  ;;  %v625_v42 = vpop.f32.mrb[1].mxu1 }
 0x11e   : > { %v620_v43 = vadd.f32 %v619_v40, %v618_v37  ;;  %v626_v44 = vadd.f32 %v625_v42, %v624_v38  ;;  %v621_v45 = vpop.f32.mrb[2].mxu0  ;;  %v627_v46 = vpop.f32.mrb[2].mxu1  ;;  %461 = sbr.rel (%p596_p11) target bundleno = 301 (0x12d), region = 59 }
 0x11f   : > { %v622_v48 = vpop.f32.mrb[3].mxu0  ;;  %v628_v50 = vpop.f32.mrb[3].mxu1 }
 0x120   : > { %v449_v51 = vadd.f32 %v620_v43, %v256_v39  ;;  %v451_v52 = vadd.f32 %v626_v44, %v258_v41  ;;  %v623_v53 = vadd.f32 %v622_v48, %v621_v45  ;;  %v629_v54 = vadd.f32 %v628_v50, %v627_v46 }
 0x122   : > { %454 = vst.msk [vmem:[#allocation2] sm:$0xff] %vm453_vm1, %v449_v51  ;;  %456 = vst.msk [vmem:[#allocation2 + $0x10] sm:$0xff] %vm453_vm1, %v451_v52  ;;  %v450_v55 = vadd.f32 %v623_v53, %v257_v47  ;;  %v452_v56 = vadd.f32 %v629_v54, %v259_v49 }
 0x124   : > { %455 = vst.msk [vmem:[#allocation2 + $0x8] sm:$0xff] %vm453_vm1, %v450_v55  ;;  %457 = vst.msk [vmem:[#allocation2 + $0x18] sm:$0xff] %vm453_vm1, %v452_v56 }
 0x129   : > { %v462_v57 = vld [vmem:[#allocation2] sm:$0xff]  ;;  %v464_v59 = vld [vmem:[#allocation2 + $0x10] sm:$0xff] }
 0x12a   : > { %466 = vst.msk [vmem:[%s876_s2] sm:$0xff] %vm453_vm1, %v462_v57  ;;  %468 = vst.msk [vmem:[%s876_s2 + $0x10] sm:$0xff] %vm453_vm1, %v464_v59 }
 0x12b   : > { %v463_v58 = vld [vmem:[#allocation2 + $0x8] sm:$0xff]  ;;  %v465_v60 = vld [vmem:[#allocation2 + $0x18] sm:$0xff] }
 0x12c   : > { %467 = vst.msk [vmem:[%s876_s2 + $0x8] sm:$0xff] %vm453_vm1, %v463_v58  ;;  %469 = vst.msk [vmem:[%s876_s2 + $0x18] sm:$0xff] %vm453_vm1, %v465_v60 }
 0x12d PF: > { %s12_s13 = sadd.s32 1, %s741_s13   ;;  %s877_s9 = smov %s729_s10 }
 0x12e   : > { %p9_p12 = scmp.ge.s32.totalorder %s12_s13, 5   ;;  %s878_s10 = smov %s794_s17 }
 0x12f   : > { %s879_s11 = smov %s737_s12  ;;  %s880_s12 = smov %s882_s14 }
 0x130   :  { %11 = sbr.rel (!%p9_p12) target bundleno = 3 (0x3), region = 97 }

// kernel: clip_model_forward.6
= control target key start
LH: loop header
LB: loop body
LE: loop exit
PB: predicated region body
PF: predicated region fallthrough
CT: control target
= control target key end

     0   :  { %s386_s15 = smov 0   ;;  %s434_s0 = inlined_call_operand.vmem [shape: f32[2,17,64], index: 0, kind: input, shape index: {}]   ;;  %s435_s1 = inlined_call_operand.vmem [shape: f32[17,64], index: 1, kind: input, shape index: {}]   ;;  %s436_s2 = inlined_call_operand.vmem [shape: f32[1,64], index: 2, kind: input, shape index: {}]   ;;  %s437_s3 = inlined_call_operand.vmem [shape: f32[1,64], index: 3, kind: input, shape index: {}]   ;;  %s438_s4 = inlined_call_operand.vmem [shape: f32[2,17,64], index: 4, kind: output, shape index: {}]  }
   0x1 LB: > { %s327_s16 = sadd.s32 4294967295, %s359_s15   ;;  %p331_p0 = scmp.ge.s32.totalorder %s359_s15, 1  ;;  %s359_s15 = sphi %s386_s15, %s14_s15  }
   0x2   : > { %p162_p1 = scmp.lt.s32.totalorder %s359_s15, 3 }
   0x4   : > { %p163_p2 = pnand %p331_p0, %p162_p1 }
   0x5   : > { %p188_p3 = scmp.lt.s32.totalorder (!%p163_p2), %s327_s16, 1  ;;  %v201_v0 = vld [vmem:[%s435_s1] sm:$0xff] (!%p163_p2)  ;;  %v203_v1 = vld [vmem:[%s435_s1 + $0x10] sm:$0x1] (!%p163_p2)  ;;  %v202_v2 = vld [vmem:[%s435_s1 + $0x8] sm:$0xff] (!%p163_p2)  ;;  %vm209_vm0 = vcmask (!%p163_p2), 523264  }
   0x6   : > { %166 = sbr.rel (%p163_p2) target bundleno = 339 (0x153), region = 36  ;;  %vm216_vm1 = vcmask (!%p163_p2), 516096   ;;  %v334_v37 = vld [vmem:[%s436_s2] ss:$0 sm:$0xff] (!%p163_p2) }
   0x7   : > { %v335_v39 = vld [vmem:[%s437_s3] ss:$0 sm:$0xff] (!%p163_p2) }
   0xd   : > { %s440_s16 = smov (!%p188_p3, %s327_s16), 1 }
   0xe   : > { %s338_s17 = smul.u32 24, %s440_s16 }
  0x10   : > { %s192_s26 = scalar_lea.vmem %s434_s0, %s338_s17  ;;  %s197_s7 = scalar_lea.vmem %s438_s4, %s338_s17 }
  0x11   : > { %v198_v3 = vld [vmem:[%s192_s26] sm:$0xff]  ;;  %v200_v4 = vld [vmem:[%s192_s26 + $0x10] sm:$0x1]  ;;  %v199_v5 = vld [vmem:[%s192_s26 + $0x8] sm:$0xff] }
  0x12   : > { %v204_v6 = vadd.f32 %v201_v0, %v198_v3  ;;  %v206_v7 = vadd.f32 %v203_v1, %v200_v4  ;;  %v205_v8 = vadd.f32 %v202_v2, %v199_v5 }
  0x14   : > { %v210_v9 = vsel %vm209_vm0, %v204_v6, 0.0  ;;  %v217_v10 = vsel %vm216_vm1, %v206_v7, 0.0  ;;  %v213_v11 = vsel %vm209_vm0, %v205_v8, 0.0 }
  0x15   : > { %211 = vadd.xlane.f32.xlu0 %v210_v9  ;;  %218 = vadd.xlane.f32.xlu1 %v217_v10 }
  0x19   : > { %214 = vadd.xlane.f32.xlu0 %v213_v11 }
  0xa2   : > { %v212_v12 = vpop.xlane.xlu0 %211  ;;  %v219_v13 = vpop.xlane.xlu1 %218 }
  0xa3   : > { %v221_v14 = vmul.f32 0.015625, %v212_v12  ;;  %v223_v15 = vmul.f32 0.015625, %v219_v13 }
  0xa5   : > { %v224_v16 = vsub.f32 %v204_v6, %v221_v14  ;;  %v226_v17 = vsub.f32 %v206_v7, %v223_v15 }
  0xa6   : > { %v215_v18 = vpop.xlane.xlu0 %214 }
  0xa7   : > { %v222_v19 = vmul.f32 0.015625, %v215_v18  ;;  %v227_v20 = vmul.f32 %v224_v16, %v224_v16  ;;  %v229_v21 = vmul.f32 %v226_v17, %v226_v17 }
  0xa9   : > { %v225_v22 = vsub.f32 %v205_v8, %v222_v19  ;;  %v230_v23 = vsel %vm209_vm0, %v227_v20, 0.0  ;;  %v236_v24 = vsel %vm216_vm1, %v229_v21, 0.0 }
  0xaa   : > { %231 = vadd.xlane.f32.xlu1 %v230_v23 }
  0xab   : > { %v228_v25 = vmul.f32 %v225_v22, %v225_v22 }
  0xad   : > { %v233_v26 = vsel %vm209_vm0, %v228_v25, 0.0 }
  0xae   : > { %237 = vadd.xlane.f32.xlu1 %v236_v24  ;;  %234 = vadd.xlane.f32.xlu0 %v233_v26 }
 0x137   : > { %v232_v27 = vpop.xlane.xlu1 %231 }
 0x138   : > { %v239_v28 = vmul.f32 0.015625, %v232_v27 }
 0x13a   : > { %v242_v29 = vadd.f32 1e-05, %v239_v28 }
 0x13b   : > { %v238_v30 = vpop.xlane.xlu1 %237  ;;  %v235_v31 = vpop.xlane.xlu0 %234 }
 0x13c   : > { %347 = vrsqrt.f32 %v242_v29  ;;  %v241_v32 = vmul.f32 0.015625, %v238_v30  ;;  %v240_v33 = vmul.f32 0.015625, %v235_v31 }
 0x13e   : > { %v244_v34 = vadd.f32 1e-05, %v241_v32  ;;  %v243_v35 = vadd.f32 1e-05, %v240_v33 }
 0x140   : > { %349 = vrsqrt.f32 %v244_v34 }
 0x141   : > { %351 = vrsqrt.f32 %v243_v35 }
 0x146   : > { %v348_v36 = vpop.eup %347 }
 0x147   : > { %v248_v38 = vmul.f32 %v348_v36, %v224_v16 }
 0x149   : > { %v257_v40 = vmul.f32 %v334_v37, %v248_v38 }
 0x14a   : > { %v350_v41 = vpop.eup %349 }
 0x14b   : > { %v352_v42 = vpop.eup %351  ;;  %v266_v43 = vadd.f32 %v335_v39, %v257_v40  ;;  %v250_v44 = vmul.f32 %v350_v41, %v226_v17 }
 0x14c   : > { %v249_v45 = vmul.f32 %v352_v42, %v225_v22 }
 0x14d   : > { %269 = vst.msk [vmem:[%s197_s7] sm:$0xff] %vm209_vm0, %v266_v43  ;;  %v259_v46 = vmul.f32 %v334_v37, %v250_v44 }
 0x14e   : > { %v258_v47 = vmul.f32 %v334_v37, %v249_v45 }
 0x14f   : > { %v268_v48 = vadd.f32 %v335_v39, %v259_v46 }
 0x150   : > { %v267_v49 = vadd.f32 %v335_v39, %v258_v47 }
 0x151   : > { %271 = vst.msk [vmem:[%s197_s7 + $0x10] sm:$0x1] %vm216_vm1, %v268_v48 }
 0x152   : > { %270 = vst.msk [vmem:[%s197_s7 + $0x8] sm:$0xff] %vm209_vm0, %v267_v49 }
 0x153 PF: > { %s14_s15 = sadd.s32 1, %s359_s15  }
 0x154   : > { %p11_p4 = scmp.ge.s32.totalorder %s14_s15, 4  }
 0x156   :  { %13 = sbr.rel (!%p11_p4) target bundleno = 1 (0x1), region = 66 }

// kernel: clip_model_forward.9
= control target key start
LH: loop header
LB: loop body
LE: loop exit
PB: predicated region body
PF: predicated region fallthrough
CT: control target
= control target key end

     0   :  { %17 = vsyncpa [#allocation3], 0  ;;  %vm41_vm0 = vcmask 517120   ;;  %s2600_s0 = inlined_call_operand.vmem [shape: f32[2,64], index: 0, kind: input, shape index: {}]   ;;  %s2601_s1 = inlined_call_operand.vmem [shape: f32[1,64], index: 1, kind: input, shape index: {}]   ;;  %s2602_s2 = inlined_call_operand.vmem [shape: f32[1,64], index: 2, kind: input, shape index: {}]   ;;  %s2603_s3 = inlined_call_operand.vmem [shape: bf16[64,512], index: 3, kind: input, shape index: {}]   ;;  %s2604_s4 = inlined_call_operand.vmem [shape: bf16[512,128], index: 4, kind: input, shape index: {}]   ;;  %s2605_s5 = inlined_call_operand.vmem [shape: bf16[512,256], index: 5, kind: input, shape index: {}]   ;;  %s2606_s6 = inlined_call_operand.vmem [shape: bf16[256,128], index: 6, kind: input, shape index: {}]   ;;  %s2607_s7 = inlined_call_operand.vmem [shape: bf16[128,128], index: 7, kind: input, shape index: {}]   ;;  %s2608_s8 = inlined_call_operand.vmem [shape: bf16[128,128], index: 8, kind: input, shape index: {}]   ;;  %s2609_s9 = inlined_call_operand.hbm [shape: f32[2,512], index: 9, kind: output, shape index: {0}]   ;;  %s2610_s10 = inlined_call_operand.hbm [shape: f32[2,128], index: 10, kind: output, shape index: {1}]   ;;  %s2611_s11 = inlined_call_operand.vmem [shape: f32[1,128], index: 11, kind: output, shape index: {2}]  }
   0x1   :  { %v38_v0 = vld [vmem:[%s2600_s0] sm:$0x3] }
   0x2   :  { %v42_v1 = vsel %vm41_vm0, %v38_v0, 0.0 }
   0x3   :  { %43 = vadd.xlane.f32.xlu0 %v42_v1 }
   0x4   :  { %18 = vsyncpa [#allocation5], 0  ;;  %v1798_v7 = vld [vmem:[%s2603_s3 + $0x4] ss:$16 sps:$4 sm:$0xff]   ;;  %v1800_v8 = vld [vmem:[%s2603_s3] ss:$16 sps:$4 sm:$0xff]  }
   0x5   :  { %171 = vmatprep.subr.bf16.mxu1 %v1798_v7  ;;  %v1801_v9 = vld [vmem:[%s2603_s3 + $0x24] ss:$16 sps:$4 sm:$0xff]   ;;  %v1803_v10 = vld [vmem:[%s2603_s3 + $0x20] ss:$16 sps:$4 sm:$0xff]   ;;  %v2034_v15 = vmov 0   ;;  %v1824_v19 = vld [vmem:[%s2604_s4 + $0x48] sm:$0xff]  }
   0x6   :  { %172 = vmatpush1.bf16.msra.mxu1 %v1800_v8  ;;  %v1804_v11 = vld [vmem:[%s2603_s3 + $0x44] ss:$16 sps:$4 sm:$0xff]   ;;  %v1806_v12 = vld [vmem:[%s2603_s3 + $0x40] ss:$16 sps:$4 sm:$0xff]   ;;  %203 = vmatprep.mubr.bf16.mxu1 %v2034_v15  ;;  %v1812_v16 = vld [vmem:[%s2603_s3 + $0xc] ss:$16 sps:$4 sm:$0xff]  }
   0x7   :  { %173 = vmatprep.subr.bf16.mxu1 %v1801_v9  ;;  %v1807_v13 = vld [vmem:[%s2603_s3 + $0x64] ss:$16 sps:$4 sm:$0xff]   ;;  %v1809_v14 = vld [vmem:[%s2603_s3 + $0x60] ss:$16 sps:$4 sm:$0xff]   ;;  %v1825_v20 = vld [vmem:[%s2604_s4 + $0x8] sm:$0xff]   ;;  %vm167_vm1 = vcmask 523264  }
   0x8   :  { %v1822_v17 = vld [vmem:[%s2604_s4 + $0x40] sm:$0xff]   ;;  %v1826_v21 = vld [vmem:[%s2604_s4 + $0x50] sm:$0xff]   ;;  %v1828_v23 = vld [vmem:[%s2604_s4 + $0x58] sm:$0xff]   ;;  %vm2037_vm2 = vmmov 0   ;;  %s2038_s27 = smov [#allocation2]   ;;  %s2039_s29 = smov [#allocation4]  }
   0x9   :  { %v1823_v18 = vld [vmem:[%s2604_s4] sm:$0xff]   ;;  %1664 = vmatprep.subr.bf16.mxu0 %v1822_v17  ;;  %v1827_v22 = vld [vmem:[%s2604_s4 + $0x10] sm:$0xff]   ;;  %v1829_v24 = vld [vmem:[%s2604_s4 + $0x18] sm:$0xff]   ;;  %s1490_s28 = sshll.u32 %s2038_s27, 4  ;;  %s1500_s30 = sshll.u32 %s2039_s29, 4  ;;  %s1491_s28 = int_to_ptr.vmem [resolvable:$true] %s1490_s28  ;;  %s1501_s30 = int_to_ptr.vmem [resolvable:$true] %s1500_s30 }
   0xa   :  { %174 = vmatpush1.bf16.msra.mxu1 %v1803_v10  ;;  %1665 = vmatpush3.bf16.msra.mxu0 %v1823_v18  ;;  %v1830_v25 = vld [vmem:[%s2604_s4 + $0x60] sm:$0xff]   ;;  %v1834_v27 = vld [vmem:[%s2604_s4 + $0x68] sm:$0xff]   ;;  %v1838_v29 = vld [vmem:[%s2604_s4 + $0x70] sm:$0xff]   ;;  %s1986_s12 = scalar_lea.vmem %s1491_s28, 128  ;;  %p1991_p1 = scmp.lt.s32.totalorder %s1491_s28, %s1491_s28 }
   0xb   :  { %175 = vmatprep.subr.bf16.mxu1 %v1804_v11  ;;  %1666 = vmatprep.subr.bf16.mxu0 %v1824_v19  ;;  %v1832_v26 = vld [vmem:[%s2604_s4 + $0x20] sm:$0xff]   ;;  %v1836_v28 = vld [vmem:[%s2604_s4 + $0x28] sm:$0xff]   ;;  %v1840_v30 = vld [vmem:[%s2604_s4 + $0x30] sm:$0xff]   ;;  %p1987_p0 = scmp.ne.s32.totalorder %s1491_s28, %s1986_s12  ;;  %p1992_p2 = scmp.lt.s32.totalorder %s1986_s12, %s1986_s12 }
   0xc   :  { %v1516_v35 = vld [vmem:[%s2601_s1] ss:$0 sm:$0xff]  ;;  %v1810_v40 = vld [vmem:[%s2603_s3 + $0x8] ss:$16 sps:$4 sm:$0xff]   ;;  %v1815_v42 = vld [vmem:[%s2603_s3 + $0x2c] ss:$16 sps:$4 sm:$0xff]  }
   0xd   :  { %v1517_v37 = vld [vmem:[%s2602_s2] ss:$0 sm:$0xff]  ;;  %v1813_v43 = vld [vmem:[%s2603_s3 + $0x28] ss:$16 sps:$4 sm:$0xff]   ;;  %v1818_v44 = vld [vmem:[%s2603_s3 + $0x4c] ss:$16 sps:$4 sm:$0xff]   ;;  %p1993_p3 = por %p1992_p2, %p1991_p1 }
   0xe   :  { %176 = vmatpush1.bf16.msra.mxu1 %v1806_v12  ;;  %1667 = vmatpush3.bf16.msra.mxu0 %v1825_v20  ;;  %v1816_v45 = vld [vmem:[%s2603_s3 + $0x48] ss:$16 sps:$4 sm:$0xff]   ;;  %v1821_v46 = vld [vmem:[%s2603_s3 + $0x6c] ss:$16 sps:$4 sm:$0xff]   ;;  %v1831_v48 = vld [vmem:[%s2604_s4 + $0xc0] sm:$0xff]  }
   0xf   :  { %177 = vmatprep.subr.bf16.mxu1 %v1807_v13  ;;  %1668 = vmatprep.subr.bf16.mxu0 %v1826_v21  ;;  %v1819_v47 = vld [vmem:[%s2603_s3 + $0x68] ss:$16 sps:$4 sm:$0xff]   ;;  %v1833_v49 = vld [vmem:[%s2604_s4 + $0x80] sm:$0xff]   ;;  %v1839_v52 = vld [vmem:[%s2604_s4 + $0xd0] sm:$0xff]   ;;  %p1994_p4 = pnand %p1993_p3, %p1987_p0 }
  0x10   :  { %v1835_v50 = vld [vmem:[%s2604_s4 + $0xc8] sm:$0xff]   ;;  %v1841_v53 = vld [vmem:[%s2604_s4 + $0x90] sm:$0xff]   ;;  %v1842_v54 = vld [vmem:[%s2604_s4 + $0x78] sm:$0xff]  }
  0x11   :  { %v1837_v51 = vld [vmem:[%s2604_s4 + $0x88] sm:$0xff]   ;;  %v1843_v55 = vld [vmem:[%s2604_s4 + $0xd8] sm:$0xff]   ;;  %v1846_v58 = vld [vmem:[%s2604_s4 + $0xe0] sm:$0xff]  }
  0x12   :  { %178 = vmatpush1.bf16.msra.mxu1 %v1809_v14  ;;  %1669 = vmatpush3.bf16.msra.mxu0 %v1827_v22  ;;  %v1844_v56 = vld [vmem:[%s2604_s4 + $0x38] sm:$0xff]   ;;  %v1849_v59 = vld [vmem:[%s2605_s5 + $0x4] ss:$8 sps:$4 sm:$0xff]   ;;  %v1856_v63 = vld [vmem:[%s2604_s4 + $0xf0] sm:$0xff]   ;;  %v2035_v14 = vmov 1983009808  }
  0x13   :  { %212 = vmatprep.subr.bf16.mxu1 %v1812_v16  ;;  %1670 = vmatprep.subr.bf16.mxu0 %v1828_v23  ;;  %v1845_v57 = vld [vmem:[%s2604_s4 + $0x98] sm:$0xff]   ;;  %v1850_v60 = vld [vmem:[%s2604_s4 + $0xa0] sm:$0xff]   ;;  %v1851_v61 = vld [vmem:[%s2604_s4 + $0xe8] sm:$0xff]   ;;  %v262_v16 = vlaneseq }
  0x14   :  { %v1855_v62 = vld [vmem:[%s2604_s4 + $0xa8] sm:$0xff]   ;;  %v1861_v1 = vld [vmem:[%s2604_s4 + $0xf8] sm:$0xff]  }
  0x15   :  { %v1847_v8 = vld [vmem:[%s2605_s5] ss:$8 sps:$4 sm:$0xff]   ;;  %v1854_v11 = vld [vmem:[%s2605_s5 + $0x14] ss:$8 sps:$4 sm:$0xff]   ;;  %v1852_v12 = vld [vmem:[%s2605_s5 + $0x10] ss:$8 sps:$4 sm:$0xff]  }
  0x16   :  { %1671 = vmatpush3.bf16.msra.mxu0 %v1829_v24  ;;  %v1859_v13 = vld [vmem:[%s2605_s5 + $0x24] ss:$8 sps:$4 sm:$0xff]   ;;  %v1857_v17 = vld [vmem:[%s2605_s5 + $0x20] ss:$8 sps:$4 sm:$0xff]   ;;  %v1864_v18 = vld [vmem:[%s2605_s5 + $0x34] ss:$8 sps:$4 sm:$0xff]  }
  0x17   :  { %1672 = vmatprep.subr.bf16.mxu0 %v1830_v25  ;;  %v263_v20 = vshrl.u32 %v262_v16, 7  ;;  %v1862_v21 = vld [vmem:[%s2605_s5 + $0x30] ss:$8 sps:$4 sm:$0xff]   ;;  %v1868_v22 = vld [vmem:[%s2605_s5 + $0x44] ss:$8 sps:$4 sm:$0xff]  }
  0x18   :  { %v1950_v16 = vld [vmem:[%s2606_s6 + $0x40] sm:$0xff]  }
  0x1a   :  { %1673 = vmatpush3.bf16.msra.mxu0 %v1832_v26 }
  0x1b   :  { %1674 = vmatprep.subr.bf16.mxu0 %v1834_v27 }
  0x1e   :  { %1675 = vmatpush3.bf16.msra.mxu0 %v1836_v28 }
  0x1f   :  { %1676 = vmatprep.subr.bf16.mxu0 %v1838_v29  ;;  %v1866_v29 = vld [vmem:[%s2605_s5 + $0x40] ss:$8 sps:$4 sm:$0xff]  }
  0x22   :  { %1677 = vmatpush3.bf16.msra.mxu0 %v1840_v30 }
  0x23   :  { %1678 = vmatprep.subr.bf16.mxu0 %v1842_v54  ;;  %v1896_v54 = vld [vmem:[%s2605_s5 + $0xe0] ss:$8 sps:$4 sm:$0xff]  }
  0x26   :  { %1679 = vmatpush3.bf16.msra.mxu0 %v1844_v56  ;;  %v1899_v56 = vld [vmem:[%s2605_s5 + $0xf0] ss:$8 sps:$4 sm:$0xff]  }
  0x27   :  { %1001 = vmatprep.subr.bf16.mxu0 %v1849_v59  ;;  %v1907_v59 = vld [vmem:[%s2605_s5 + $0x114] ss:$8 sps:$4 sm:$0xff]  }
  0x90   :  { %v44_v2 = vpop.xlane.xlu0 %43 }
  0x91   :  { %v46_v3 = vmul.f32 0.015625, %v44_v2  ;;  %v1865_v2 = vld [vmem:[%s2604_s4 + $0xb8] sm:$0xff]  }
  0x93   :  { %v47_v4 = vsub.f32 %v38_v0, %v46_v3  ;;  %v1860_v0 = vld [vmem:[%s2604_s4 + $0xb0] sm:$0xff]  }
  0x95   :  { %v48_v5 = vmul.f32 %v47_v4, %v47_v4 }
  0x97   :  { %v49_v6 = vsel %vm41_vm0, %v48_v5, 0.0 }
  0x98   :  { %50 = vadd.xlane.f32.xlu0 %v49_v6 }
 0x125   :  { %v51_v31 = vpop.xlane.xlu0 %50 }
 0x126   :  { %v52_v32 = vmul.f32 0.015625, %v51_v31 }
 0x128   :  { %v53_v33 = vadd.f32 1e-05, %v52_v32  ;;  %v1871_v32 = vld [vmem:[%s2605_s5 + $0x54] ss:$8 sps:$4 sm:$0xff]  }
 0x12a   :  { %1982 = vrsqrt.f32 %v53_v33 }
 0x134   :  { %v1983_v34 = vpop.eup %1982 }
 0x135   :  { %v55_v36 = vmul.f32 %v1983_v34, %v47_v4 }
 0x137   :  { %v62_v38 = vmul.f32 %v1516_v35, %v55_v36  ;;  %v1869_v35 = vld [vmem:[%s2605_s5 + $0x50] ss:$8 sps:$4 sm:$0xff]  }
 0x139   :  { %v69_v39 = vadd.f32 %v1517_v37, %v62_v38  ;;  %v1874_v37 = vld [vmem:[%s2605_s5 + $0x64] ss:$8 sps:$4 sm:$0xff]   ;;  %v1872_v38 = vld [vmem:[%s2605_s5 + $0x60] ss:$8 sps:$4 sm:$0xff]  }
 0x13b   :  { %v70_v41 = vpack.c.bf16 %v69_v39, %v69_v39  ;;  %v1877_v39 = vld [vmem:[%s2605_s5 + $0x74] ss:$8 sps:$4 sm:$0xff]  }
 0x13d   :  { %1534 = vmatmul.mubr.msk.bf16.vlgmr.msra.gmra.mrb[0].mxu1 %vm167_vm1, %v70_v41 }
 0x13e   :  { %213 = vmatpush1.bf16.msra.mxu1 %v1810_v40  ;;  %244 = vmatprep.mubr.bf16.mxu1 %v2034_v15  ;;  %v260_v15 = vunpack.c.l.s4 %v2035_v14  ;;  %v1875_v40 = vld [vmem:[%s2605_s5 + $0x70] ss:$8 sps:$4 sm:$0xff]   ;;  %v1932_v14 = vld [vmem:[%s2605_s5 + $0x1a0] ss:$8 sps:$4 sm:$0xff]  }
 0x13f   :  { %214 = vmatprep.subr.bf16.mxu1 %v1815_v42  ;;  %v1878_v42 = vld [vmem:[%s2605_s5 + $0x80] ss:$8 sps:$4 sm:$0xff]  }
 0x140   :  { %v261_v19 = vunpack.c.0.s8 %v260_v15  ;;  %v1937_v15 = vld [vmem:[%s2605_s5 + $0x1b4] ss:$8 sps:$4 sm:$0xff]  }
 0x142   :  { %215 = vmatpush1.bf16.msra.mxu1 %v1813_v43  ;;  %v264_v24 = vsub.s32 %v261_v19, %v263_v20  ;;  %v1883_v43 = vld [vmem:[%s2605_s5 + $0x94] ss:$8 sps:$4 sm:$0xff]   ;;  %v1935_v19 = vld [vmem:[%s2605_s5 + $0x1b0] ss:$8 sps:$4 sm:$0xff]   ;;  %v1953_v20 = vld [vmem:[%s2606_s6 + $0x8] sm:$0xff]  }
 0x143   :  { %216 = vmatprep.subr.bf16.mxu1 %v1818_v44  ;;  %v1881_v44 = vld [vmem:[%s2605_s5 + $0x90] ss:$8 sps:$4 sm:$0xff]  }
 0x146   :  { %217 = vmatpush1.bf16.msra.mxu1 %v1816_v45  ;;  %v1886_v45 = vld [vmem:[%s2605_s5 + $0xa4] ss:$8 sps:$4 sm:$0xff]  }
 0x147   :  { %218 = vmatprep.subr.bf16.mxu1 %v1821_v46  ;;  %v1884_v46 = vld [vmem:[%s2605_s5 + $0xa0] ss:$8 sps:$4 sm:$0xff]  }
 0x14a   :  { %219 = vmatpush1.bf16.msra.mxu1 %v1819_v47  ;;  %v1889_v47 = vld [vmem:[%s2605_s5 + $0xb4] ss:$8 sps:$4 sm:$0xff]  }
 0x14b   :  { %1686 = vmatprep.subr.bf16.mxu1 %v1831_v48  ;;  %v1887_v48 = vld [vmem:[%s2605_s5 + $0xb0] ss:$8 sps:$4 sm:$0xff]  }
 0x14d   :  { %1535 = vmatmul.mubr.msk.bf16.vlgmr.msra.gmra.mrb[4].mxu1 %vm167_vm1, %v70_v41  ;;  %v1880_v41 = vld [vmem:[%s2605_s5 + $0x84] ss:$8 sps:$4 sm:$0xff]  }
 0x14e   :  { %1687 = vmatpush3.bf16.msra.mxu1 %v1833_v49  ;;  %v1892_v49 = vld [vmem:[%s2605_s5 + $0xc4] ss:$8 sps:$4 sm:$0xff]  }
 0x14f   :  { %1688 = vmatprep.subr.bf16.mxu1 %v1835_v50  ;;  %v1890_v50 = vld [vmem:[%s2605_s5 + $0xc0] ss:$8 sps:$4 sm:$0xff]  }
 0x152   :  { %1689 = vmatpush3.bf16.msra.mxu1 %v1837_v51  ;;  %v1895_v51 = vld [vmem:[%s2605_s5 + $0xd4] ss:$8 sps:$4 sm:$0xff]  }
 0x153   :  { %1690 = vmatprep.subr.bf16.mxu1 %v1839_v52  ;;  %v1893_v52 = vld [vmem:[%s2605_s5 + $0xd0] ss:$8 sps:$4 sm:$0xff]  }
 0x156   :  { %1691 = vmatpush3.bf16.msra.mxu1 %v1841_v53  ;;  %v1898_v53 = vld [vmem:[%s2605_s5 + $0xe4] ss:$8 sps:$4 sm:$0xff]  }
 0x157   :  { %1692 = vmatprep.subr.bf16.mxu1 %v1843_v55  ;;  %v1901_v55 = vld [vmem:[%s2605_s5 + $0xf4] ss:$8 sps:$4 sm:$0xff]  }
 0x15a   :  { %1693 = vmatpush3.bf16.msra.mxu1 %v1845_v57  ;;  %v1904_v57 = vld [vmem:[%s2605_s5 + $0x104] ss:$8 sps:$4 sm:$0xff]  }
 0x15b   :  { %1694 = vmatprep.subr.bf16.mxu1 %v1846_v58  ;;  %v1902_v58 = vld [vmem:[%s2605_s5 + $0x100] ss:$8 sps:$4 sm:$0xff]  }
 0x15e   :  { %1695 = vmatpush3.bf16.msra.mxu1 %v1850_v60  ;;  %v1905_v60 = vld [vmem:[%s2605_s5 + $0x110] ss:$8 sps:$4 sm:$0xff]  }
 0x15f   :  { %1696 = vmatprep.subr.bf16.mxu1 %v1851_v61  ;;  %v1910_v61 = vld [vmem:[%s2605_s5 + $0x124] ss:$8 sps:$4 sm:$0xff]  }
 0x162   :  { %1697 = vmatpush3.bf16.msra.mxu1 %v1855_v62  ;;  %v1908_v62 = vld [vmem:[%s2605_s5 + $0x120] ss:$8 sps:$4 sm:$0xff]  }
 0x163   :  { %1698 = vmatprep.subr.bf16.mxu1 %v1856_v63  ;;  %v1913_v63 = vld [vmem:[%s2605_s5 + $0x134] ss:$8 sps:$4 sm:$0xff]  }
 0x166   :  { %1699 = vmatpush3.bf16.msra.mxu1 %v1860_v0  ;;  %v1911_v0 = vld [vmem:[%s2605_s5 + $0x130] ss:$8 sps:$4 sm:$0xff]  }
 0x167   :  { %1700 = vmatprep.subr.bf16.mxu1 %v1861_v1  ;;  %v1916_v1 = vld [vmem:[%s2605_s5 + $0x144] ss:$8 sps:$4 sm:$0xff]  }
 0x16a   :  { %1701 = vmatpush3.bf16.msra.mxu1 %v1865_v2  ;;  %v1914_v2 = vld [vmem:[%s2605_s5 + $0x140] ss:$8 sps:$4 sm:$0xff]  }
 0x16b   :  { %1708 = vmatprep.subr.bf16.mxu1 %v1950_v16  ;;  %v1978_v16 = vld [vmem:[%s2608_s8 + $0x20] sm:$0xff]  }
 0x210   :  { %v205_v3 = vpop.f32.mrb[0].mxu1 }
 0x211   :  { %v207_v4 = vpop.f32.mrb[1].mxu1  ;;  %v2261_v9 = vpack.c.bf16 %v205_v3, %v205_v3 }
 0x212   :  { %v257_v5 = vcombine.low %v205_v3, %v207_v4  ;;  %v209_v6 = vpop.f32.mrb[2].mxu1  ;;  %v277_v7 = vpack.c.bf16 %v207_v4, %v207_v4  ;;  %v1919_v3 = vld [vmem:[%s2605_s5 + $0x154] ss:$8 sps:$4 sm:$0xff]   ;;  %v1917_v4 = vld [vmem:[%s2605_s5 + $0x150] ss:$8 sps:$4 sm:$0xff]  }
 0x213   :  { %v210_v10 = vpop.f32.mrb[3].mxu1  ;;  %v1920_v6 = vld [vmem:[%s2605_s5 + $0x160] ss:$8 sps:$4 sm:$0xff]  }
 0x214   :  { %568 = vmatprep.mubr.bf16.mxu0 %v277_v7  ;;  %v265_v33 = vrot.slane %v257_v5, %v264_v24  ;;  %v1922_v5 = vld [vmem:[%s2605_s5 + $0x164] ss:$8 sps:$4 sm:$0xff]   ;;  %v1926_v10 = vld [vmem:[%s2605_s5 + $0x180] ss:$8 sps:$4 sm:$0xff]  }
 0x215   :  { %569 = vmatmul.mubr.bf16.vlgmr.msra.gmra.mrb[0].mxu0 %v2261_v9 }
 0x216   :  { %1002 = vmatpush1.bf16.msra.mxu0 %v1847_v8  ;;  %1033 = vmatprep.mubr.bf16.mxu0 %v277_v7  ;;  %v1925_v7 = vld [vmem:[%s2605_s5 + $0x174] ss:$8 sps:$4 sm:$0xff]   ;;  %v1923_v8 = vld [vmem:[%s2605_s5 + $0x170] ss:$8 sps:$4 sm:$0xff]  }
 0x217   :  { %1003 = vmatprep.subr.bf16.mxu0 %v1854_v11  ;;  %v1931_v11 = vld [vmem:[%s2605_s5 + $0x194] ss:$8 sps:$4 sm:$0xff]  }
 0x21a   :  { %1004 = vmatpush1.bf16.msra.mxu0 %v1852_v12  ;;  %v1929_v12 = vld [vmem:[%s2605_s5 + $0x190] ss:$8 sps:$4 sm:$0xff]  }
 0x21b   :  { %1005 = vmatprep.subr.bf16.mxu0 %v1859_v13  ;;  %v1934_v13 = vld [vmem:[%s2605_s5 + $0x1a4] ss:$8 sps:$4 sm:$0xff]  }
 0x21e   :  { %1006 = vmatpush1.bf16.msra.mxu0 %v1857_v17  ;;  %v1951_v17 = vld [vmem:[%s2606_s6] sm:$0xff]  }
 0x21f   :  { %1007 = vmatprep.subr.bf16.mxu0 %v1864_v18  ;;  %v1952_v18 = vld [vmem:[%s2606_s6 + $0x48] sm:$0xff]  }
 0x220   :  { %v246_v23 = vpop.f32.mrb[4].mxu1 }
 0x221   :  { %v248_v25 = vpop.f32.mrb[5].mxu1  ;;  %v2290_v30 = vpack.c.bf16 %v246_v23, %v246_v23 }
 0x222   :  { %v258_v26 = vcombine.low %v246_v23, %v248_v25  ;;  %v2285_v27 = vpack.c.bf16 %v248_v25, %v248_v25  ;;  %v250_v28 = vpop.f32.mrb[6].mxu1  ;;  %1008 = vmatpush1.bf16.msra.mxu0 %v1862_v21  ;;  %v1940_v21 = vld [vmem:[%s2605_s5 + $0x1c4] ss:$8 sps:$4 sm:$0xff]   ;;  %v1938_v23 = vld [vmem:[%s2605_s5 + $0x1c0] ss:$8 sps:$4 sm:$0xff]  }
 0x223   :  { %v251_v31 = vpop.f32.mrb[7].mxu1  ;;  %1009 = vmatprep.subr.bf16.mxu0 %v1868_v22  ;;  %v1954_v22 = vld [vmem:[%s2606_s6 + $0x50] sm:$0xff]   ;;  %v1957_v28 = vld [vmem:[%s2606_s6 + $0x18] sm:$0xff]  }
 0x224   :  { %608 = vmatprep.mubr.bf16.mxu1 %v2285_v27  ;;  %v272_v34 = vrot.slane %v258_v26, %v264_v24  ;;  %v1955_v24 = vld [vmem:[%s2606_s6 + $0x10] sm:$0xff]   ;;  %v1956_v26 = vld [vmem:[%s2606_s6 + $0x58] sm:$0xff]   ;;  %v1958_v31 = vld [vmem:[%s2606_s6 + $0x60] sm:$0xff]  }
 0x225   :  { %609 = vmatmul.mubr.bf16.vlgmr.msra.gmra.mrb[8].mxu1 %v2290_v30  ;;  %v1943_v25 = vld [vmem:[%s2605_s5 + $0x1d4] ss:$8 sps:$4 sm:$0xff]  }
 0x226   :  { %1010 = vmatpush1.bf16.msra.mxu0 %v1866_v29  ;;  %v273_v36 = vcombine.low %v265_v33, %v272_v34  ;;  %1709 = vmatpush3.bf16.msra.mxu1 %v1951_v17  ;;  %v1946_v29 = vld [vmem:[%s2605_s5 + $0x1e4] ss:$8 sps:$4 sm:$0xff]   ;;  %v1949_v34 = vld [vmem:[%s2605_s5 + $0x1f4] ss:$8 sps:$4 sm:$0xff]  }
 0x227   :  { %1011 = vmatprep.subr.bf16.mxu0 %v1871_v32  ;;  %1710 = vmatprep.subr.bf16.mxu1 %v1952_v18  ;;  %v1944_v32 = vld [vmem:[%s2605_s5 + $0x1e0] ss:$8 sps:$4 sm:$0xff]   ;;  %v1980_v18 = vld [vmem:[%s2608_s8 + $0x30] sm:$0xff]  }
 0x228   :  { %275 = vst [vmem:[#allocation2] sm:$0xff] %v273_v36  ;;  %v1959_v33 = vld [vmem:[%s2606_s6 + $0x20] sm:$0xff]   ;;  %v1947_v36 = vld [vmem:[%s2605_s5 + $0x1f0] ss:$8 sps:$4 sm:$0xff]   ;;  %v1979_v17 = vld [vmem:[%s2608_s8 + $0x28] sm:$0xff]  }
 0x22a   :  { %1012 = vmatpush1.bf16.msra.mxu0 %v1869_v35  ;;  %1711 = vmatpush3.bf16.msra.mxu1 %v1953_v20  ;;  %v1960_v35 = vld [vmem:[%s2606_s6 + $0x68] sm:$0xff]  }
 0x22b   :  { %1013 = vmatprep.subr.bf16.mxu0 %v1874_v37  ;;  %1712 = vmatprep.subr.bf16.mxu1 %v1954_v22  ;;  %v1961_v37 = vld [vmem:[%s2606_s6 + $0x28] sm:$0xff]  }
 0x22e   :  { %1014 = vmatpush1.bf16.msra.mxu0 %v1872_v38  ;;  %1713 = vmatpush3.bf16.msra.mxu1 %v1955_v24  ;;  %v1962_v38 = vld [vmem:[%s2606_s6 + $0x70] sm:$0xff]  }
 0x22f   :  { %1015 = vmatprep.subr.bf16.mxu0 %v1877_v39  ;;  %1714 = vmatprep.subr.bf16.mxu1 %v1956_v26  ;;  %v1963_v39 = vld [vmem:[%s2606_s6 + $0x30] sm:$0xff]  }
 0x232   :  { %1016 = vmatpush1.bf16.msra.mxu0 %v1875_v40  ;;  %1715 = vmatpush3.bf16.msra.mxu1 %v1957_v28 }
 0x233   :  { %1017 = vmatprep.subr.bf16.mxu0 %v1880_v41  ;;  %1716 = vmatprep.subr.bf16.mxu1 %v1958_v31 }
 0x236   :  { %1018 = vmatpush1.bf16.msra.mxu0 %v1878_v42  ;;  %1717 = vmatpush3.bf16.msra.mxu1 %v1959_v33  ;;  %v1964_v42 = vld [vmem:[%s2606_s6 + $0x78] sm:$0xff]  }
 0x237   :  { %1019 = vmatprep.subr.bf16.mxu0 %v1883_v43  ;;  %1718 = vmatprep.subr.bf16.mxu1 %v1960_v35 }
 0x23a   :  { %1020 = vmatpush1.bf16.msra.mxu0 %v1881_v44  ;;  %1719 = vmatpush3.bf16.msra.mxu1 %v1961_v37 }
 0x23b   :  { %1021 = vmatprep.subr.bf16.mxu0 %v1886_v45  ;;  %1720 = vmatprep.subr.bf16.mxu1 %v1962_v38  ;;  %v1965_v45 = vld [vmem:[%s2606_s6 + $0x38] sm:$0xff]  }
 0x23e   :  { %1022 = vmatpush1.bf16.msra.mxu0 %v1884_v46  ;;  %1721 = vmatpush3.bf16.msra.mxu1 %v1963_v39 }
 0x23f   :  { %1023 = vmatprep.subr.bf16.mxu0 %v1889_v47  ;;  %1722 = vmatprep.subr.bf16.mxu1 %v1964_v42 }
 0x242   :  { %1024 = vmatpush1.bf16.msra.mxu0 %v1887_v48  ;;  %1723 = vmatpush3.bf16.msra.mxu1 %v1965_v45 }
 0x243   :  { %1025 = vmatprep.subr.bf16.mxu0 %v1892_v49 }
 0x246   :  { %1026 = vmatpush1.bf16.msra.mxu0 %v1890_v50 }
 0x247   :  { %1027 = vmatprep.subr.bf16.mxu0 %v1895_v51 }
 0x24a   :  { %1028 = vmatpush1.bf16.msra.mxu0 %v1893_v52 }
 0x24b   :  { %1029 = vmatprep.subr.bf16.mxu0 %v1898_v53 }
 0x24e   :  { %1030 = vmatpush1.bf16.msra.mxu0 %v1896_v54 }
 0x24f   :  { %1031 = vmatprep.subr.bf16.mxu0 %v1901_v55 }
 0x252   :  { %1032 = vmatpush1.bf16.msra.mxu0 %v1899_v56 }
 0x253   :  { %1042 = vmatprep.subr.bf16.mxu0 %v1904_v57 }
 0x255   :  { %1034 = vmatmul.mubr.bf16.vlgmr.msra.gmra.mrb[4].mxu0 %v2261_v9  ;;  %v1928_v9 = vld [vmem:[%s2605_s5 + $0x184] ss:$8 sps:$4 sm:$0xff]  }
 0x256   :  { %1043 = vmatpush1.bf16.msra.mxu0 %v1902_v58  ;;  %1074 = vmatprep.mubr.bf16.mxu0 %v2285_v27  ;;  %v1941_v27 = vld [vmem:[%s2605_s5 + $0x1d0] ss:$8 sps:$4 sm:$0xff]  }
 0x257   :  { %1044 = vmatprep.subr.bf16.mxu0 %v1907_v59 }
 0x25a   :  { %1045 = vmatpush1.bf16.msra.mxu0 %v1905_v60  ;;  %v1966_v60 = vld [vmem:[%s2607_s7] sm:$0xff]  }
 0x25b   :  { %1046 = vmatprep.subr.bf16.mxu0 %v1910_v61 }
 0x25e   :  { %1047 = vmatpush1.bf16.msra.mxu0 %v1908_v62  ;;  %v1967_v62 = vld [vmem:[%s2607_s7 + $0x8] sm:$0xff]  }
 0x25f   :  { %1048 = vmatprep.subr.bf16.mxu0 %v1913_v63  ;;  %v1968_v63 = vld [vmem:[%s2607_s7 + $0x10] sm:$0xff]  }
 0x262   :  { %1049 = vmatpush1.bf16.msra.mxu0 %v1911_v0  ;;  %v1969_v0 = vld [vmem:[%s2607_s7 + $0x18] sm:$0xff]  }
 0x263   :  { %1050 = vmatprep.subr.bf16.mxu0 %v1916_v1  ;;  %v1970_v1 = vld [vmem:[%s2607_s7 + $0x20] sm:$0xff]  }
 0x266   :  { %1051 = vmatpush1.bf16.msra.mxu0 %v1914_v2  ;;  %v1971_v2 = vld [vmem:[%s2607_s7 + $0x28] sm:$0xff]  }
 0x267   :  { %1052 = vmatprep.subr.bf16.mxu0 %v1919_v3  ;;  %v1972_v3 = vld [vmem:[%s2607_s7 + $0x30] sm:$0xff]  }
 0x26a   :  { %1053 = vmatpush1.bf16.msra.mxu0 %v1917_v4  ;;  %v1973_v4 = vld [vmem:[%s2607_s7 + $0x38] sm:$0xff]  }
 0x26b   :  { %1054 = vmatprep.subr.bf16.mxu0 %v1922_v5 }
 0x26e   :  { %1055 = vmatpush1.bf16.msra.mxu0 %v1920_v6 }
 0x26f   :  { %1056 = vmatprep.subr.bf16.mxu0 %v1925_v7 }
 0x272   :  { %1057 = vmatpush1.bf16.msra.mxu0 %v1923_v8 }
 0x273   :  { %1058 = vmatprep.subr.bf16.mxu0 %v1928_v9 }
 0x276   :  { %1059 = vmatpush1.bf16.msra.mxu0 %v1926_v10 }
 0x277   :  { %1060 = vmatprep.subr.bf16.mxu0 %v1931_v11  ;;  %v1974_v11 = vld [vmem:[%s2608_s8] sm:$0xff]  }
 0x27a   :  { %1061 = vmatpush1.bf16.msra.mxu0 %v1929_v12 }
 0x27b   :  { %1062 = vmatprep.subr.bf16.mxu0 %v1934_v13  ;;  %v1975_v13 = vld [vmem:[%s2608_s8 + $0x8] sm:$0xff]  }
 0x27e   :  { %1063 = vmatpush1.bf16.msra.mxu0 %v1932_v14  ;;  %v1976_v14 = vld [vmem:[%s2608_s8 + $0x10] sm:$0xff]  }
 0x27f   :  { %1064 = vmatprep.subr.bf16.mxu0 %v1937_v15  ;;  %v1977_v15 = vld [vmem:[%s2608_s8 + $0x18] sm:$0xff]  }
 0x282   :  { %1065 = vmatpush1.bf16.msra.mxu0 %v1935_v19  ;;  %v1981_v19 = vld [vmem:[%s2608_s8 + $0x38] sm:$0xff]  }
 0x283   :  { %1066 = vmatprep.subr.bf16.mxu0 %v1940_v21 }
 0x286   :  { %1067 = vmatpush1.bf16.msra.mxu0 %v1938_v23 }
 0x287   :  { %1068 = vmatprep.subr.bf16.mxu0 %v1943_v25 }
 0x28a   :  { %1069 = vmatpush1.bf16.msra.mxu0 %v1941_v27 }
 0x28b   :  { %1070 = vmatprep.subr.bf16.mxu0 %v1946_v29 }
 0x28e   :  { %1071 = vmatpush1.bf16.msra.mxu0 %v1944_v32 }
 0x28f   :  { %1072 = vmatprep.subr.bf16.mxu0 %v1949_v34 }
 0x292   :  { %1073 = vmatpush1.bf16.msra.mxu0 %v1947_v36 }
 0x295   :  { %1075 = vmatmul.mubr.bf16.vlgmr.msra.gmra.mrb[4].mxu0 %v2290_v30  ;;  %v2036_v30 = vmov 0.0  }
 0x296   :  { %1748 = vmatprep.subr.bf16.mxu1 %v2036_v30 }
 0x2e8   :  { %v1680_v40 = vpop.f32.mrb[0].mxu0 }
 0x2e9   :  { %v1681_v41 = vpop.f32.mrb[1].mxu0 }
 0x2ea   :  { %v1682_v43 = vadd.f32 %v1681_v41, %v1680_v40  ;;  %v1683_v44 = vpop.f32.mrb[2].mxu0 }
 0x2eb   :  { %v1684_v46 = vpop.f32.mrb[3].mxu0 }
 0x2f8   :  { %v1702_v47 = vpop.f32.mrb[8].mxu1 }
 0x2f9   :  { %v1703_v48 = vpop.f32.mrb[9].mxu1 }
 0x2fa   :  { %v1704_v49 = vadd.f32 %v1703_v48, %v1702_v47  ;;  %v1705_v50 = vpop.f32.mrb[10].mxu1 }
 0x2fb   :  { %v1706_v51 = vpop.f32.mrb[11].mxu1 }
 0x2fc   :  { %v611_v52 = vadd.f32 %v1704_v49, %v1682_v43 }
 0x2fe   :  { %616 = vst [vmem:[#allocation4] sm:$0x3] %v611_v52 }
 0x368   :  { %v1076_v53 = vpop.f32.mrb[4].mxu0 }
 0x369   :  { %v1083_v54 = vmax.f32 %v1076_v53, 0.0  ;;  %v1078_v55 = vpop.f32.mrb[5].mxu0 }
 0x36a   :  { %v1084_v56 = vmax.f32 %v1078_v55, 0.0  ;;  %v1080_v57 = vpop.f32.mrb[6].mxu0 }
 0x36b   :  { %v1081_v58 = vpop.f32.mrb[7].mxu0  ;;  %v1085_v61 = vpack.c.bf16 %v1083_v54, %v1083_v54 }
 0x36c   :  { %v1086_v59 = vpack.c.bf16 %v1084_v56, %v1084_v56 }
 0x36e   :  { %1247 = vmatprep.mubr.bf16.mxu1 %v1086_v59 }
 0x36f   :  { %1248 = vmatmul.mubr.bf16.vlgmr.msra.gmra.mrb[12].mxu1 %v1085_v61 }
 0x370   :  { %1749 = vmatpush3.bf16.msra.mxu1 %v1966_v60  ;;  %1764 = vmatprep.mubr.msk.bf16.mxu1 %vm2037_vm2, %v2036_v30 }
 0x371   :  { %1750 = vmatprep.subr.bf16.mxu1 %v2036_v30 }
 0x374   :  { %1751 = vmatpush3.bf16.msra.mxu1 %v1967_v62 }
 0x375   :  { %1752 = vmatprep.subr.bf16.mxu1 %v2036_v30 }
 0x378   :  { %1753 = vmatpush3.bf16.msra.mxu1 %v1968_v63 }
 0x379   :  { %1754 = vmatprep.subr.bf16.mxu1 %v2036_v30 }
 0x37c   :  { %1755 = vmatpush3.bf16.msra.mxu1 %v1969_v0 }
 0x37d   :  { %1756 = vmatprep.subr.bf16.mxu1 %v2036_v30 }
 0x380   :  { %1757 = vmatpush3.bf16.msra.mxu1 %v1970_v1 }
 0x381   :  { %1758 = vmatprep.subr.bf16.mxu1 %v2036_v30 }
 0x384   :  { %1759 = vmatpush3.bf16.msra.mxu1 %v1971_v2 }
 0x385   :  { %1760 = vmatprep.subr.bf16.mxu1 %v2036_v30 }
 0x388   :  { %1761 = vmatpush3.bf16.msra.mxu1 %v1972_v3 }
 0x389   :  { %1762 = vmatprep.subr.bf16.mxu1 %v2036_v30 }
 0x38c   :  { %1763 = vmatpush3.bf16.msra.mxu1 %v1973_v4 }
 0x38d   :  { %1768 = vmatprep.subr.bf16.mxu1 %v2036_v30 }
 0x442   :  { %v1724_v5 = vpop.f32.mrb[12].mxu1 }
 0x443   :  { %v1725_v6 = vpop.f32.mrb[13].mxu1 }
 0x444   :  { %v1726_v7 = vadd.f32 %v1725_v6, %v1724_v5  ;;  %v1727_v8 = vpop.f32.mrb[14].mxu1 }
 0x445   :  { %v1728_v9 = vpop.f32.mrb[15].mxu1 }
 0x446   :  { %v1255_v10 = vmax.f32 %v1726_v7, 0.0 }
 0x448   :  { %v1256_v12 = vpack.c.bf16 %v1255_v10, %v1255_v10 }
 0x44a   :  { %1765 = vmatmul.mubr.bf16.vlgmr.msra.gmra.mrb[16].mxu1 %v1256_v12 }
 0x44b   :  { %1769 = vmatpush3.bf16.msra.mxu1 %v1974_v11  ;;  %1784 = vmatprep.mubr.msk.bf16.mxu1 %vm2037_vm2, %v2036_v30 }
 0x44c   :  { %1770 = vmatprep.subr.bf16.mxu1 %v2036_v30 }
 0x44f   :  { %1771 = vmatpush3.bf16.msra.mxu1 %v1975_v13 }
 0x450   :  { %1772 = vmatprep.subr.bf16.mxu1 %v2036_v30 }
 0x453   :  { %1773 = vmatpush3.bf16.msra.mxu1 %v1976_v14 }
 0x454   :  { %1774 = vmatprep.subr.bf16.mxu1 %v2036_v30 }
 0x457   :  { %1775 = vmatpush3.bf16.msra.mxu1 %v1977_v15 }
 0x458   :  { %1776 = vmatprep.subr.bf16.mxu1 %v2036_v30 }
 0x45b   :  { %1777 = vmatpush3.bf16.msra.mxu1 %v1978_v16 }
 0x45c   :  { %1778 = vmatprep.subr.bf16.mxu1 %v2036_v30 }
 0x45f   :  { %1779 = vmatpush3.bf16.msra.mxu1 %v1979_v17 }
 0x460   :  { %1780 = vmatprep.subr.bf16.mxu1 %v2036_v30 }
 0x463   :  { %1781 = vmatpush3.bf16.msra.mxu1 %v1980_v18 }
 0x464   :  { %1782 = vmatprep.subr.bf16.mxu1 %v2036_v30 }
 0x467   :  { %1783 = vmatpush3.bf16.msra.mxu1 %v1981_v19 }
 0x51d   :  { %v1355_v20 = vpop.f32.mrb[16].mxu1 }
 0x51e   :  { %v1361_v21 = vmax.f32 %v1355_v20, 0.0  ;;  %v1766_v22 = vpop.f32.mrb[17].mxu1 }
 0x51f   :  { %v1358_v23 = vpop.f32.mrb[18].mxu1 }
 0x520   :  { %v1362_v24 = vpack.c.bf16 %v1361_v21, %v1361_v21  ;;  %v1767_v25 = vpop.f32.mrb[19].mxu1 }
 0x522   :  { %1785 = vmatmul.mubr.bf16.vlgmr.msra.gmra.mrb[20].mxu1 %v1362_v24 }
 0x523   :  { %1997 = shalt.err (!%p1994_p4)
}
 0x524   :  { %s1998_s13 = scalar_lea.hbm %s2609_s9, 128 }
 0x525   :  { %p1999_p5 = scmp.ne.s32.totalorder %s2609_s9, %s1998_s13  ;;  %p2002_p6 = scmp.lt.u32.totalorder %s1998_s13, %s2609_s9 }
 0x527   :  { %p2004_p7 = pnand %p2002_p6, %p1999_p5 }
 0x529   :  { %2007 = shalt.err (!%p2004_p7)
}
 0x52a   :  { %1493 = dma.vmem_to_hbm [thread:$0]  %s1491_s28, 128, %s2609_s9, [#allocation3]  }
 0x52b   :  { %s2008_s7 = scalar_lea.vmem %s1501_s30, 32  ;;  %p2013_p9 = scmp.lt.s32.totalorder %s1501_s30, %s1501_s30 }
 0x52c   :  { %p2009_p8 = scmp.ne.s32.totalorder %s1501_s30, %s2008_s7  ;;  %p2014_p10 = scmp.lt.s32.totalorder %s2008_s7, %s2008_s7 }
 0x52e   :  { %p2015_p11 = por %p2014_p10, %p2013_p9 }
 0x530   :  { %p2016_p12 = pnand %p2015_p11, %p2009_p8 }
 0x532   :  { %2019 = shalt.err (!%p2016_p12)
}
 0x533   :  { %s2020_s20 = scalar_lea.hbm %s2610_s10, 32 }
 0x534   :  { %p2021_p13 = scmp.ne.s32.totalorder %s2610_s10, %s2020_s20  ;;  %p2024_p0 = scmp.lt.u32.totalorder %s2020_s20, %s2610_s10 }
 0x536   :  { %p2026_p1 = pnand %p2024_p0, %p2021_p13 }
 0x538   :  { %2029 = shalt.err (!%p2026_p1)
}
 0x539   :  { %1503 = dma.vmem_to_hbm [thread:$0]  %s1501_s30, 32, %s2610_s10, [#allocation5]   ;;  %vm1468_vm3 = vcmask 1041408  }
 0x5f5   :  { %v1461_v26 = vpop.f32.mrb[20].mxu1 }
 0x5f6   :  { %v1467_v27 = vmul.f32 %v1461_v26, %v1461_v26  ;;  %v1786_v28 = vpop.f32.mrb[21].mxu1 }
 0x5f7   :  { %v1464_v29 = vpop.f32.mrb[22].mxu1 }
 0x5f8   :  { %v1469_v31 = vsel %vm1468_vm3, %v1467_v27, 0.0  ;;  %v1787_v32 = vpop.f32.mrb[23].mxu1 }
 0x5f9   :  { %v1470_v33 = vrot.slane %v1469_v31, 4 }
 0x5fb   :  { %v1471_v34 = vadd.f32 %v1470_v33, %v1469_v31 }
 0x5fd   :  { %v1472_v35 = vrot.slane %v1471_v34, 2 }
 0x5ff   :  { %v1473_v36 = vadd.f32 %v1472_v35, %v1471_v34 }
 0x601   :  { %v1474_v37 = vrot.slane %v1473_v36, 1 }
 0x603   :  { %v1475_v38 = vadd.f32 %v1474_v37, %v1473_v36 }
 0x605   :  { %1984 = vrsqrt.f32 %v1475_v38  ;;  %vm1478_vm4 = vcmp.eq.f32.partialorder %v1475_v38, inf  ;;  %v1481_v41 = vand.u32 2147483648, %v1475_v38  ;;  %vm1480_vm5 = vcmp.eq.f32.partialorder %v1475_v38, 0.0 }
 0x60f   :  { %v1985_v39 = vpop.eup %1984 }
 0x610   :  { %v1477_v40 = vmul.f32 %v1985_v39, %v1475_v38 }
 0x612   :  { %v1479_v42 = vsel %vm1478_vm4, %v1475_v38, %v1477_v40 }
 0x613   :  { %v1482_v43 = vsel %vm1480_vm5, %v1481_v41, %v1479_v42 }
 0x614   :  { %1483 = vst [vmem:[%s2611_s11] sm:$0x1] %v1482_v43 }
 0x615   :  { %2030 = dma.done.wait [#allocation3], 128  }
 0x616   :  { %2031 = vsyncadd [#allocation3], 4294967168 }
 0x617   :  { %2032 = dma.done.wait [#allocation5], 32  }
 0x618   :  { %2033 = vsyncadd [#allocation5], 4294967264 }
 0x619   :  { %1514 = vsyncpa [#allocation3], 1 }
 0x61a   :  { %1515 = vsyncpa [#allocation5], 1 }

// kernel: clip_model_forward.7
= control target key start
LH: loop header
LB: loop body
LE: loop exit
PB: predicated region body
PF: predicated region fallthrough
CT: control target
= control target key end

     0   :  { %s2578_s25 = smov 0   ;;  %s2945_s0 = inlined_call_operand.vmem [shape: f32[2,17,64], index: 0, kind: input, shape index: {}]   ;;  %s2946_s1 = inlined_call_operand.vmem [shape: f32[1,64], index: 1, kind: input, shape index: {}, may-alias: {1,7}]   ;;  %s2947_s2 = inlined_call_operand.vmem [shape: f32[1,64], index: 2, kind: input, shape index: {}, may-alias: {2,6,8,12}]   ;;  %s2948_s3 = inlined_call_operand.vmem [shape: bf16[6,64,32], index: 3, kind: input, shape index: {}]   ;;  %s2949_s4 = inlined_call_operand.vmem [shape: f32[6,1,32], index: 4, kind: input, shape index: {}]   ;;  %s2950_s5 = inlined_call_operand.vmem [shape: bf16[2,32,64], index: 5, kind: input, shape index: {}]   ;;  %s2951_s6 = inlined_call_operand.vmem [shape: f32[1,64], index: 6, kind: input, shape index: {}, may-alias: {2,6,8,12}]   ;;  %s2952_s7 = inlined_call_operand.vmem [shape: f32[1,64], index: 7, kind: input, shape index: {}, may-alias: {1,7}]   ;;  %s2953_s8 = inlined_call_operand.vmem [shape: f32[1,64], index: 8, kind: input, shape index: {}, may-alias: {2,6,8,12}]   ;;  %s2954_s9 = inlined_call_operand.vmem [shape: bf16[64,256], index: 9, kind: input, shape index: {}]   ;;  %s2955_s10 = inlined_call_operand.vmem [shape: f32[1,256], index: 10, kind: input, shape index: {}]   ;;  %s2956_s11 = inlined_call_operand.vmem [shape: bf16[256,64], index: 11, kind: input, shape index: {}]   ;;  %s2957_s12 = inlined_call_operand.vmem [shape: f32[1,64], index: 12, kind: input, shape index: {}, may-alias: {2,6,8,12}]   ;;  %s2958_s13 = inlined_call_operand.vmem [shape: f32[2,17,64], index: 13, kind: output, shape index: {}]  }
   0x1 LB: > { %s2007_s26 = sadd.s32 4294967295, %s2505_s25   ;;  %p2011_p0 = scmp.ge.s32.totalorder %s2505_s25, 1  ;;  %s2505_s25 = sphi %s2578_s25, %s23_s25  }
   0x2   : > { %p387_p1 = scmp.lt.s32.totalorder %s2505_s25, 3 }
   0x4   : > { %p388_p2 = pnand %p2011_p0, %p387_p1 }
   0x5   : > { %p431_p3 = scmp.lt.s32.totalorder (!%p388_p2), %s2007_s26, 1  ;;  %vm447_vm0 = vcmask (!%p388_p2), 523264   ;;  %vm454_vm1 = vcmask (!%p388_p2), 516096   ;;  %v2383_v21 = vld [vmem:[%s2948_s3] sm:$0xff] (!%p388_p2)   ;;  %v2385_v23 = vld [vmem:[%s2948_s3 + $0x8] sm:$0xff] (!%p388_p2)   ;;  %v2387_v25 = vld [vmem:[%s2948_s3 + $0x10] sm:$0xff] (!%p388_p2)  }
   0x6   : > { %391 = sbr.rel (%p388_p2) target bundleno = 3127 (0xc37), region = 72  ;;  %v2384_v22 = vld [vmem:[%s2948_s3 + $0x40] sm:$0xff] (!%p388_p2)   ;;  %2249 = vmatprep.subr.bf16.mxu0 (!%p388_p2), %v2383_v21  ;;  %v2386_v24 = vld [vmem:[%s2948_s3 + $0x48] sm:$0xff] (!%p388_p2)   ;;  %v2388_v26 = vld [vmem:[%s2948_s3 + $0x50] sm:$0xff] (!%p388_p2)   ;;  %vm784_vm2 = vcmask (!%p388_p2), 261120   ;;  %vm893_vm3 = vcmask (!%p388_p2), 1040384  }
   0x7   : > { %2250 = vmatpush3.bf16.msra.mxu0 (!%p388_p2), %v2383_v21  ;;  %2261 = vmatprep.subr.bf16.mxu1 (!%p388_p2), %v2384_v22  ;;  %v2389_v27 = vld [vmem:[%s2948_s3 + $0x18] sm:$0xff] (!%p388_p2)   ;;  %v2391_v29 = vld [vmem:[%s2948_s3 + $0x80] sm:$0xff] (!%p388_p2)   ;;  %v2392_v55 = vld [vmem:[%s2948_s3 + $0x88] sm:$0xff] (!%p388_p2)   ;;  %vm848_vm4 = vcmask (!%p388_p2), 138240   ;;  %vm855_vm5 = vcmask (!%p388_p2), 131072  }
   0x8   : > { %2262 = vmatpush3.bf16.msra.mxu1 (!%p388_p2), %v2384_v22  ;;  %2251 = vmatprep.subr.bf16.mxu0 (!%p388_p2), %v2385_v23  ;;  %v2390_v28 = vld [vmem:[%s2948_s3 + $0x58] sm:$0xff] (!%p388_p2)   ;;  %v2014_v41 = vld [vmem:[%s2946_s1] ss:$0 sm:$0xff] (!%p388_p2)  ;;  %v2393_v56 = vld [vmem:[%s2948_s3 + $0x90] sm:$0xff] (!%p388_p2)  }
   0x9   : > { %2263 = vmatprep.subr.bf16.mxu1 (!%p388_p2), %v2386_v24  ;;  %v2015_v47 = vld [vmem:[%s2947_s2] ss:$0 sm:$0xff] (!%p388_p2)  ;;  %v2394_v57 = vld [vmem:[%s2948_s3 + $0x98] sm:$0xff] (!%p388_p2)   ;;  %v2032_v60 = vld [vmem:[%s2949_s4 + $0x2] ss:$0 sm:$0xff] (!%p388_p2) }
   0xa   : > { %v2016_v61 = vld [vmem:[%s2949_s4] ss:$0 sm:$0xff] (!%p388_p2) }
   0xb   : > { %2252 = vmatpush3.bf16.msra.mxu0 (!%p388_p2), %v2385_v23 }
   0xc   : > { %2264 = vmatpush3.bf16.msra.mxu1 (!%p388_p2), %v2386_v24  ;;  %2253 = vmatprep.subr.bf16.mxu0 (!%p388_p2), %v2387_v25 }
   0xd   : > { %s2960_s26 = smov (!%p431_p3, %s2007_s26), 1  ;;  %2265 = vmatprep.subr.bf16.mxu1 %v2388_v26 }
   0xe   : > { %s2373_s27 = smul.u32 24, %s2960_s26 }
   0xf   : > { %2254 = vmatpush3.bf16.msra.mxu0 %v2387_v25 }
  0x10   : > { %s435_s30 = scalar_lea.vmem %s2945_s0, %s2373_s27  ;;  %2266 = vmatpush3.bf16.msra.mxu1 %v2388_v26  ;;  %2255 = vmatprep.subr.bf16.mxu0 %v2389_v27  ;;  %s440_s20 = scalar_lea.vmem %s2958_s13, %s2373_s27 }
  0x11   : > { %v2594_v0 = vld [vmem:[%s435_s30] sm:$0xff]  ;;  %v2596_v1 = vld [vmem:[%s435_s30 + $0x10] sm:$0x1]  ;;  %v2598_v2 = vld [vmem:[%s435_s30 + $0x8] sm:$0xff]  ;;  %2267 = vmatprep.subr.bf16.mxu1 %v2390_v28 }
  0x12   : > { %v448_v3 = vsel %vm447_vm0, %v2594_v0, 0.0  ;;  %v455_v4 = vsel %vm454_vm1, %v2596_v1, 0.0  ;;  %v451_v5 = vsel %vm447_vm0, %v2598_v2, 0.0 }
  0x13   : > { %449 = vadd.xlane.f32.xlu0 %v448_v3  ;;  %456 = vadd.xlane.f32.xlu1 %v455_v4 }
  0x14   : > { %2256 = vmatpush3.bf16.msra.mxu0 %v2389_v27  ;;  %2268 = vmatpush3.bf16.msra.mxu1 %v2390_v28  ;;  %v2507_v28 = vmov 0  }
  0x15   : > { %2273 = vmatprep.subr.bf16.mxu0 %v2391_v29 }
  0x17   : > { %452 = vadd.xlane.f32.xlu0 %v451_v5 }
  0xa0   : > { %v450_v6 = vpop.xlane.xlu0 %449  ;;  %v457_v7 = vpop.xlane.xlu1 %456 }
  0xa1   : > { %v459_v8 = vmul.f32 0.015625, %v450_v6  ;;  %v461_v9 = vmul.f32 0.015625, %v457_v7 }
  0xa3   : > { %v462_v10 = vsub.f32 %v2594_v0, %v459_v8  ;;  %v464_v11 = vsub.f32 %v2596_v1, %v461_v9 }
  0xa4   : > { %v453_v12 = vpop.xlane.xlu0 %452 }
  0xa5   : > { %v460_v13 = vmul.f32 0.015625, %v453_v12  ;;  %v465_v14 = vmul.f32 %v462_v10, %v462_v10  ;;  %v467_v15 = vmul.f32 %v464_v11, %v464_v11 }
  0xa7   : > { %v463_v16 = vsub.f32 %v2598_v2, %v460_v13  ;;  %v468_v17 = vsel %vm447_vm0, %v465_v14, 0.0  ;;  %v474_v18 = vsel %vm454_vm1, %v467_v15, 0.0 }
  0xa8   : > { %469 = vadd.xlane.f32.xlu1 %v468_v17  ;;  %v2395_v17 = vld [vmem:[%s2948_s3 + $0x20] sm:$0xff]  }
  0xa9   : > { %v466_v19 = vmul.f32 %v463_v16, %v463_v16 }
  0xab   : > { %v471_v20 = vsel %vm447_vm0, %v466_v19, 0.0 }
  0xac   : > { %475 = vadd.xlane.f32.xlu1 %v474_v18  ;;  %472 = vadd.xlane.f32.xlu0 %v471_v20 }
 0x135   : > { %v470_v30 = vpop.xlane.xlu1 %469 }
 0x136   : > { %v477_v31 = vmul.f32 0.015625, %v470_v30 }
 0x138   : > { %v480_v32 = vadd.f32 1e-05, %v477_v31 }
 0x139   : > { %v476_v33 = vpop.xlane.xlu1 %475  ;;  %v473_v34 = vpop.xlane.xlu0 %472 }
 0x13a   : > { %2439 = vrsqrt.f32 %v480_v32  ;;  %v479_v35 = vmul.f32 0.015625, %v476_v33  ;;  %v478_v36 = vmul.f32 0.015625, %v473_v34  ;;  %v2396_v32 = vld [vmem:[%s2948_s3 + $0x28] sm:$0xff]   ;;  %v2397_v34 = vld [vmem:[%s2948_s3 + $0x30] sm:$0xff]  }
 0x13c   : > { %v482_v37 = vadd.f32 1e-05, %v479_v35  ;;  %v481_v38 = vadd.f32 1e-05, %v478_v36  ;;  %v2398_v35 = vld [vmem:[%s2948_s3 + $0x38] sm:$0xff]   ;;  %v2399_v36 = vld [vmem:[%s2948_s3 + $0xa0] sm:$0xff]  }
 0x13e   : > { %2441 = vrsqrt.f32 %v482_v37  ;;  %v2400_v37 = vld [vmem:[%s2948_s3 + $0xa8] sm:$0xff]  }
 0x13f   : > { %2443 = vrsqrt.f32 %v481_v38  ;;  %v2401_v38 = vld [vmem:[%s2948_s3 + $0xb0] sm:$0xff]  }
 0x144   : > { %v2440_v39 = vpop.eup %2439 }
 0x145   : > { %v486_v40 = vmul.f32 %v2440_v39, %v462_v10  ;;  %v2402_v39 = vld [vmem:[%s2948_s3 + $0xb8] sm:$0xff]  }
 0x147   : > { %v495_v45 = vmul.f32 %v2014_v41, %v486_v40 }
 0x148   : > { %v2442_v42 = vpop.eup %2441 }
 0x149   : > { %v2444_v43 = vpop.eup %2443  ;;  %v488_v44 = vmul.f32 %v2442_v42, %v464_v11  ;;  %v504_v51 = vadd.f32 %v2015_v47, %v495_v45 }
 0x14a   : > { %v487_v46 = vmul.f32 %v2444_v43, %v463_v16  ;;  %v2048_v16 = vld [vmem:[%s2949_s4 + $0x4] ss:$0 sm:$0xff] }
 0x14b   : > { %v497_v48 = vmul.f32 %v2014_v41, %v488_v44 }
 0x14c   : > { %v496_v49 = vmul.f32 %v2014_v41, %v487_v46 }
 0x14d   : > { %v506_v50 = vadd.f32 %v2015_v47, %v497_v48 }
 0x14e   : > { %v505_v52 = vadd.f32 %v2015_v47, %v496_v49 }
 0x14f   : > { %v2645_v53 = vpack.c.bf16 %v506_v50, %v506_v50  ;;  %v2068_v50 = vld [vmem:[%s2949_s4 + $0x1] ss:$0 sm:$0xff] }
 0x150   : > { %v2647_v54 = vpack.c.bf16 %v505_v52, %v504_v51 }
 0x152   : > { %2257 = vmatprep.mubr.msk.bf16.mxu0 %vm447_vm0, %v2647_v54  ;;  %2269 = vmatprep.mubr.msk.bf16.mxu1 %vm447_vm0, %v2647_v54 }
 0x153   : > { %2258 = vmatmul.mubr.msk.bf16.vlgmr.msra.gmra.mrb[0].mxu0 %vm447_vm0, %v2645_v53  ;;  %2270 = vmatmul.mubr.msk.bf16.vlgmr.msra.gmra.mrb[0].mxu1 %vm447_vm0, %v2645_v53 }
 0x154   : > { %2274 = vmatpush3.bf16.msra.mxu0 %v2391_v29  ;;  %2281 = vmatprep.mubr.msk.bf16.mxu0 %vm447_vm0, %v2647_v54  ;;  %v2688_v29 = vsel %vm893_vm3, 65535, %v2507_v28 }
 0x155   : > { %2275 = vmatprep.subr.bf16.mxu0 %v2392_v55 }
 0x158   : > { %2276 = vmatpush3.bf16.msra.mxu0 %v2392_v55 }
 0x159   : > { %2277 = vmatprep.subr.bf16.mxu0 %v2393_v56 }
 0x15c   : > { %2278 = vmatpush3.bf16.msra.mxu0 %v2393_v56 }
 0x15d   : > { %2279 = vmatprep.subr.bf16.mxu0 %v2394_v57 }
 0x160   : > { %2280 = vmatpush3.bf16.msra.mxu0 %v2394_v57 }
 0x163   : > { %2282 = vmatmul.mubr.msk.bf16.vlgmr.msra.gmra.mrb[4].mxu0 %vm447_vm0, %v2645_v53 }
 0x226   : > { %v2259_v58 = vpop.f32.mrb[0].mxu0  ;;  %v2271_v59 = vpop.f32.mrb[0].mxu1 }
 0x227   : > { %v588_v62 = vpop.f32.mrb[1].mxu0  ;;  %v677_v63 = vpop.f32.mrb[1].mxu1  ;;  %v686_v5 = vadd.f32 %v2271_v59, %v2032_v60  ;;  %v597_v22 = vadd.f32 %v2259_v58, %v2016_v61 }
 0x228   : > { %v2260_v3 = vpop.f32.mrb[2].mxu0  ;;  %v2272_v4 = vpop.f32.mrb[2].mxu1  ;;  %v589_v8 = vadd.f32 %v2016_v61, %v588_v62  ;;  %v678_v9 = vadd.f32 %v2032_v60, %v677_v63  ;;  %v2740_v62 = vld [vmem:[%s2949_s4 + $0x5] ss:$0 sm:$0xff] }
 0x229   : > { %v591_v6 = vpop.f32.mrb[3].mxu0  ;;  %v680_v7 = vpop.f32.mrb[3].mxu1  ;;  %v783_v14 = vpack.c.bf16 %v686_v5, %v686_v5  ;;  %v781_v30 = vpack.c.bf16 %v597_v22, %v597_v22 }
 0x22a   : > { %v592_v10 = vadd.f32 %v2016_v61, %v591_v6  ;;  %v681_v11 = vadd.f32 %v2032_v60, %v680_v7 }
 0x22b   : > { %v795_v18 = vsel %vm784_vm2, %v783_v14, 0 }
 0x22c   : > { %v780_v12 = vpack.c.bf16 %v592_v10, %v589_v8  ;;  %v782_v13 = vpack.c.bf16 %v681_v11, %v678_v9 }
 0x22e   : > { %2369 = vmatprep.subr.msk.bf16.mxu1 %vm784_vm2, %v782_v13  ;;  %2289 = vmatprep.mubr.msk.bf16.mxu1 %vm784_vm2, %v780_v12  ;;  %v792_v15 = vsel %vm784_vm2, %v782_v13, 0 }
 0x22f   : > { %2286 = vmatpush3.bf16.xpose.msra.mxu1 %v792_v15 }
 0x230   : > { %2370 = vmatprep.subr.msk.bf16.mxu1 %vm784_vm2, %v783_v14 }
 0x236   : > { %v2283_v19 = vpop.f32.mrb[4].mxu0 }
 0x237   : > { %v775_v20 = vadd.f32 %v2283_v19, %v2048_v16  ;;  %v766_v21 = vpop.f32.mrb[5].mxu0  ;;  %2288 = vmatpush3.bf16.xpose.msra.mxu1 %v795_v18 }
 0x238   : > { %v2284_v23 = vpop.f32.mrb[6].mxu0  ;;  %2301 = vmatprep.subr.bf16.mxu1 %v2395_v17  ;;  %v767_v26 = vadd.f32 %v2048_v16, %v766_v21 }
 0x239   : > { %v769_v24 = vpop.f32.mrb[7].mxu0  ;;  %v886_v25 = vpack.c.bf16 %v775_v20, %v775_v20  ;;  %v2403_v23 = vld [vmem:[%s2948_s3 + $0x60] sm:$0xff]  }
 0x23a   : > { %v770_v27 = vadd.f32 %v2048_v16, %v769_v24  ;;  %v2407_v24 = vld [vmem:[%s2950_s5] sm:$0xff]  }
 0x23b   : > { %v897_v33 = vand.u32 %v2688_v29, %v886_v25 }
 0x23c   : > { %v885_v31 = vpack.c.bf16 %v770_v27, %v767_v26 }
 0x23e   : > { %2293 = vmatprep.subr.bf16.mxu0 %v885_v31  ;;  %2290 = vmatmul.mubr.msk.bf16.vlgmr.msra.gmra.mrb[4].mxu1 %vm784_vm2, %v781_v30 }
 0x23f   : > { %2294 = vmatpush3.bf16.msra.mxu0 %v885_v31  ;;  %2302 = vmatpush3.bf16.msra.mxu1 %v2395_v17 }
 0x240   : > { %2295 = vmatprep.subr.bf16.mxu0 %v897_v33  ;;  %2309 = vmatprep.mubr.msk.bf16.mxu1 %vm447_vm0, %v2647_v54 }
 0x241   : > { %2303 = vmatprep.subr.bf16.mxu1 %v2396_v32 }
 0x243   : > { %2296 = vmatpush3.bf16.msra.mxu0 %v897_v33  ;;  %2304 = vmatpush3.bf16.msra.mxu1 %v2396_v32 }
 0x244   : > { %2305 = vmatprep.subr.bf16.mxu1 %v2397_v34  ;;  %2313 = vmatprep.subr.bf16.mxu0 %v2403_v23 }
 0x247   : > { %2306 = vmatpush3.bf16.msra.mxu1 %v2397_v34 }
 0x248   : > { %2307 = vmatprep.subr.bf16.mxu1 %v2398_v35 }
 0x24b   : > { %2308 = vmatpush3.bf16.msra.mxu1 %v2398_v35 }
 0x24c   : > { %2325 = vmatprep.subr.bf16.mxu1 %v2399_v36 }
 0x24e   : > { %2310 = vmatmul.mubr.msk.bf16.vlgmr.msra.gmra.mrb[8].mxu1 %vm447_vm0, %v2645_v53 }
 0x24f   : > { %2326 = vmatpush3.bf16.msra.mxu1 %v2399_v36  ;;  %2333 = vmatprep.mubr.msk.bf16.mxu1 %vm447_vm0, %v2647_v54 }
 0x250   : > { %2327 = vmatprep.subr.bf16.mxu1 %v2400_v37 }
 0x253   : > { %2328 = vmatpush3.bf16.msra.mxu1 %v2400_v37 }
 0x254   : > { %2329 = vmatprep.subr.bf16.mxu1 %v2401_v38 }
 0x257   : > { %2330 = vmatpush3.bf16.msra.mxu1 %v2401_v38  ;;  %v2404_v38 = vld [vmem:[%s2948_s3 + $0x68] sm:$0xff]  }
 0x258   : > { %2331 = vmatprep.subr.bf16.mxu1 %v2402_v39 }
 0x25b   : > { %2332 = vmatpush3.bf16.msra.mxu1 %v2402_v39  ;;  %v2405_v39 = vld [vmem:[%s2948_s3 + $0x70] sm:$0xff]  }
 0x25c   : > { %2361 = vmatprep.subr.bf16.mxu1 %v2407_v24 }
 0x25e   : > { %2334 = vmatmul.mubr.msk.bf16.vlgmr.msra.gmra.mrb[12].mxu1 %vm447_vm0, %v2645_v53 }
 0x25f   : > { %2362 = vmatpush3.bf16.msra.mxu1 %v2407_v24 }
 0x311   : > { %v2291_v40 = vpop.f32.mrb[4].mxu1 }
 0x312   : > { %v831_v41 = vpop.f32.mrb[5].mxu1  ;;  %v847_v45 = vmul.f32 0.17677669, %v2291_v40  ;;  %v2406_v40 = vld [vmem:[%s2948_s3 + $0x78] sm:$0xff]  }
 0x313   : > { %v845_v42 = vmul.f32 0.17677669, %v831_v41  ;;  %v2292_v43 = vpop.f32.mrb[6].mxu1 }
 0x314   : > { %v834_v44 = vpop.f32.mrb[7].mxu1  ;;  %v856_v49 = vsel %vm855_vm5, %v847_v45, -inf }
 0x315   : > { %v846_v46 = vmul.f32 0.17677669, %v834_v44  ;;  %v849_v47 = vsel %vm848_vm4, %v845_v42, -inf }
 0x316   : > { %850 = vmax.xlane.f32.xlu0 %v849_v47  ;;  %v2084_v47 = vld [vmem:[%s2949_s4 + $0x3] ss:$0 sm:$0xff] }
 0x317   : > { %v852_v48 = vsel %vm848_vm4, %v846_v46, -inf }
 0x318   : > { %853 = vmax.xlane.f32.xlu1 %v852_v48 }
 0x31a   : > { %857 = vmax.xlane.f32.xlu0 %v856_v49 }
 0x321   : > { %v2311_v51 = vpop.f32.mrb[8].mxu1 }
 0x322   : > { %v2727_v52 = vadd.f32 %v2311_v51, %v2068_v50  ;;  %v1028_v55 = vpop.f32.mrb[9].mxu1 }
 0x323   : > { %v2312_v56 = vpop.f32.mrb[10].mxu1  ;;  %v2729_v58 = vadd.f32 %v2068_v50, %v1028_v55 }
 0x324   : > { %v1031_v57 = vpop.f32.mrb[11].mxu1 }
 0x325   : > { %v2731_v59 = vadd.f32 %v2068_v50, %v1031_v57 }
 0x327   : > { %v1220_v60 = vpack.c.bf16 %v2731_v59, %v2729_v58 }
 0x331   : > { %v2735_v61 = vpop.f32.mrb[12].mxu1 }
 0x332   : > { %v1206_v63 = vpop.f32.mrb[13].mxu1 }
 0x333   : > { %v2336_v3 = vpop.f32.mrb[14].mxu1  ;;  %v1207_v5 = vadd.f32 %v2740_v62, %v1206_v63 }
 0x334   : > { %v1209_v4 = vpop.f32.mrb[15].mxu1 }
 0x335   : > { %v1210_v6 = vadd.f32 %v2740_v62, %v1209_v4  ;;  %v1221_v4 = vpack.c.bf16 %v2727_v52, %v2727_v52 }
 0x337   : > { %v2744_v7 = vpack.c.bf16 %v1210_v6, %v1207_v5 }
 0x3a3   : > { %v851_v8 = vpop.xlane.xlu0 %850 }
 0x3a4   : > { %v859_v9 = vsub.f32 %v845_v42, %v851_v8 }
 0x3a5   : > { %v854_v10 = vpop.xlane.xlu1 %853 }
 0x3a6   : > { %v862_v11 = vmul.f32 1.442695, %v859_v9  ;;  %v860_v12 = vsub.f32 %v846_v46, %v854_v10 }
 0x3a7   : > { %v858_v13 = vpop.xlane.xlu0 %857 }
 0x3a8   : > { %2445 = vpow2.f32 %v862_v11  ;;  %v864_v14 = vmul.f32 1.442695, %v860_v12  ;;  %v861_v15 = vsub.f32 %v847_v45, %v858_v13 }
 0x3aa   : > { %2447 = vpow2.f32 %v864_v14  ;;  %v866_v16 = vmul.f32 1.442695, %v861_v15 }
 0x3ac   : > { %2449 = vpow2.f32 %v866_v16 }
 0x3b2   : > { %v2446_v17 = vpop.eup %2445 }
 0x3b3   : > { %v868_v18 = vsel %vm848_vm4, %v2446_v17, 0.0 }
 0x3b4   : > { %v2448_v19 = vpop.eup %2447  ;;  %869 = vadd.xlane.f32.xlu1 %v868_v18 }
 0x3b5   : > { %v871_v20 = vsel %vm848_vm4, %v2448_v19, 0.0 }
 0x3b6   : > { %v2450_v21 = vpop.eup %2449  ;;  %872 = vadd.xlane.f32.xlu0 %v871_v20 }
 0x3b7   : > { %v874_v22 = vsel %vm855_vm5, %v2450_v21, 0.0 }
 0x3b8   : > { %875 = vadd.xlane.f32.xlu1 %v874_v22 }
 0x441   : > { %v870_v25 = vpop.xlane.xlu1 %869 }
 0x442   : > { %2451 = vrcp.f32 %v870_v25 }
 0x443   : > { %v873_v26 = vpop.xlane.xlu0 %872 }
 0x444   : > { %2453 = vrcp.f32 %v873_v26 }
 0x445   : > { %v876_v27 = vpop.xlane.xlu1 %875 }
 0x446   : > { %2455 = vrcp.f32 %v876_v27 }
 0x44c   : > { %v2452_v30 = vpop.eup %2451 }
 0x44d   : > { %v880_v32 = vmul.f32 %v2452_v30, %v2446_v17 }
 0x44e   : > { %v2454_v31 = vpop.eup %2453 }
 0x44f   : > { %v881_v33 = vmul.f32 %v2454_v31, %v2448_v19 }
 0x450   : > { %v2456_v34 = vpop.eup %2455 }
 0x451   : > { %v882_v35 = vmul.f32 %v2456_v34, %v2450_v21  ;;  %v883_v36 = vpack.c.bf16 %v881_v33, %v880_v32  ;;  %v2409_v33 = vld [vmem:[%s2950_s5 + $0x10] sm:$0xff]  }
 0x453   : > { %2297 = vmatprep.mubr.msk.bf16.mxu0 %vm848_vm4, %v883_v36  ;;  %v884_v37 = vpack.c.bf16 %v882_v35, %v882_v35 }
 0x455   : > { %2298 = vmatmul.mubr.msk.bf16.vlgmr.msra.gmra.mrb[8].mxu0 %vm848_vm4, %v884_v37 }
 0x456   : > { %2314 = vmatpush3.bf16.msra.mxu0 %v2403_v23  ;;  %2321 = vmatprep.mubr.msk.bf16.mxu0 %vm447_vm0, %v2647_v54  ;;  %v2408_v54 = vld [vmem:[%s2950_s5 + $0x8] sm:$0xff]  }
 0x457   : > { %2315 = vmatprep.subr.bf16.mxu0 %v2404_v38  ;;  %2363 = vmatprep.subr.bf16.mxu1 %v2408_v54 }
 0x458   : > { %2364 = vmatpush3.bf16.msra.mxu1 %v2408_v54 }
 0x45a   : > { %2316 = vmatpush3.bf16.msra.mxu0 %v2404_v38 }
 0x45b   : > { %2317 = vmatprep.subr.bf16.mxu0 %v2405_v39 }
 0x45e   : > { %2318 = vmatpush3.bf16.msra.mxu0 %v2405_v39 }
 0x45f   : > { %2319 = vmatprep.subr.bf16.mxu0 %v2406_v40 }
 0x462   : > { %2320 = vmatpush3.bf16.msra.mxu0 %v2406_v40 }
 0x465   : > { %2322 = vmatmul.mubr.msk.bf16.vlgmr.msra.gmra.mrb[12].mxu0 %vm447_vm0, %v2645_v53 }
 0x466   : > { %2341 = vmatprep.mubr.msk.bf16.mxu0 %vm784_vm2, %v1220_v60  ;;  %v1215_v60 = vadd.f32 %v2735_v61, %v2740_v62 }
 0x468   : > { %v1323_v3 = vpack.c.bf16 %v1215_v60, %v1215_v60 }
 0x46a   : > { %v1331_v5 = vand.u32 %v1323_v3, %v2688_v29 }
 0x528   : > { %v2299_v41 = vpop.f32.mrb[8].mxu0 }
 0x529   : > { %v933_v42 = vpop.f32.mrb[9].mxu0  ;;  %v948_v46 = vpack.c.bf16 %v2299_v41, %v2299_v41 }
 0x52a   : > { %v2300_v43 = vpop.f32.mrb[10].mxu0 }
 0x52b   : > { %v936_v44 = vpop.f32.mrb[11].mxu0 }
 0x52c   : > { %v947_v45 = vpack.c.bf16 %v936_v44, %v933_v42  ;;  %v2410_v44 = vld [vmem:[%s2950_s5 + $0x18] sm:$0xff]  }
 0x52e   : > { %2365 = vmatprep.mubr.msk.bf16.mxu1 %vm784_vm2, %v947_v45 }
 0x52f   : > { %2366 = vmatmul.mubr.msk.bf16.vlgmr.msra.gmra.mrb[16].mxu1 %vm784_vm2, %v948_v46 }
 0x538   : > { %v2323_v53 = vpop.f32.mrb[12].mxu0 }
 0x539   : > { %v1117_v48 = vpop.f32.mrb[13].mxu0  ;;  %v1126_v51 = vadd.f32 %v2323_v53, %v2084_v47 }
 0x53a   : > { %v2324_v49 = vpop.f32.mrb[14].mxu0  ;;  %v1118_v55 = vadd.f32 %v2084_v47, %v1117_v48 }
 0x53b   : > { %v1120_v50 = vpop.f32.mrb[15].mxu0  ;;  %v1223_v58 = vpack.c.bf16 %v1126_v51, %v1126_v51 }
 0x53c   : > { %v1121_v56 = vadd.f32 %v2084_v47, %v1120_v50 }
 0x53d   : > { %v1234_v63 = vsel %vm784_vm2, %v1223_v58, 0 }
 0x53e   : > { %v1222_v57 = vpack.c.bf16 %v1121_v56, %v1118_v55 }
 0x540   : > { %2371 = vmatprep.subr.msk.bf16.mxu0 %vm784_vm2, %v1222_v57  ;;  %v1231_v59 = vsel %vm784_vm2, %v1222_v57, 0 }
 0x541   : > { %2338 = vmatpush3.bf16.xpose.msra.mxu0 %v1231_v59 }
 0x542   : > { %2372 = vmatprep.subr.msk.bf16.mxu0 %vm784_vm2, %v1223_v58  ;;  %v2123_v58 = vld [vmem:[%s2951_s6] ss:$0 sm:$0xff] }
 0x549   : > { %2340 = vmatpush3.bf16.xpose.msra.mxu0 %v1234_v63 }
 0x54a   : > { %2345 = vmatprep.subr.bf16.mxu0 %v2744_v7 }
 0x550   : > { %2342 = vmatmul.mubr.msk.bf16.vlgmr.msra.gmra.mrb[16].mxu0 %vm784_vm2, %v1221_v4 }
 0x551   : > { %2346 = vmatpush3.bf16.msra.mxu0 %v2744_v7 }
 0x552   : > { %2347 = vmatprep.subr.bf16.mxu0 %v1331_v5 }
 0x555   : > { %2348 = vmatpush3.bf16.msra.mxu0 %v1331_v5 }
 0x556   : > { %2353 = vmatprep.subr.bf16.mxu0 %v2409_v33 }
 0x602   : > { %v2794_v6 = vpop.f32.mrb[16].mxu1 }
 0x603   : > { %v2796_v61 = vpop.f32.mrb[17].mxu1 }
 0x604   : > { %v2368_v62 = vpop.f32.mrb[18].mxu1 }
 0x605   : > { %v2798_v8 = vpop.f32.mrb[19].mxu1 }
 0x623   : > { %v2343_v9 = vpop.f32.mrb[16].mxu0 }
 0x624   : > { %v1270_v10 = vpop.f32.mrb[17].mxu0  ;;  %v1286_v13 = vmul.f32 0.17677669, %v2343_v9 }
 0x625   : > { %v1284_v11 = vmul.f32 0.17677669, %v1270_v10  ;;  %v2344_v12 = vpop.f32.mrb[18].mxu0 }
 0x626   : > { %v1273_v52 = vpop.f32.mrb[19].mxu0  ;;  %v1293_v15 = vsel %vm855_vm5, %v1286_v13, -inf }
 0x627   : > { %v1285_v29 = vmul.f32 0.17677669, %v1273_v52  ;;  %v1287_v14 = vsel %vm848_vm4, %v1284_v11, -inf }
 0x628   : > { %1288 = vmax.xlane.f32.xlu0 %v1287_v14 }
 0x629   : > { %v1290_v7 = vsel %vm848_vm4, %v1285_v29, -inf }
 0x62a   : > { %1291 = vmax.xlane.f32.xlu1 %v1290_v7 }
 0x62c   : > { %1294 = vmax.xlane.f32.xlu0 %v1293_v15 }
 0x6b5   : > { %v1289_v16 = vpop.xlane.xlu0 %1288 }
 0x6b6   : > { %v1296_v17 = vsub.f32 %v1284_v11, %v1289_v16 }
 0x6b7   : > { %v1292_v18 = vpop.xlane.xlu1 %1291 }
 0x6b8   : > { %v1299_v19 = vmul.f32 1.442695, %v1296_v17  ;;  %v1297_v20 = vsub.f32 %v1285_v29, %v1292_v18 }
 0x6b9   : > { %v1295_v21 = vpop.xlane.xlu0 %1294 }
 0x6ba   : > { %2457 = vpow2.f32 %v1299_v19  ;;  %v1301_v22 = vmul.f32 1.442695, %v1297_v20  ;;  %v1298_v23 = vsub.f32 %v1286_v13, %v1295_v21  ;;  %v2413_v19 = vld [vmem:[%s2954_s9 + $0x4] ss:$8 sps:$4 sm:$0xff]   ;;  %v2411_v20 = vld [vmem:[%s2954_s9] ss:$8 sps:$4 sm:$0xff]  }
 0x6bb   : > { %v2416_v21 = vld [vmem:[%s2954_s9 + $0x14] ss:$8 sps:$4 sm:$0xff]  }
 0x6bc   : > { %2459 = vpow2.f32 %v1301_v22  ;;  %v1303_v24 = vmul.f32 1.442695, %v1298_v23  ;;  %v2414_v22 = vld [vmem:[%s2954_s9 + $0x10] ss:$8 sps:$4 sm:$0xff]   ;;  %v2419_v23 = vld [vmem:[%s2954_s9 + $0x24] ss:$8 sps:$4 sm:$0xff]  }
 0x6be   : > { %2461 = vpow2.f32 %v1303_v24  ;;  %v2417_v24 = vld [vmem:[%s2954_s9 + $0x20] ss:$8 sps:$4 sm:$0xff]  }
 0x6c4   : > { %v2458_v25 = vpop.eup %2457 }
 0x6c5   : > { %v1305_v26 = vsel %vm848_vm4, %v2458_v25, 0.0 }
 0x6c6   : > { %v2460_v27 = vpop.eup %2459  ;;  %1306 = vadd.xlane.f32.xlu1 %v1305_v26  ;;  %v2422_v26 = vld [vmem:[%s2954_s9 + $0x34] ss:$8 sps:$4 sm:$0xff]  }
 0x6c7   : > { %v1308_v30 = vsel %vm848_vm4, %v2460_v27, 0.0 }
 0x6c8   : > { %v2462_v31 = vpop.eup %2461  ;;  %1309 = vadd.xlane.f32.xlu0 %v1308_v30 }
 0x6c9   : > { %v1311_v32 = vsel %vm855_vm5, %v2462_v31, 0.0 }
 0x6ca   : > { %1312 = vadd.xlane.f32.xlu1 %v1311_v32 }
 0x753   : > { %v1307_v34 = vpop.xlane.xlu1 %1306 }
 0x754   : > { %2463 = vrcp.f32 %v1307_v34 }
 0x755   : > { %v1310_v35 = vpop.xlane.xlu0 %1309 }
 0x756   : > { %2465 = vrcp.f32 %v1310_v35 }
 0x757   : > { %v1313_v36 = vpop.xlane.xlu1 %1312 }
 0x758   : > { %2467 = vrcp.f32 %v1313_v36 }
 0x75e   : > { %v2464_v37 = vpop.eup %2463 }
 0x75f   : > { %v1317_v39 = vmul.f32 %v2464_v37, %v2458_v25  ;;  %v2420_v25 = vld [vmem:[%s2954_s9 + $0x30] ss:$8 sps:$4 sm:$0xff]  }
 0x760   : > { %v2466_v38 = vpop.eup %2465 }
 0x761   : > { %v1318_v40 = vmul.f32 %v2466_v38, %v2460_v27 }
 0x762   : > { %v2468_v54 = vpop.eup %2467 }
 0x763   : > { %v1319_v41 = vmul.f32 %v2468_v54, %v2462_v31  ;;  %v1320_v42 = vpack.c.bf16 %v1318_v40, %v1317_v39  ;;  %v2124_v39 = vld [vmem:[%s2952_s7] ss:$0 sm:$0xff] }
 0x765   : > { %2349 = vmatprep.mubr.msk.bf16.mxu0 %vm848_vm4, %v1320_v42  ;;  %v1321_v43 = vpack.c.bf16 %v1319_v41, %v1319_v41 }
 0x767   : > { %2350 = vmatmul.mubr.msk.bf16.vlgmr.msra.gmra.mrb[20].mxu0 %vm848_vm4, %v1321_v43 }
 0x768   : > { %2354 = vmatpush3.bf16.msra.mxu0 %v2409_v33 }
 0x769   : > { %2355 = vmatprep.subr.bf16.mxu0 %v2410_v44 }
 0x76c   : > { %2356 = vmatpush3.bf16.msra.mxu0 %v2410_v44  ;;  %v2125_v44 = vld [vmem:[%s2953_s8] ss:$0 sm:$0xff] }
 0x76d   : > { %1660 = vmatprep.subr.bf16.mxu0 %v2413_v19 }
 0x83a   : > { %v2351_v45 = vpop.f32.mrb[20].mxu0 }
 0x83b   : > { %v1367_v46 = vpop.f32.mrb[21].mxu0  ;;  %v1382_v49 = vpack.c.bf16 %v2351_v45, %v2351_v45 }
 0x83c   : > { %v2352_v53 = vpop.f32.mrb[22].mxu0 }
 0x83d   : > { %v1370_v47 = vpop.f32.mrb[23].mxu0 }
 0x83e   : > { %v1381_v48 = vpack.c.bf16 %v1370_v47, %v1367_v46 }
 0x840   : > { %2357 = vmatprep.mubr.msk.bf16.mxu0 %vm784_vm2, %v1381_v48 }
 0x841   : > { %2358 = vmatmul.mubr.msk.bf16.vlgmr.msra.gmra.mrb[24].mxu0 %vm784_vm2, %v1382_v49 }
 0x842   : > { %1692 = vmatprep.mubr.bf16.mxu0 %v2507_v28  ;;  %1661 = vmatpush1.bf16.msra.mxu0 %v2411_v20 }
 0x843   : > { %1662 = vmatprep.subr.bf16.mxu0 %v2416_v21 }
 0x846   : > { %1663 = vmatpush1.bf16.msra.mxu0 %v2414_v22 }
 0x847   : > { %1664 = vmatprep.subr.bf16.mxu0 %v2419_v23 }
 0x84a   : > { %1665 = vmatpush1.bf16.msra.mxu0 %v2417_v24 }
 0x84b   : > { %1666 = vmatprep.subr.bf16.mxu0 %v2422_v26 }
 0x84e   : > { %1667 = vmatpush1.bf16.msra.mxu0 %v2420_v25 }
 0x914   : > { %v2359_v50 = vpop.f32.mrb[24].mxu0 }
 0x915   : > { %v1515_v51 = vadd.f32 %v2794_v6, %v2359_v50  ;;  %v1440_v55 = vpop.f32.mrb[25].mxu0 }
 0x916   : > { %v1507_v56 = vadd.f32 %v2796_v61, %v1440_v55  ;;  %v2360_v57 = vpop.f32.mrb[26].mxu0  ;;  %v2423_v55 = vld [vmem:[%s2956_s11 + $0x40] sm:$0xff]  }
 0x917   : > { %v1443_v59 = vpop.f32.mrb[27].mxu0  ;;  %v1522_v60 = vadd.f32 %v1515_v51, %v2596_v1  ;;  %2221 = vmatprep.subr.bf16.mxu1 %v2423_v55  ;;  %v2425_v57 = vld [vmem:[%s2956_s11 + $0x48] sm:$0xff]  }
 0x918   : > { %v1520_v63 = vadd.f32 %v1507_v56, %v2594_v0  ;;  %v1510_v3 = vadd.f32 %v2798_v8, %v1443_v59  ;;  %v2424_v56 = vld [vmem:[%s2956_s11] sm:$0xff]   ;;  %v2428_v59 = vld [vmem:[%s2956_s11 + $0x10] sm:$0xff]  }
 0x919   : > { %v2828_v6 = vadd.f32 %v2123_v58, %v1522_v60  ;;  %2222 = vmatpush3.bf16.msra.mxu1 %v2424_v56  ;;  %v2429_v60 = vld [vmem:[%s2956_s11 + $0x58] sm:$0xff]  }
 0x91a   : > { %v2825_v4 = vadd.f32 %v2123_v58, %v1520_v63  ;;  %v1521_v5 = vadd.f32 %v1510_v3, %v2598_v2  ;;  %2223 = vmatprep.subr.bf16.mxu1 %v2425_v57  ;;  %v2430_v63 = vld [vmem:[%s2956_s11 + $0x18] sm:$0xff]   ;;  %v2431_v3 = vld [vmem:[%s2956_s11 + $0x60] sm:$0xff]  }
 0x91b   : > { %v1541_v0 = vsel %vm454_vm1, %v2828_v6, 0.0 }
 0x91c   : > { %v2830_v62 = vadd.f32 %v2123_v58, %v1521_v5  ;;  %v1535_v61 = vsel %vm447_vm0, %v2825_v4, 0.0  ;;  %v2427_v58 = vld [vmem:[%s2956_s11 + $0x50] sm:$0xff]   ;;  %v2432_v5 = vld [vmem:[%s2956_s11 + $0x20] sm:$0xff]  }
 0x91d   : > { %1536 = vadd.xlane.f32.xlu0 %v1535_v61  ;;  %v2433_v61 = vld [vmem:[%s2956_s11 + $0x68] sm:$0xff]  }
 0x91e   : > { %v1538_v9 = vsel %vm447_vm0, %v2830_v62, 0.0 }
 0x91f   : > { %1539 = vadd.xlane.f32.xlu1 %v1538_v9  ;;  %v2434_v9 = vld [vmem:[%s2956_s11 + $0x28] sm:$0xff]  }
 0x921   : > { %1542 = vadd.xlane.f32.xlu0 %v1541_v0  ;;  %v2435_v0 = vld [vmem:[%s2956_s11 + $0x70] sm:$0xff]  }
 0x9aa   : > { %v1537_v1 = vpop.xlane.xlu0 %1536 }
 0x9ab   : > { %v1544_v8 = vmul.f32 0.015625, %v1537_v1  ;;  %v2436_v1 = vld [vmem:[%s2956_s11 + $0x30] sm:$0xff]  }
 0x9ac   : > { %v1540_v10 = vpop.xlane.xlu1 %1539 }
 0x9ad   : > { %v1547_v2 = vsub.f32 %v2825_v4, %v1544_v8  ;;  %v1545_v11 = vmul.f32 0.015625, %v1540_v10  ;;  %v2437_v8 = vld [vmem:[%s2956_s11 + $0x78] sm:$0xff]  }
 0x9ae   : > { %v1543_v12 = vpop.xlane.xlu0 %1542  ;;  %v2438_v10 = vld [vmem:[%s2956_s11 + $0x38] sm:$0xff]  }
 0x9af   : > { %v1548_v52 = vsub.f32 %v2830_v62, %v1545_v11  ;;  %v1546_v13 = vmul.f32 0.015625, %v1543_v12  ;;  %v1550_v29 = vmul.f32 %v1547_v2, %v1547_v2 }
 0x9b1   : > { %v1549_v14 = vsub.f32 %v2828_v6, %v1546_v13  ;;  %v1553_v7 = vsel %vm447_vm0, %v1550_v29, 0.0  ;;  %v1551_v15 = vmul.f32 %v1548_v52, %v1548_v52 }
 0x9b2   : > { %1554 = vadd.xlane.f32.xlu1 %v1553_v7 }
 0x9b3   : > { %v1556_v16 = vsel %vm447_vm0, %v1551_v15, 0.0  ;;  %v1552_v17 = vmul.f32 %v1549_v14, %v1549_v14 }
 0x9b4   : > { %1557 = vadd.xlane.f32.xlu0 %v1556_v16 }
 0x9b5   : > { %v1559_v18 = vsel %vm454_vm1, %v1552_v17, 0.0 }
 0x9b6   : > { %1560 = vadd.xlane.f32.xlu1 %v1559_v18 }
 0xa3f   : > { %v1555_v27 = vpop.xlane.xlu1 %1554 }
 0xa40   : > { %v1562_v30 = vmul.f32 0.015625, %v1555_v27 }
 0xa41   : > { %v1558_v31 = vpop.xlane.xlu0 %1557 }
 0xa42   : > { %v1565_v32 = vadd.f32 1e-05, %v1562_v30  ;;  %v1563_v33 = vmul.f32 0.015625, %v1558_v31 }
 0xa43   : > { %v1561_v34 = vpop.xlane.xlu1 %1560 }
 0xa44   : > { %2469 = vrsqrt.f32 %v1565_v32  ;;  %v1566_v35 = vadd.f32 1e-05, %v1563_v33  ;;  %v1564_v36 = vmul.f32 0.015625, %v1561_v34 }
 0xa46   : > { %2471 = vrsqrt.f32 %v1566_v35  ;;  %v1567_v37 = vadd.f32 1e-05, %v1564_v36 }
 0xa48   : > { %2473 = vrsqrt.f32 %v1567_v37 }
 0xa4e   : > { %v2470_v38 = vpop.eup %2469 }
 0xa4f   : > { %v1571_v40 = vmul.f32 %v2470_v38, %v1547_v2  ;;  %v1604_v2 = vlaneseq }
 0xa50   : > { %v2472_v54 = vpop.eup %2471 }
 0xa51   : > { %v1580_v41 = vmul.f32 %v2124_v39, %v1571_v40  ;;  %v1572_v42 = vmul.f32 %v2472_v54, %v1548_v52  ;;  %v1605_v11 = vshrl.u32 %v1604_v2, 7  ;;  %v1602_v52 = vld [vmem:[%s2955_s10] sm:$0x3] }
 0xa52   : > { %v2474_v43 = vpop.eup %2473 }
 0xa53   : > { %v1581_v45 = vmul.f32 %v2124_v39, %v1572_v42  ;;  %v1573_v46 = vmul.f32 %v2474_v43, %v1549_v14  ;;  %v1589_v53 = vadd.f32 %v2125_v44, %v1580_v41  ;;  %v1606_v12 = vsub.s32 0, %v1605_v11 }
 0xa54   : > { %v1610_v13 = vsub.s32 1, %v1605_v11  ;;  %v2142_v11 = vld [vmem:[%s2957_s12] ss:$0 sm:$0xff] }
 0xa55   : > { %v1590_v47 = vadd.f32 %v2125_v44, %v1581_v45  ;;  %v1582_v49 = vmul.f32 %v2124_v39, %v1573_v46  ;;  %v1607_v29 = vrot.slane %v1602_v52, %v1606_v12 }
 0xa56   : > { %v1611_v14 = vrot.slane %v1602_v52, %v1610_v13 }
 0xa57   : > { %v1592_v48 = vpack.c.bf16 %v1590_v47, %v1589_v53  ;;  %v1591_v50 = vadd.f32 %v2125_v44, %v1582_v49 }
 0xa59   : > { %2134 = vmatmul.mubr.msk.bf16.vlgmr.msra.gmra.mrb[28].mxu0 %vm447_vm0, %v1592_v48  ;;  %v1593_v51 = vpack.c.bf16 %v1591_v50, %v1591_v50 }
 0xa5a   : > { %1702 = vmatprep.mubr.bf16.mxu0 %v2507_v28  ;;  %v2426_v28 = vld [vmem:[%s2956_s11 + $0x8] sm:$0xff]  }
 0xa5b   : > { %2224 = vmatpush3.bf16.msra.mxu1 %v2426_v28 }
 0xa5c   : > { %2225 = vmatprep.subr.bf16.mxu1 %v2427_v58 }
 0xa5f   : > { %2226 = vmatpush3.bf16.msra.mxu1 %v2428_v59 }
 0xa60   : > { %2227 = vmatprep.subr.bf16.mxu1 %v2429_v60 }
 0xa61   : > { %2135 = vmatmul.mubr.msk.bf16.gmra.mrb[32].mxu0 %vm447_vm0, %v1593_v51 }
 0xa63   : > { %2228 = vmatpush3.bf16.msra.mxu1 %v2430_v63 }
 0xa64   : > { %2229 = vmatprep.subr.bf16.mxu1 %v2431_v3 }
 0xa67   : > { %2230 = vmatpush3.bf16.msra.mxu1 %v2432_v5 }
 0xa68   : > { %2231 = vmatprep.subr.bf16.mxu1 %v2433_v61 }
 0xa6b   : > { %2232 = vmatpush3.bf16.msra.mxu1 %v2434_v9 }
 0xa6c   : > { %2233 = vmatprep.subr.bf16.mxu1 %v2435_v0 }
 0xa6f   : > { %2234 = vmatpush3.bf16.msra.mxu1 %v2436_v1 }
 0xa70   : > { %2235 = vmatprep.subr.bf16.mxu1 %v2437_v8 }
 0xa73   : > { %2236 = vmatpush3.bf16.msra.mxu1 %v2438_v10 }
 0xb2c   : > { %v1694_v7 = vpop.f32.mrb[28].mxu0 }
 0xb2d   : > { %v1695_v15 = vadd.f32 %v1694_v7, %v1607_v29  ;;  %v1696_v16 = vpop.f32.mrb[29].mxu0 }
 0xb2e   : > { %v1697_v17 = vadd.f32 %v1696_v16, %v1611_v14  ;;  %v1698_v18 = vpop.f32.mrb[30].mxu0 }
 0xb2f   : > { %v2136_v19 = vmul.f32 -1.702, %v1695_v15  ;;  %v1699_v20 = vadd.f32 %v1698_v18, %v1607_v29  ;;  %v1700_v21 = vpop.f32.mrb[31].mxu0 }
 0xb30   : > { %v2137_v22 = vmul.f32 -1.702, %v1697_v17  ;;  %v1701_v23 = vadd.f32 %v1700_v21, %v1611_v14 }
 0xb31   : > { %v1723_v24 = vmul.f32 1.442695, %v2136_v19  ;;  %v2138_v25 = vmul.f32 -1.702, %v1699_v20 }
 0xb32   : > { %v1725_v26 = vmul.f32 1.442695, %v2137_v22  ;;  %v2139_v27 = vmul.f32 -1.702, %v1701_v23 }
 0xb33   : > { %2475 = vpow2.f32 %v1723_v24  ;;  %v1727_v30 = vmul.f32 1.442695, %v2138_v25 }
 0xb34   : > { %2477 = vpow2.f32 %v1725_v26  ;;  %v1729_v31 = vmul.f32 1.442695, %v2139_v27  ;;  %v1704_v32 = vpop.f32.mrb[32].mxu0 }
 0xb35   : > { %2479 = vpow2.f32 %v1727_v30  ;;  %v1705_v33 = vadd.f32 %v1704_v32, %v1607_v29  ;;  %v1706_v34 = vpop.f32.mrb[33].mxu0 }
 0xb36   : > { %2481 = vpow2.f32 %v1729_v31  ;;  %v1707_v35 = vadd.f32 %v1706_v34, %v1611_v14  ;;  %v1708_v36 = vpop.f32.mrb[34].mxu0 }
 0xb37   : > { %v2140_v37 = vmul.f32 -1.702, %v1705_v33  ;;  %v1709_v38 = vpop.f32.mrb[35].mxu0 }
 0xb38   : > { %v2141_v39 = vmul.f32 -1.702, %v1707_v35 }
 0xb39   : > { %v1731_v40 = vmul.f32 1.442695, %v2140_v37 }
 0xb3a   : > { %v1733_v54 = vmul.f32 1.442695, %v2141_v39 }
 0xb3b   : > { %2483 = vpow2.f32 %v1731_v40 }
 0xb3c   : > { %2485 = vpow2.f32 %v1733_v54 }
 0xb3d   : > { %v2476_v41 = vpop.eup %2475 }
 0xb3e   : > { %v2478_v42 = vpop.eup %2477  ;;  %v1735_v43 = vadd.f32 1.0, %v2476_v41 }
 0xb3f   : > { %v2480_v44 = vpop.eup %2479  ;;  %v1736_v45 = vadd.f32 1.0, %v2478_v42 }
 0xb40   : > { %v2482_v46 = vpop.eup %2481  ;;  %2487 = vrcp.f32 %v1735_v43  ;;  %v1737_v53 = vadd.f32 1.0, %v2480_v44 }
 0xb41   : > { %2489 = vrcp.f32 %v1736_v45  ;;  %v1738_v47 = vadd.f32 1.0, %v2482_v46 }
 0xb42   : > { %2491 = vrcp.f32 %v1737_v53 }
 0xb43   : > { %2493 = vrcp.f32 %v1738_v47 }
 0xb45   : > { %v2484_v48 = vpop.eup %2483 }
 0xb46   : > { %v2486_v49 = vpop.eup %2485  ;;  %v1739_v50 = vadd.f32 1.0, %v2484_v48 }
 0xb47   : > { %v1740_v51 = vadd.f32 1.0, %v2486_v49 }
 0xb48   : > { %2495 = vrcp.f32 %v1739_v50 }
 0xb49   : > { %2497 = vrcp.f32 %v1740_v51 }
 0xb4a   : > { %v2488_v55 = vpop.eup %2487 }
 0xb4b   : > { %v2490_v56 = vpop.eup %2489  ;;  %v1753_v58 = vmul.f32 %v2488_v55, %v1695_v15 }
 0xb4c   : > { %v2492_v57 = vpop.eup %2491  ;;  %v1754_v60 = vmul.f32 %v2490_v56, %v1697_v17 }
 0xb4d   : > { %v2494_v28 = vpop.eup %2493  ;;  %v1755_v59 = vmul.f32 %v2492_v57, %v1699_v20 }
 0xb4e   : > { %v1756_v63 = vmul.f32 %v2494_v28, %v1701_v23 }
 0xb4f   : > { %v1759_v3 = vpack.c.bf16 %v1755_v59, %v1753_v58 }
 0xb50   : > { %v1760_v5 = vpack.c.bf16 %v1756_v63, %v1754_v60 }
 0xb52   : > { %v2496_v61 = vpop.eup %2495  ;;  %1930 = vmatprep.mubr.bf16.mxu1 %v1760_v5 }
 0xb53   : > { %v2498_v9 = vpop.eup %2497  ;;  %1931 = vmatmul.mubr.bf16.vlgmr.msra.gmra.mrb[20].mxu1 %v1759_v3  ;;  %v1757_v1 = vmul.f32 %v2496_v61, %v1705_v33 }
 0xb54   : > { %v1758_v0 = vmul.f32 %v2498_v9, %v1707_v35 }
 0xb55   : > { %v1761_v10 = vpack.c.bf16 %v1757_v1, %v1757_v1 }
 0xb56   : > { %v1762_v8 = vpack.c.bf16 %v1758_v0, %v1758_v0 }
 0xb58   : > { %1938 = vmatprep.mubr.bf16.mxu1 %v1762_v8 }
 0xb5b   : > { %1939 = vmatmul.mubr.bf16.gmra.mrb[24].mxu1 %v1761_v10 }
 0xc26   : > { %v2237_v2 = vpop.f32.mrb[20].mxu1 }
 0xc27   : > { %v2238_v12 = vpop.f32.mrb[21].mxu1 }
 0xc28   : > { %v2239_v52 = vadd.f32 %v2238_v12, %v2237_v2  ;;  %v2240_v13 = vpop.f32.mrb[22].mxu1 }
 0xc29   : > { %v2241_v29 = vpop.f32.mrb[23].mxu1 }
 0xc2a   : > { %v1933_v14 = vadd.f32 %v2239_v52, %v2142_v11  ;;  %v2242_v7 = vadd.f32 %v2241_v29, %v2240_v13 }
 0xc2c   : > { %v1946_v15 = vadd.f32 %v1933_v14, %v2825_v4  ;;  %v1936_v16 = vadd.f32 %v2242_v7, %v2142_v11 }
 0xc2e   : > { %1949 = vst.msk [vmem:[%s440_s20] sm:$0xff] %vm447_vm0, %v1946_v15  ;;  %v1947_v17 = vadd.f32 %v1936_v16, %v2830_v62  ;;  %v2243_v18 = vpop.f32.mrb[24].mxu1 }
 0xc2f   : > { %v2244_v19 = vpop.f32.mrb[25].mxu1 }
 0xc30   : > { %1950 = vst.msk [vmem:[%s440_s20 + $0x8] sm:$0xff] %vm447_vm0, %v1947_v17  ;;  %v2245_v20 = vadd.f32 %v2244_v19, %v2243_v18  ;;  %v2246_v21 = vpop.f32.mrb[26].mxu1 }
 0xc31   : > { %v2247_v22 = vpop.f32.mrb[27].mxu1 }
 0xc32   : > { %v1941_v23 = vadd.f32 %v2245_v20, %v2142_v11 }
 0xc34   : > { %v1948_v24 = vadd.f32 %v1941_v23, %v2828_v6 }
 0xc36   : > { %1951 = vst.msk [vmem:[%s440_s20 + $0x10] sm:$0x1] %vm454_vm1, %v1948_v24 }
 0xc37 PF: > { %s23_s25 = sadd.s32 1, %s2505_s25  }
 0xc38   : > { %p20_p4 = scmp.ge.s32.totalorder %s23_s25, 4  }
 0xc3a   :  { %22 = sbr.rel (!%p20_p4) target bundleno = 1 (0x1), region = 113 }

</bundles_post_ra>
